<compile_context>
chip_gen: v7x
topology: tpu7x:2x2x1
jax: 0.10.0
libtpu: 0.0.40
codegen_flags: <defaults>
</compile_context>

<pallas_src>
import functools

import jax
import jax.numpy as jnp
from jax.experimental import pallas as pl
from jax.experimental.pallas import tpu as pltpu

EPS = 1e-5          # torch.nn.LayerNorm default
NEG_INF = -1e30     # finite "-inf": identical softmax where not fully masked, no NaNs


def _ln(x, g, b):
    """LayerNorm over the last dim; stats in f32, rsqrt on the EUP."""
    mu = jnp.mean(x, axis=-1, keepdims=True)
    xc = x - mu
    var = jnp.mean(xc * xc, axis=-1, keepdims=True)
    return xc * jax.lax.rsqrt(var + EPS) * g + b


def _mha(xf, kvf, mbias, wq, bq, wk, bk, wv, bv, wo, bo,
         *, bt, s, skv, h, d_k, d_v):
    """Multi-head attention on a flattened (bt*s, D) query block.

    Projections are single big bf16 MXU matmuls; heads are split once via
    reshape/swapaxes (no per-head lane slicing, no lane-dim concatenate).
    The 1/sqrt(d_k) scale is folded into q (smaller than the score tensor).
    """
    xb = xf.astype(jnp.bfloat16)
    kvb = xb if kvf is xf else kvf.astype(jnp.bfloat16)   # reuse cast for self-att

    scale = 1.0 / float(d_k) ** 0.5
    q = (jnp.dot(xb, wq, preferred_element_type=jnp.float32) + bq) * scale  # (bt*s,   h*d_k)
    k = jnp.dot(kvb, wk, preferred_element_type=jnp.float32) + bk           # (bt*skv, h*d_k)
    v = jnp.dot(kvb, wv, preferred_element_type=jnp.float32) + bv           # (bt*skv, h*d_v)

    # (rows, h*d) -> (bt*h, seq, d): one relayout each instead of h lane slices.
    qh = jnp.swapaxes(q.reshape(bt, s, h, d_k), 1, 2).reshape(bt * h, s, d_k)
    kh = jnp.swapaxes(k.reshape(bt, skv, h, d_k), 1, 2).reshape(bt * h, skv, d_k)
    vh = jnp.swapaxes(v.reshape(bt, skv, h, d_v), 1, 2).reshape(bt * h, skv, d_v)

    sc = jnp.einsum("gqd,gkd->gqk",
                    qh.astype(jnp.bfloat16), kh.astype(jnp.bfloat16),
                    preferred_element_type=jnp.float32)                      # (bt*h, s, skv)
    # additive mask bias (0 / -1e30), broadcast over heads (leading-dim split only)
    sc = (sc.reshape(bt, h, s, skv) + mbias[:, None, :, :]).reshape(bt * h, s, skv)

    m = jnp.max(sc, axis=-1, keepdims=True)                                  # f32 stats
    e = jnp.exp(sc - m)
    p = e * pl.reciprocal(jnp.sum(e, axis=-1, keepdims=True), approx=True)

    o = jnp.einsum("gqk,gkv->gqv",
                   p.astype(jnp.bfloat16), vh.astype(jnp.bfloat16),
                   preferred_element_type=jnp.float32)                       # (bt*h, s, d_v)
    of = jnp.swapaxes(o.reshape(bt, h, s, d_v), 1, 2).reshape(bt * s, h * d_v)
    return jnp.dot(of.astype(jnp.bfloat16), wo,
                   preferred_element_type=jnp.float32) + bo                  # (bt*s, D)


# --------------------------------------------------------------------------
# Fused DecoderLayer kernel (one grid step = Bt batch elements)
# --------------------------------------------------------------------------
def _decoder_layer_kernel(
        x_ref, enc_ref, mbs_ref, mbe_ref, pad_ref,
        # self-attention weights
        wq1, bq1, wk1, bk1, wv1, bv1, wo1, bo1, gi1, bi1, gl1, bl1,
        # encoder-attention weights
        wq2, bq2, wk2, bk2, wv2, bv2, wo2, bo2, gi2, bi2, gl2, bl2,
        # position-wise FFN weights
        wf1, bf1, wf2, bf2, gf, bff,
        out_ref, *, h, d_k, d_v):
    bt, s, d = x_ref.shape
    skv = enc_ref.shape[1]
    rows = bt * s

    x = x_ref[...].reshape(rows, d)                 # (R, D) f32
    pad = pad_ref[...].reshape(rows, 1)             # (R, 1) f32

    # ---- self attention + MHA-internal LN + lnorm1 + pad --------------------
    att = _mha(x, x, mbs_ref[...].astype(jnp.float32),
               wq1[...], bq1[...], wk1[...], bk1[...], wv1[...], bv1[...],
               wo1[...], bo1[...], bt=bt, s=s, skv=s, h=h, d_k=d_k, d_v=d_v)
    sa = _ln(x + att, gi1[...], bi1[...])           # MHA's own residual + LN
    sa = _ln(x + sa, gl1[...], bl1[...]) * pad      # DecoderLayer add1 + lnorm1

    # ---- encoder attention + MHA-internal LN + lnorm2 + pad -----------------
    enc = enc_ref[...].reshape(bt * skv, d)
    att2 = _mha(sa, enc, mbe_ref[...].astype(jnp.float32),
                wq2[...], bq2[...], wk2[...], bk2[...], wv2[...], bv2[...],
                wo2[...], bo2[...], bt=bt, s=s, skv=skv, h=h, d_k=d_k, d_v=d_v)
    ea = _ln(sa + att2, gi2[...], bi2[...])
    ea = _ln(sa + ea, gl2[...], bl2[...]) * pad

    # ---- position-wise feed-forward + LN + pad ------------------------------
    hdn = jnp.dot(ea.astype(jnp.bfloat16), wf1[...],
                  preferred_element_type=jnp.float32) + bf1[...]
    hdn = jnp.maximum(hdn, 0.0)
    y = jnp.dot(hdn.astype(jnp.bfloat16), wf2[...],
                preferred_element_type=jnp.float32) + bf2[...]
    ff = _ln(ea + y, gf[...], bff[...]) * pad

    out_ref[...] = ff.reshape(bt, s, d)


# --------------------------------------------------------------------------
# Wrapper
# --------------------------------------------------------------------------
def _pick_batch_tile(B, S, target_rows=256):
    """Largest divisor of B with ~target_rows rows per grid step."""
    bt = max(1, min(B, target_rows // max(S, 1)))
    while B % bt:
        bt -= 1
    return bt


def decoder_layer_forward(x, enc, mask_pad, mask_self, mask_enc, params,
                          *, h, d_k, d_v):
    B, S, D = x.shape
    Se = enc.shape[1]
    Bt = _pick_batch_tile(B, S)

    # Additive attention-mask biases shipped as bf16 (halves the mask DMA bytes;
    # finite -1e30 avoids NaN on fully-masked rows).
    mb_self = jnp.where(mask_self > 0.5, NEG_INF, 0.0).astype(jnp.bfloat16)
    mb_enc = jnp.where(mask_enc > 0.5, NEG_INF, 0.0).astype(jnp.bfloat16)

    def mha_w(p):
        return [p["wq"].astype(jnp.bfloat16), p["bq"],
                p["wk"].astype(jnp.bfloat16), p["bk"],
                p["wv"].astype(jnp.bfloat16), p["bv"],
                p["wo"].astype(jnp.bfloat16), p["bo"],
                p["g_in"], p["b_in"], p["g_out"], p["b_out"]]

    pw = params["pwff"]
    weights = (mha_w(params["self_att"]) + mha_w(params["enc_att"]) +
               [pw["w1"].astype(jnp.bfloat16), pw["b1"],
                pw["w2"].astype(jnp.bfloat16), pw["b2"], pw["g"], pw["b"]])

    tiled = [x, enc, mb_self, mb_enc, mask_pad]
    tiled_specs = [pl.BlockSpec((Bt,) + a.shape[1:], lambda b: (b, 0, 0))
                   for a in tiled]
    # Weights: full-array blocks, constant index_map -> stay resident across grid.
    weight_specs = [pl.BlockSpec(w.shape, lambda b: (0, 0)) for w in weights]

    # VMEM budget: double-buffered activation blocks + resident weights + headroom
    # for attention intermediates, clamped to [32 MiB, 64 MiB] (above v5e's small
    # scoped default, never above v7x's 64 MiB physical VMEM).
    def nbytes(a, bt=None):
        shape = a.shape if bt is None else (bt,) + a.shape[1:]
        n = 1
        for dim in shape:
            n *= dim
        return n * a.dtype.itemsize
    act = sum(nbytes(a, Bt) for a in tiled) + Bt * S * D * 4
    wts = sum(nbytes(w) for w in weights)
    scores = Bt * h * S * max(S, Se) * 4
    est = 2 * act + 2 * wts + 8 * scores + (1 << 20)
    vmem_limit = int(min(max(est, 32 * 1024 * 1024), 64 * 1024 * 1024))

    kernel = functools.partial(_decoder_layer_kernel, h=h, d_k=d_k, d_v=d_v)
    return pl.pallas_call(
        kernel,
        out_shape=jax.ShapeDtypeStruct((B, S, D), jnp.float32),
        grid=(B // Bt,),
        in_specs=tiled_specs + weight_specs,
        out_specs=pl.BlockSpec((Bt, S, D), lambda b: (b, 0, 0)),
        compiler_params=pltpu.CompilerParams(
            dimension_semantics=("parallel",),        # batch axis is independent
            vmem_limit_bytes=vmem_limit),
    )(*tiled, *weights)


# --------------------------------------------------------------------------
# Deterministic synthetic parameters (shapes from __init__; no checkpoint load)
# --------------------------------------------------------------------------
def init_params(key, d_model, d_k, d_v, h, d_ff):
    def W(k, shape, scale=0.02):
        return scale * jax.random.normal(k, shape, jnp.float32)

    def ln(kg, kb):
        return (1.0 + 0.1 * jax.random.normal(kg, (1, d_model), jnp.float32),
                0.05 * jax.random.normal(kb, (1, d_model), jnp.float32))

    def mha(k):
        ks = jax.random.split(k, 12)
        g_in, b_in = ln(ks[8], ks[9])
        g_out, b_out = ln(ks[10], ks[11])
        return dict(
            wq=W(ks[0], (d_model, h * d_k)), bq=W(ks[1], (1, h * d_k)),
            wk=W(ks[2], (d_model, h * d_k)), bk=W(ks[3], (1, h * d_k)),
            wv=W(ks[4], (d_model, h * d_v)), bv=W(ks[5], (1, h * d_v)),
            wo=W(ks[6], (h * d_v, d_model)), bo=W(ks[7], (1, d_model)),
            g_in=g_in, b_in=b_in, g_out=g_out, b_out=b_out)

    k_sa, k_ea, k_ff = jax.random.split(key, 3)
    kf = jax.random.split(k_ff, 6)
    g_ff, b_ff = (1.0 + 0.1 * jax.random.normal(kf[4], (1, d_model), jnp.float32),
                  0.05 * jax.random.normal(kf[5], (1, d_model), jnp.float32))
    return dict(
        self_att=mha(k_sa),
        enc_att=mha(k_ea),
        pwff=dict(w1=W(kf[0], (d_model, d_ff)), b1=W(kf[1], (1, d_ff)),
                  w2=W(kf[2], (d_ff, d_model)), b2=W(kf[3], (1, d_model)),
                  g=g_ff, b=b_ff))


# --------------------------------------------------------------------------
# Pure-JAX f32 reference (for correctness check)
# --------------------------------------------------------------------------
def _ref_mha(q_in, kv, mask, pad, p, h, d_k, d_v):
    B, S, D = q_in.shape
    Skv = kv.shape[1]
    q = (q_in @ p["wq"] + p["bq"]).reshape(B, S, h, d_k).transpose(0, 2, 1, 3)
    k = (kv @ p["wk"] + p["bk"]).reshape(B, Skv, h, d_k).transpose(0, 2, 1, 3)
    v = (kv @ p["wv"] + p["bv"]).reshape(B, Skv, h, d_v).transpose(0, 2, 1, 3)
    s = jnp.einsum("bhqd,bhkd->bhqk", q, k) / jnp.sqrt(jnp.float32(d_k))
    s = jnp.where(mask[:, None] > 0.5, NEG_INF, s)   # torch uses -inf; finite avoids NaN
    a = jax.nn.softmax(s, axis=-1)
    o = jnp.einsum("bhqk,bhkd->bhqd", a, v).transpose(0, 2, 1, 3).reshape(B, S, h * d_v)
    o = o @ p["wo"] + p["bo"]
    inner = _ln(q_in + o, p["g_in"], p["b_in"])
    return _ln(q_in + inner, p["g_out"], p["b_out"]) * pad


def _ref_ffn(x, pad, p):
    y = jnp.maximum(x @ p["w1"] + p["b1"], 0.0) @ p["w2"] + p["b2"]
    return _ln(x + y, p["g"], p["b"]) * pad


def decoder_layer_reference(x, enc, mask_pad, mask_self, mask_enc, params,
                            *, h, d_k, d_v):
    sa = _ref_mha(x, x, mask_self, mask_pad, params["self_att"], h, d_k, d_v)
    ea = _ref_mha(sa, enc, mask_enc, mask_pad, params["enc_att"], h, d_k, d_v)
    return _ref_ffn(ea, mask_pad, params["pwff"])


# --------------------------------------------------------------------------
if __name__ == "__main__":
    B, S, Se = 2, 8, 16
    d_model, d_k, d_v, h, d_ff = 32, 8, 8, 4, 64

    key = jax.random.PRNGKey(0)
    kx, ke, kp = jax.random.split(key, 3)
    x = jax.random.normal(kx, (B, S, d_model), jnp.float32)
    enc = jax.random.normal(ke, (B, Se, d_model), jnp.float32)

    # causal self-attention mask (1.0 = masked), shared across batch
    causal = (jnp.arange(S)[None, :] > jnp.arange(S)[:, None]).astype(jnp.float32)
    mask_self = jnp.broadcast_to(causal, (B, S, S))
    # encoder-attention mask: last 2 encoder tokens of batch 1 masked
    enc_mask = jnp.zeros((B, Se), jnp.float32).at[1, Se - 2:].set(1.0)
    mask_enc = jnp.broadcast_to(enc_mask[:, None, :], (B, S, Se))
    # decoder pad mask (1.0 = keep): last 2 query positions of batch 1 are padding
    mask_pad = jnp.ones((B, S, 1), jnp.float32).at[1, S - 2:, :].set(0.0)

    params = init_params(kp, d_model, d_k, d_v, h, d_ff)

    out = decoder_layer_forward(x, enc, mask_pad, mask_self, mask_enc, params,
                                h=h, d_k=d_k, d_v=d_v)
    out = jax.block_until_ready(out)

    ref = decoder_layer_reference(x, enc, mask_pad, mask_self, mask_enc, params,
                                  h=h, d_k=d_k, d_v=d_v)
    max_err = float(jnp.max(jnp.abs(out - ref)))
    assert out.shape == (B, S, d_model)
    # bf16 matmuls (f32 accumulation) vs f32 reference -> small, bounded error
    assert max_err < 2e-2, f"mismatch vs reference, max abs err = {max_err}"
    print("KERNEL_OK")
</pallas_src>

<mosaic_0001>
module attributes {stable_mosaic.version = 11 : i64} {
  func.func @_decoder_layer_kernel(%arg0: i32, %arg1: memref<2x8x32xf32, #tpu.memory_space<vmem>>, %arg2: memref<2x16x32xf32, #tpu.memory_space<vmem>>, %arg3: memref<2x8x8xbf16, #tpu.memory_space<vmem>>, %arg4: memref<2x8x16xbf16, #tpu.memory_space<vmem>>, %arg5: memref<2x8x1xf32, #tpu.memory_space<vmem>>, %arg6: memref<32x32xbf16, #tpu.memory_space<vmem>>, %arg7: memref<1x32xf32, #tpu.memory_space<vmem>>, %arg8: memref<32x32xbf16, #tpu.memory_space<vmem>>, %arg9: memref<1x32xf32, #tpu.memory_space<vmem>>, %arg10: memref<32x32xbf16, #tpu.memory_space<vmem>>, %arg11: memref<1x32xf32, #tpu.memory_space<vmem>>, %arg12: memref<32x32xbf16, #tpu.memory_space<vmem>>, %arg13: memref<1x32xf32, #tpu.memory_space<vmem>>, %arg14: memref<1x32xf32, #tpu.memory_space<vmem>>, %arg15: memref<1x32xf32, #tpu.memory_space<vmem>>, %arg16: memref<1x32xf32, #tpu.memory_space<vmem>>, %arg17: memref<1x32xf32, #tpu.memory_space<vmem>>, %arg18: memref<32x32xbf16, #tpu.memory_space<vmem>>, %arg19: memref<1x32xf32, #tpu.memory_space<vmem>>, %arg20: memref<32x32xbf16, #tpu.memory_space<vmem>>, %arg21: memref<1x32xf32, #tpu.memory_space<vmem>>, %arg22: memref<32x32xbf16, #tpu.memory_space<vmem>>, %arg23: memref<1x32xf32, #tpu.memory_space<vmem>>, %arg24: memref<32x32xbf16, #tpu.memory_space<vmem>>, %arg25: memref<1x32xf32, #tpu.memory_space<vmem>>, %arg26: memref<1x32xf32, #tpu.memory_space<vmem>>, %arg27: memref<1x32xf32, #tpu.memory_space<vmem>>, %arg28: memref<1x32xf32, #tpu.memory_space<vmem>>, %arg29: memref<1x32xf32, #tpu.memory_space<vmem>>, %arg30: memref<32x64xbf16, #tpu.memory_space<vmem>>, %arg31: memref<1x64xf32, #tpu.memory_space<vmem>>, %arg32: memref<64x32xbf16, #tpu.memory_space<vmem>>, %arg33: memref<1x32xf32, #tpu.memory_space<vmem>>, %arg34: memref<1x32xf32, #tpu.memory_space<vmem>>, %arg35: memref<1x32xf32, #tpu.memory_space<vmem>>, %arg36: memref<2x8x32xf32, #tpu.memory_space<vmem>>) attributes {dimension_semantics = [#tpu.dimension_semantics<parallel>], iteration_bounds = array<i64: 1>, scalar_prefetch = 0 : i64, scratch_operands = 0 : i64, tpu.core_type = #tpu.core_type<tc>, window_params = [{transform_indices = @transform_0, window_bounds = array<i64: 2, 8, 32>}, {transform_indices = @transform_1, window_bounds = array<i64: 2, 16, 32>}, {transform_indices = @transform_2, window_bounds = array<i64: 2, 8, 8>}, {transform_indices = @transform_3, window_bounds = array<i64: 2, 8, 16>}, {transform_indices = @transform_4, window_bounds = array<i64: 2, 8, 1>}, {pipeline_mode = #tpu.pipeline_mode<synchronous>, transform_indices = @transform_5, window_bounds = array<i64: 32, 32>}, {pipeline_mode = #tpu.pipeline_mode<synchronous>, transform_indices = @transform_6, window_bounds = array<i64: 1, 32>}, {pipeline_mode = #tpu.pipeline_mode<synchronous>, transform_indices = @transform_7, window_bounds = array<i64: 32, 32>}, {pipeline_mode = #tpu.pipeline_mode<synchronous>, transform_indices = @transform_8, window_bounds = array<i64: 1, 32>}, {pipeline_mode = #tpu.pipeline_mode<synchronous>, transform_indices = @transform_9, window_bounds = array<i64: 32, 32>}, {pipeline_mode = #tpu.pipeline_mode<synchronous>, transform_indices = @transform_10, window_bounds = array<i64: 1, 32>}, {pipeline_mode = #tpu.pipeline_mode<synchronous>, transform_indices = @transform_11, window_bounds = array<i64: 32, 32>}, {pipeline_mode = #tpu.pipeline_mode<synchronous>, transform_indices = @transform_12, window_bounds = array<i64: 1, 32>}, {pipeline_mode = #tpu.pipeline_mode<synchronous>, transform_indices = @transform_13, window_bounds = array<i64: 1, 32>}, {pipeline_mode = #tpu.pipeline_mode<synchronous>, transform_indices = @transform_14, window_bounds = array<i64: 1, 32>}, {pipeline_mode = #tpu.pipeline_mode<synchronous>, transform_indices = @transform_15, window_bounds = array<i64: 1, 32>}, {pipeline_mode = #tpu.pipeline_mode<synchronous>, transform_indices = @transform_16, window_bounds = array<i64: 1, 32>}, {pipeline_mode = #tpu.pipeline_mode<synchronous>, transform_indices = @transform_17, window_bounds = array<i64: 32, 32>}, {pipeline_mode = #tpu.pipeline_mode<synchronous>, transform_indices = @transform_18, window_bounds = array<i64: 1, 32>}, {pipeline_mode = #tpu.pipeline_mode<synchronous>, transform_indices = @transform_19, window_bounds = array<i64: 32, 32>}, {pipeline_mode = #tpu.pipeline_mode<synchronous>, transform_indices = @transform_20, window_bounds = array<i64: 1, 32>}, {pipeline_mode = #tpu.pipeline_mode<synchronous>, transform_indices = @transform_21, window_bounds = array<i64: 32, 32>}, {pipeline_mode = #tpu.pipeline_mode<synchronous>, transform_indices = @transform_22, window_bounds = array<i64: 1, 32>}, {pipeline_mode = #tpu.pipeline_mode<synchronous>, transform_indices = @transform_23, window_bounds = array<i64: 32, 32>}, {pipeline_mode = #tpu.pipeline_mode<synchronous>, transform_indices = @transform_24, window_bounds = array<i64: 1, 32>}, {pipeline_mode = #tpu.pipeline_mode<synchronous>, transform_indices = @transform_25, window_bounds = array<i64: 1, 32>}, {pipeline_mode = #tpu.pipeline_mode<synchronous>, transform_indices = @transform_26, window_bounds = array<i64: 1, 32>}, {pipeline_mode = #tpu.pipeline_mode<synchronous>, transform_indices = @transform_27, window_bounds = array<i64: 1, 32>}, {pipeline_mode = #tpu.pipeline_mode<synchronous>, transform_indices = @transform_28, window_bounds = array<i64: 1, 32>}, {pipeline_mode = #tpu.pipeline_mode<synchronous>, transform_indices = @transform_29, window_bounds = array<i64: 32, 64>}, {pipeline_mode = #tpu.pipeline_mode<synchronous>, transform_indices = @transform_30, window_bounds = array<i64: 1, 64>}, {pipeline_mode = #tpu.pipeline_mode<synchronous>, transform_indices = @transform_31, window_bounds = array<i64: 64, 32>}, {pipeline_mode = #tpu.pipeline_mode<synchronous>, transform_indices = @transform_32, window_bounds = array<i64: 1, 32>}, {pipeline_mode = #tpu.pipeline_mode<synchronous>, transform_indices = @transform_33, window_bounds = array<i64: 1, 32>}, {pipeline_mode = #tpu.pipeline_mode<synchronous>, transform_indices = @transform_34, window_bounds = array<i64: 1, 32>}, {transform_indices = @transform_35, window_bounds = array<i64: 2, 8, 32>}]} {
    %c0 = arith.constant 0 : index
    %c0_0 = arith.constant 0 : index
    %c0_1 = arith.constant 0 : index
    %0 = vector.load %arg1[%c0, %c0_0, %c0_1] : memref<2x8x32xf32, #tpu.memory_space<vmem>>, vector<2x8x32xf32>
    %1 = vector.shape_cast %0 : vector<2x8x32xf32> to vector<16x32xf32>
    %c0_2 = arith.constant 0 : index
    %c0_3 = arith.constant 0 : index
    %c0_4 = arith.constant 0 : index
    %2 = vector.load %arg5[%c0_2, %c0_3, %c0_4] : memref<2x8x1xf32, #tpu.memory_space<vmem>>, vector<2x8x1xf32>
    %3 = vector.shape_cast %2 : vector<2x8x1xf32> to vector<16x1xf32>
    %c0_5 = arith.constant 0 : index
    %c0_6 = arith.constant 0 : index
    %c0_7 = arith.constant 0 : index
    %4 = vector.load %arg3[%c0_5, %c0_6, %c0_7] : memref<2x8x8xbf16, #tpu.memory_space<vmem>>, vector<2x8x8xbf16>
    %5 = arith.extf %4 : vector<2x8x8xbf16> to vector<2x8x8xf32>
    %c0_8 = arith.constant 0 : index
    %c0_9 = arith.constant 0 : index
    %6 = vector.load %arg6[%c0_8, %c0_9] : memref<32x32xbf16, #tpu.memory_space<vmem>>, vector<32x32xbf16>
    %c0_10 = arith.constant 0 : index
    %c0_11 = arith.constant 0 : index
    %7 = vector.load %arg7[%c0_10, %c0_11] : memref<1x32xf32, #tpu.memory_space<vmem>>, vector<1x32xf32>
    %c0_12 = arith.constant 0 : index
    %c0_13 = arith.constant 0 : index
    %8 = vector.load %arg8[%c0_12, %c0_13] : memref<32x32xbf16, #tpu.memory_space<vmem>>, vector<32x32xbf16>
    %c0_14 = arith.constant 0 : index
    %c0_15 = arith.constant 0 : index
    %9 = vector.load %arg9[%c0_14, %c0_15] : memref<1x32xf32, #tpu.memory_space<vmem>>, vector<1x32xf32>
    %c0_16 = arith.constant 0 : index
    %c0_17 = arith.constant 0 : index
    %10 = vector.load %arg10[%c0_16, %c0_17] : memref<32x32xbf16, #tpu.memory_space<vmem>>, vector<32x32xbf16>
    %c0_18 = arith.constant 0 : index
    %c0_19 = arith.constant 0 : index
    %11 = vector.load %arg11[%c0_18, %c0_19] : memref<1x32xf32, #tpu.memory_space<vmem>>, vector<1x32xf32>
    %c0_20 = arith.constant 0 : index
    %c0_21 = arith.constant 0 : index
    %12 = vector.load %arg12[%c0_20, %c0_21] : memref<32x32xbf16, #tpu.memory_space<vmem>>, vector<32x32xbf16>
    %c0_22 = arith.constant 0 : index
    %c0_23 = arith.constant 0 : index
    %13 = vector.load %arg13[%c0_22, %c0_23] : memref<1x32xf32, #tpu.memory_space<vmem>>, vector<1x32xf32>
    %14 = arith.truncf %1 : vector<16x32xf32> to vector<16x32xbf16>
    %cst = arith.constant dense<0.000000e+00> : vector<16x32xf32>
    %15 = tpu.matmul %14, %6, %cst {dimension_numbers = #tpu.dot_dimension_numbers<[1], [0], [0], [1], [0, 0, 1, 1], [], []>} : vector<16x32xbf16>, vector<32x32xbf16>, vector<16x32xf32> -> vector<16x32xf32>
    %16 = vector.broadcast %7 : vector<1x32xf32> to vector<16x32xf32>
    %17 = arith.addf %15, %16 : vector<16x32xf32>
    %cst_24 = arith.constant 0.353553385 : f32
    %18 = vector.broadcast %cst_24 : f32 to vector<16x32xf32>
    %19 = arith.mulf %17, %18 : vector<16x32xf32>
    %cst_25 = arith.constant dense<0.000000e+00> : vector<16x32xf32>
    %20 = tpu.matmul %14, %8, %cst_25 {dimension_numbers = #tpu.dot_dimension_numbers<[1], [0], [0], [1], [0, 0, 1, 1], [], []>} : vector<16x32xbf16>, vector<32x32xbf16>, vector<16x32xf32> -> vector<16x32xf32>
    %21 = vector.broadcast %9 : vector<1x32xf32> to vector<16x32xf32>
    %22 = arith.addf %20, %21 : vector<16x32xf32>
    %cst_26 = arith.constant dense<0.000000e+00> : vector<16x32xf32>
    %23 = tpu.matmul %14, %10, %cst_26 {dimension_numbers = #tpu.dot_dimension_numbers<[1], [0], [0], [1], [0, 0, 1, 1], [], []>} : vector<16x32xbf16>, vector<32x32xbf16>, vector<16x32xf32> -> vector<16x32xf32>
    %24 = vector.broadcast %11 : vector<1x32xf32> to vector<16x32xf32>
    %25 = arith.addf %23, %24 : vector<16x32xf32>
    %26 = vector.shape_cast %19 : vector<16x32xf32> to vector<2x8x4x8xf32>
    %27 = tpu.transpose %26, [0, 2, 1, 3] : vector<2x8x4x8xf32> -> vector<2x4x8x8xf32>
    %28 = vector.shape_cast %27 : vector<2x4x8x8xf32> to vector<8x8x8xf32>
    %29 = vector.shape_cast %22 : vector<16x32xf32> to vector<2x8x4x8xf32>
    %30 = tpu.transpose %29, [0, 2, 1, 3] : vector<2x8x4x8xf32> -> vector<2x4x8x8xf32>
    %31 = vector.shape_cast %30 : vector<2x4x8x8xf32> to vector<8x8x8xf32>
    %32 = vector.shape_cast %25 : vector<16x32xf32> to vector<2x8x4x8xf32>
    %33 = tpu.transpose %32, [0, 2, 1, 3] : vector<2x8x4x8xf32> -> vector<2x4x8x8xf32>
    %34 = vector.shape_cast %33 : vector<2x4x8x8xf32> to vector<8x8x8xf32>
    %35 = arith.truncf %28 : vector<8x8x8xf32> to vector<8x8x8xbf16>
    %36 = arith.truncf %31 : vector<8x8x8xf32> to vector<8x8x8xbf16>
    "tpu.trace_start"() <{level = 10 : i32, message = "gqd,gkd->gqk"}> : () -> ()
    %cst_27 = arith.constant dense<0.000000e+00> : vector<8x8x8xf32>
    %37 = tpu.matmul %35, %36, %cst_27 {dimension_numbers = #tpu.dot_dimension_numbers<[2], [2], [1], [1], [0, 0, 0, 1, 1, 1], [0], [0]>} : vector<8x8x8xbf16>, vector<8x8x8xbf16>, vector<8x8x8xf32> -> vector<8x8x8xf32>
    "tpu.trace_stop"() : () -> ()
    %38 = vector.shape_cast %37 : vector<8x8x8xf32> to vector<2x4x8x8xf32>
    %39 = vector.shape_cast %5 : vector<2x8x8xf32> to vector<2x1x8x8xf32>
    %40 = vector.broadcast %39 : vector<2x1x8x8xf32> to vector<2x4x8x8xf32>
    %41 = arith.addf %38, %40 : vector<2x4x8x8xf32>
    %42 = vector.shape_cast %41 : vector<2x4x8x8xf32> to vector<8x8x8xf32>
    %cst_28 = arith.constant dense<0xFF800000> : vector<8x8xf32>
    %43 = vector.multi_reduction <maximumf>, %42, %cst_28 [2] : vector<8x8x8xf32> to vector<8x8xf32>
    %44 = vector.shape_cast %43 : vector<8x8xf32> to vector<8x8x1xf32>
    %45 = vector.broadcast %44 : vector<8x8x1xf32> to vector<8x8x8xf32>
    %46 = arith.subf %42, %45 : vector<8x8x8xf32>
    %47 = math.exp %46 : vector<8x8x8xf32>
    %cst_29 = arith.constant dense<0.000000e+00> : vector<8x8xf32>
    %48 = vector.multi_reduction <add>, %47, %cst_29 [2] : vector<8x8x8xf32> to vector<8x8xf32>
    %49 = vector.shape_cast %48 : vector<8x8xf32> to vector<8x8x1xf32>
    %50 = tpu.reciprocal %49 {approx = true} : vector<8x8x1xf32> -> vector<8x8x1xf32>
    %51 = vector.broadcast %50 : vector<8x8x1xf32> to vector<8x8x8xf32>
    %52 = arith.mulf %47, %51 : vector<8x8x8xf32>
    %53 = arith.truncf %52 : vector<8x8x8xf32> to vector<8x8x8xbf16>
    %54 = arith.truncf %34 : vector<8x8x8xf32> to vector<8x8x8xbf16>
    "tpu.trace_start"() <{level = 10 : i32, message = "gqk,gkv->gqv"}> : () -> ()
    %cst_30 = arith.constant dense<0.000000e+00> : vector<8x8x8xf32>
    %55 = tpu.matmul %53, %54, %cst_30 {dimension_numbers = #tpu.dot_dimension_numbers<[2], [1], [1], [2], [0, 0, 0, 1, 1, 2], [0], [0]>} : vector<8x8x8xbf16>, vector<8x8x8xbf16>, vector<8x8x8xf32> -> vector<8x8x8xf32>
    "tpu.trace_stop"() : () -> ()
    %56 = vector.shape_cast %55 : vector<8x8x8xf32> to vector<2x4x8x8xf32>
    %57 = tpu.transpose %56, [0, 2, 1, 3] : vector<2x4x8x8xf32> -> vector<2x8x4x8xf32>
    %58 = vector.shape_cast %57 : vector<2x8x4x8xf32> to vector<16x32xf32>
    %59 = arith.truncf %58 : vector<16x32xf32> to vector<16x32xbf16>
    %cst_31 = arith.constant dense<0.000000e+00> : vector<16x32xf32>
    %60 = tpu.matmul %59, %12, %cst_31 {dimension_numbers = #tpu.dot_dimension_numbers<[1], [0], [0], [1], [0, 0, 1, 1], [], []>} : vector<16x32xbf16>, vector<32x32xbf16>, vector<16x32xf32> -> vector<16x32xf32>
    %61 = vector.broadcast %13 : vector<1x32xf32> to vector<16x32xf32>
    %62 = arith.addf %60, %61 : vector<16x32xf32>
    %63 = arith.addf %1, %62 : vector<16x32xf32>
    %c0_32 = arith.constant 0 : index
    %c0_33 = arith.constant 0 : index
    %64 = vector.load %arg14[%c0_32, %c0_33] : memref<1x32xf32, #tpu.memory_space<vmem>>, vector<1x32xf32>
    %c0_34 = arith.constant 0 : index
    %c0_35 = arith.constant 0 : index
    %65 = vector.load %arg15[%c0_34, %c0_35] : memref<1x32xf32, #tpu.memory_space<vmem>>, vector<1x32xf32>
    %cst_36 = arith.constant dense<0.000000e+00> : vector<16xf32>
    %66 = vector.multi_reduction <add>, %63, %cst_36 [1] : vector<16x32xf32> to vector<16xf32>
    %67 = vector.shape_cast %66 : vector<16xf32> to vector<16x1xf32>
    %cst_37 = arith.constant 3.200000e+01 : f32
    %68 = vector.broadcast %cst_37 : f32 to vector<16x1xf32>
    %69 = arith.divf %67, %68 : vector<16x1xf32>
    %70 = vector.broadcast %69 : vector<16x1xf32> to vector<16x32xf32>
    %71 = arith.subf %63, %70 : vector<16x32xf32>
    %72 = arith.mulf %71, %71 : vector<16x32xf32>
    %cst_38 = arith.constant dense<0.000000e+00> : vector<16xf32>
    %73 = vector.multi_reduction <add>, %72, %cst_38 [1] : vector<16x32xf32> to vector<16xf32>
    %74 = vector.shape_cast %73 : vector<16xf32> to vector<16x1xf32>
    %cst_39 = arith.constant 3.200000e+01 : f32
    %75 = vector.broadcast %cst_39 : f32 to vector<16x1xf32>
    %76 = arith.divf %74, %75 : vector<16x1xf32>
    %cst_40 = arith.constant 9.99999974E-6 : f32
    %77 = vector.broadcast %cst_40 : f32 to vector<16x1xf32>
    %78 = arith.addf %76, %77 : vector<16x1xf32>
    %79 = math.rsqrt %78 : vector<16x1xf32>
    %80 = vector.broadcast %79 : vector<16x1xf32> to vector<16x32xf32>
    %81 = arith.mulf %71, %80 : vector<16x32xf32>
    %82 = vector.broadcast %64 : vector<1x32xf32> to vector<16x32xf32>
    %83 = arith.mulf %81, %82 : vector<16x32xf32>
    %84 = vector.broadcast %65 : vector<1x32xf32> to vector<16x32xf32>
    %85 = arith.addf %83, %84 : vector<16x32xf32>
    %86 = arith.addf %1, %85 : vector<16x32xf32>
    %c0_41 = arith.constant 0 : index
    %c0_42 = arith.constant 0 : index
    %87 = vector.load %arg16[%c0_41, %c0_42] : memref<1x32xf32, #tpu.memory_space<vmem>>, vector<1x32xf32>
    %c0_43 = arith.constant 0 : index
    %c0_44 = arith.constant 0 : index
    %88 = vector.load %arg17[%c0_43, %c0_44] : memref<1x32xf32, #tpu.memory_space<vmem>>, vector<1x32xf32>
    %cst_45 = arith.constant dense<0.000000e+00> : vector<16xf32>
    %89 = vector.multi_reduction <add>, %86, %cst_45 [1] : vector<16x32xf32> to vector<16xf32>
    %90 = vector.shape_cast %89 : vector<16xf32> to vector<16x1xf32>
    %cst_46 = arith.constant 3.200000e+01 : f32
    %91 = vector.broadcast %cst_46 : f32 to vector<16x1xf32>
    %92 = arith.divf %90, %91 : vector<16x1xf32>
    %93 = vector.broadcast %92 : vector<16x1xf32> to vector<16x32xf32>
    %94 = arith.subf %86, %93 : vector<16x32xf32>
    %95 = arith.mulf %94, %94 : vector<16x32xf32>
    %cst_47 = arith.constant dense<0.000000e+00> : vector<16xf32>
    %96 = vector.multi_reduction <add>, %95, %cst_47 [1] : vector<16x32xf32> to vector<16xf32>
    %97 = vector.shape_cast %96 : vector<16xf32> to vector<16x1xf32>
    %cst_48 = arith.constant 3.200000e+01 : f32
    %98 = vector.broadcast %cst_48 : f32 to vector<16x1xf32>
    %99 = arith.divf %97, %98 : vector<16x1xf32>
    %cst_49 = arith.constant 9.99999974E-6 : f32
    %100 = vector.broadcast %cst_49 : f32 to vector<16x1xf32>
    %101 = arith.addf %99, %100 : vector<16x1xf32>
    %102 = math.rsqrt %101 : vector<16x1xf32>
    %103 = vector.broadcast %102 : vector<16x1xf32> to vector<16x32xf32>
    %104 = arith.mulf %94, %103 : vector<16x32xf32>
    %105 = vector.broadcast %87 : vector<1x32xf32> to vector<16x32xf32>
    %106 = arith.mulf %104, %105 : vector<16x32xf32>
    %107 = vector.broadcast %88 : vector<1x32xf32> to vector<16x32xf32>
    %108 = arith.addf %106, %107 : vector<16x32xf32>
    %109 = vector.broadcast %3 : vector<16x1xf32> to vector<16x32xf32>
    %110 = arith.mulf %108, %109 : vector<16x32xf32>
    %c0_50 = arith.constant 0 : index
    %c0_51 = arith.constant 0 : index
    %c0_52 = arith.constant 0 : index
    %111 = vector.load %arg2[%c0_50, %c0_51, %c0_52] : memref<2x16x32xf32, #tpu.memory_space<vmem>>, vector<2x16x32xf32>
    %112 = vector.shape_cast %111 : vector<2x16x32xf32> to vector<32x32xf32>
    %c0_53 = arith.constant 0 : index
    %c0_54 = arith.constant 0 : index
    %c0_55 = arith.constant 0 : index
    %113 = vector.load %arg4[%c0_53, %c0_54, %c0_55] : memref<2x8x16xbf16, #tpu.memory_space<vmem>>, vector<2x8x16xbf16>
    %114 = arith.extf %113 : vector<2x8x16xbf16> to vector<2x8x16xf32>
    %c0_56 = arith.constant 0 : index
    %c0_57 = arith.constant 0 : index
    %115 = vector.load %arg18[%c0_56, %c0_57] : memref<32x32xbf16, #tpu.memory_space<vmem>>, vector<32x32xbf16>
    %c0_58 = arith.constant 0 : index
    %c0_59 = arith.constant 0 : index
    %116 = vector.load %arg19[%c0_58, %c0_59] : memref<1x32xf32, #tpu.memory_space<vmem>>, vector<1x32xf32>
    %c0_60 = arith.constant 0 : index
    %c0_61 = arith.constant 0 : index
    %117 = vector.load %arg20[%c0_60, %c0_61] : memref<32x32xbf16, #tpu.memory_space<vmem>>, vector<32x32xbf16>
    %c0_62 = arith.constant 0 : index
    %c0_63 = arith.constant 0 : index
    %118 = vector.load %arg21[%c0_62, %c0_63] : memref<1x32xf32, #tpu.memory_space<vmem>>, vector<1x32xf32>
    %c0_64 = arith.constant 0 : index
    %c0_65 = arith.constant 0 : index
    %119 = vector.load %arg22[%c0_64, %c0_65] : memref<32x32xbf16, #tpu.memory_space<vmem>>, vector<32x32xbf16>
    %c0_66 = arith.constant 0 : index
    %c0_67 = arith.constant 0 : index
    %120 = vector.load %arg23[%c0_66, %c0_67] : memref<1x32xf32, #tpu.memory_space<vmem>>, vector<1x32xf32>
    %c0_68 = arith.constant 0 : index
    %c0_69 = arith.constant 0 : index
    %121 = vector.load %arg24[%c0_68, %c0_69] : memref<32x32xbf16, #tpu.memory_space<vmem>>, vector<32x32xbf16>
    %c0_70 = arith.constant 0 : index
    %c0_71 = arith.constant 0 : index
    %122 = vector.load %arg25[%c0_70, %c0_71] : memref<1x32xf32, #tpu.memory_space<vmem>>, vector<1x32xf32>
    %123 = arith.truncf %110 : vector<16x32xf32> to vector<16x32xbf16>
    %124 = arith.truncf %112 : vector<32x32xf32> to vector<32x32xbf16>
    %cst_72 = arith.constant dense<0.000000e+00> : vector<16x32xf32>
    %125 = tpu.matmul %123, %115, %cst_72 {dimension_numbers = #tpu.dot_dimension_numbers<[1], [0], [0], [1], [0, 0, 1, 1], [], []>} : vector<16x32xbf16>, vector<32x32xbf16>, vector<16x32xf32> -> vector<16x32xf32>
    %126 = vector.broadcast %116 : vector<1x32xf32> to vector<16x32xf32>
    %127 = arith.addf %125, %126 : vector<16x32xf32>
    %cst_73 = arith.constant 0.353553385 : f32
    %128 = vector.broadcast %cst_73 : f32 to vector<16x32xf32>
    %129 = arith.mulf %127, %128 : vector<16x32xf32>
    %cst_74 = arith.constant dense<0.000000e+00> : vector<32x32xf32>
    %130 = tpu.matmul %124, %117, %cst_74 {dimension_numbers = #tpu.dot_dimension_numbers<[1], [0], [0], [1], [0, 0, 1, 1], [], []>} : vector<32x32xbf16>, vector<32x32xbf16>, vector<32x32xf32> -> vector<32x32xf32>
    %131 = vector.broadcast %118 : vector<1x32xf32> to vector<32x32xf32>
    %132 = arith.addf %130, %131 : vector<32x32xf32>
    %cst_75 = arith.constant dense<0.000000e+00> : vector<32x32xf32>
    %133 = tpu.matmul %124, %119, %cst_75 {dimension_numbers = #tpu.dot_dimension_numbers<[1], [0], [0], [1], [0, 0, 1, 1], [], []>} : vector<32x32xbf16>, vector<32x32xbf16>, vector<32x32xf32> -> vector<32x32xf32>
    %134 = vector.broadcast %120 : vector<1x32xf32> to vector<32x32xf32>
    %135 = arith.addf %133, %134 : vector<32x32xf32>
    %136 = vector.shape_cast %129 : vector<16x32xf32> to vector<2x8x4x8xf32>
    %137 = tpu.transpose %136, [0, 2, 1, 3] : vector<2x8x4x8xf32> -> vector<2x4x8x8xf32>
    %138 = vector.shape_cast %137 : vector<2x4x8x8xf32> to vector<8x8x8xf32>
    %139 = vector.shape_cast %132 : vector<32x32xf32> to vector<2x16x4x8xf32>
    %140 = tpu.transpose %139, [0, 2, 1, 3] : vector<2x16x4x8xf32> -> vector<2x4x16x8xf32>
    %141 = vector.shape_cast %140 : vector<2x4x16x8xf32> to vector<8x16x8xf32>
    %142 = vector.shape_cast %135 : vector<32x32xf32> to vector<2x16x4x8xf32>
    %143 = tpu.transpose %142, [0, 2, 1, 3] : vector<2x16x4x8xf32> -> vector<2x4x16x8xf32>
    %144 = vector.shape_cast %143 : vector<2x4x16x8xf32> to vector<8x16x8xf32>
    %145 = arith.truncf %138 : vector<8x8x8xf32> to vector<8x8x8xbf16>
    %146 = arith.truncf %141 : vector<8x16x8xf32> to vector<8x16x8xbf16>
    "tpu.trace_start"() <{level = 10 : i32, message = "gqd,gkd->gqk"}> : () -> ()
    %cst_76 = arith.constant dense<0.000000e+00> : vector<8x8x16xf32>
    %147 = tpu.matmul %145, %146, %cst_76 {dimension_numbers = #tpu.dot_dimension_numbers<[2], [2], [1], [1], [0, 0, 0, 1, 1, 1], [0], [0]>} : vector<8x8x8xbf16>, vector<8x16x8xbf16>, vector<8x8x16xf32> -> vector<8x8x16xf32>
    "tpu.trace_stop"() : () -> ()
    %148 = vector.shape_cast %147 : vector<8x8x16xf32> to vector<2x4x8x16xf32>
    %149 = vector.shape_cast %114 : vector<2x8x16xf32> to vector<2x1x8x16xf32>
    %150 = vector.broadcast %149 : vector<2x1x8x16xf32> to vector<2x4x8x16xf32>
    %151 = arith.addf %148, %150 : vector<2x4x8x16xf32>
    %152 = vector.shape_cast %151 : vector<2x4x8x16xf32> to vector<8x8x16xf32>
    %cst_77 = arith.constant dense<0xFF800000> : vector<8x8xf32>
    %153 = vector.multi_reduction <maximumf>, %152, %cst_77 [2] : vector<8x8x16xf32> to vector<8x8xf32>
    %154 = vector.shape_cast %153 : vector<8x8xf32> to vector<8x8x1xf32>
    %155 = vector.broadcast %154 : vector<8x8x1xf32> to vector<8x8x16xf32>
    %156 = arith.subf %152, %155 : vector<8x8x16xf32>
    %157 = math.exp %156 : vector<8x8x16xf32>
    %cst_78 = arith.constant dense<0.000000e+00> : vector<8x8xf32>
    %158 = vector.multi_reduction <add>, %157, %cst_78 [2] : vector<8x8x16xf32> to vector<8x8xf32>
    %159 = vector.shape_cast %158 : vector<8x8xf32> to vector<8x8x1xf32>
    %160 = tpu.reciprocal %159 {approx = true} : vector<8x8x1xf32> -> vector<8x8x1xf32>
    %161 = vector.broadcast %160 : vector<8x8x1xf32> to vector<8x8x16xf32>
    %162 = arith.mulf %157, %161 : vector<8x8x16xf32>
    %163 = arith.truncf %162 : vector<8x8x16xf32> to vector<8x8x16xbf16>
    %164 = arith.truncf %144 : vector<8x16x8xf32> to vector<8x16x8xbf16>
    "tpu.trace_start"() <{level = 10 : i32, message = "gqk,gkv->gqv"}> : () -> ()
    %cst_79 = arith.constant dense<0.000000e+00> : vector<8x8x8xf32>
    %165 = tpu.matmul %163, %164, %cst_79 {dimension_numbers = #tpu.dot_dimension_numbers<[2], [1], [1], [2], [0, 0, 0, 1, 1, 2], [0], [0]>} : vector<8x8x16xbf16>, vector<8x16x8xbf16>, vector<8x8x8xf32> -> vector<8x8x8xf32>
    "tpu.trace_stop"() : () -> ()
    %166 = vector.shape_cast %165 : vector<8x8x8xf32> to vector<2x4x8x8xf32>
    %167 = tpu.transpose %166, [0, 2, 1, 3] : vector<2x4x8x8xf32> -> vector<2x8x4x8xf32>
    %168 = vector.shape_cast %167 : vector<2x8x4x8xf32> to vector<16x32xf32>
    %169 = arith.truncf %168 : vector<16x32xf32> to vector<16x32xbf16>
    %cst_80 = arith.constant dense<0.000000e+00> : vector<16x32xf32>
    %170 = tpu.matmul %169, %121, %cst_80 {dimension_numbers = #tpu.dot_dimension_numbers<[1], [0], [0], [1], [0, 0, 1, 1], [], []>} : vector<16x32xbf16>, vector<32x32xbf16>, vector<16x32xf32> -> vector<16x32xf32>
    %171 = vector.broadcast %122 : vector<1x32xf32> to vector<16x32xf32>
    %172 = arith.addf %170, %171 : vector<16x32xf32>
    %173 = arith.addf %110, %172 : vector<16x32xf32>
    %c0_81 = arith.constant 0 : index
    %c0_82 = arith.constant 0 : index
    %174 = vector.load %arg26[%c0_81, %c0_82] : memref<1x32xf32, #tpu.memory_space<vmem>>, vector<1x32xf32>
    %c0_83 = arith.constant 0 : index
    %c0_84 = arith.constant 0 : index
    %175 = vector.load %arg27[%c0_83, %c0_84] : memref<1x32xf32, #tpu.memory_space<vmem>>, vector<1x32xf32>
    %cst_85 = arith.constant dense<0.000000e+00> : vector<16xf32>
    %176 = vector.multi_reduction <add>, %173, %cst_85 [1] : vector<16x32xf32> to vector<16xf32>
    %177 = vector.shape_cast %176 : vector<16xf32> to vector<16x1xf32>
    %cst_86 = arith.constant 3.200000e+01 : f32
    %178 = vector.broadcast %cst_86 : f32 to vector<16x1xf32>
    %179 = arith.divf %177, %178 : vector<16x1xf32>
    %180 = vector.broadcast %179 : vector<16x1xf32> to vector<16x32xf32>
    %181 = arith.subf %173, %180 : vector<16x32xf32>
    %182 = arith.mulf %181, %181 : vector<16x32xf32>
    %cst_87 = arith.constant dense<0.000000e+00> : vector<16xf32>
    %183 = vector.multi_reduction <add>, %182, %cst_87 [1] : vector<16x32xf32> to vector<16xf32>
    %184 = vector.shape_cast %183 : vector<16xf32> to vector<16x1xf32>
    %cst_88 = arith.constant 3.200000e+01 : f32
    %185 = vector.broadcast %cst_88 : f32 to vector<16x1xf32>
    %186 = arith.divf %184, %185 : vector<16x1xf32>
    %cst_89 = arith.constant 9.99999974E-6 : f32
    %187 = vector.broadcast %cst_89 : f32 to vector<16x1xf32>
    %188 = arith.addf %186, %187 : vector<16x1xf32>
    %189 = math.rsqrt %188 : vector<16x1xf32>
    %190 = vector.broadcast %189 : vector<16x1xf32> to vector<16x32xf32>
    %191 = arith.mulf %181, %190 : vector<16x32xf32>
    %192 = vector.broadcast %174 : vector<1x32xf32> to vector<16x32xf32>
    %193 = arith.mulf %191, %192 : vector<16x32xf32>
    %194 = vector.broadcast %175 : vector<1x32xf32> to vector<16x32xf32>
    %195 = arith.addf %193, %194 : vector<16x32xf32>
    %196 = arith.addf %110, %195 : vector<16x32xf32>
    %c0_90 = arith.constant 0 : index
    %c0_91 = arith.constant 0 : index
    %197 = vector.load %arg28[%c0_90, %c0_91] : memref<1x32xf32, #tpu.memory_space<vmem>>, vector<1x32xf32>
    %c0_92 = arith.constant 0 : index
    %c0_93 = arith.constant 0 : index
    %198 = vector.load %arg29[%c0_92, %c0_93] : memref<1x32xf32, #tpu.memory_space<vmem>>, vector<1x32xf32>
    %cst_94 = arith.constant dense<0.000000e+00> : vector<16xf32>
    %199 = vector.multi_reduction <add>, %196, %cst_94 [1] : vector<16x32xf32> to vector<16xf32>
    %200 = vector.shape_cast %199 : vector<16xf32> to vector<16x1xf32>
    %cst_95 = arith.constant 3.200000e+01 : f32
    %201 = vector.broadcast %cst_95 : f32 to vector<16x1xf32>
    %202 = arith.divf %200, %201 : vector<16x1xf32>
    %203 = vector.broadcast %202 : vector<16x1xf32> to vector<16x32xf32>
    %204 = arith.subf %196, %203 : vector<16x32xf32>
    %205 = arith.mulf %204, %204 : vector<16x32xf32>
    %cst_96 = arith.constant dense<0.000000e+00> : vector<16xf32>
    %206 = vector.multi_reduction <add>, %205, %cst_96 [1] : vector<16x32xf32> to vector<16xf32>
    %207 = vector.shape_cast %206 : vector<16xf32> to vector<16x1xf32>
    %cst_97 = arith.constant 3.200000e+01 : f32
    %208 = vector.broadcast %cst_97 : f32 to vector<16x1xf32>
    %209 = arith.divf %207, %208 : vector<16x1xf32>
    %cst_98 = arith.constant 9.99999974E-6 : f32
    %210 = vector.broadcast %cst_98 : f32 to vector<16x1xf32>
    %211 = arith.addf %209, %210 : vector<16x1xf32>
    %212 = math.rsqrt %211 : vector<16x1xf32>
    %213 = vector.broadcast %212 : vector<16x1xf32> to vector<16x32xf32>
    %214 = arith.mulf %204, %213 : vector<16x32xf32>
    %215 = vector.broadcast %197 : vector<1x32xf32> to vector<16x32xf32>
    %216 = arith.mulf %214, %215 : vector<16x32xf32>
    %217 = vector.broadcast %198 : vector<1x32xf32> to vector<16x32xf32>
    %218 = arith.addf %216, %217 : vector<16x32xf32>
    %219 = vector.broadcast %3 : vector<16x1xf32> to vector<16x32xf32>
    %220 = arith.mulf %218, %219 : vector<16x32xf32>
    %221 = arith.truncf %220 : vector<16x32xf32> to vector<16x32xbf16>
    %c0_99 = arith.constant 0 : index
    %c0_100 = arith.constant 0 : index
    %222 = vector.load %arg30[%c0_99, %c0_100] : memref<32x64xbf16, #tpu.memory_space<vmem>>, vector<32x64xbf16>
    %cst_101 = arith.constant dense<0.000000e+00> : vector<16x64xf32>
    %223 = tpu.matmul %221, %222, %cst_101 {dimension_numbers = #tpu.dot_dimension_numbers<[1], [0], [0], [1], [0, 0, 1, 1], [], []>} : vector<16x32xbf16>, vector<32x64xbf16>, vector<16x64xf32> -> vector<16x64xf32>
    %c0_102 = arith.constant 0 : index
    %c0_103 = arith.constant 0 : index
    %224 = vector.load %arg31[%c0_102, %c0_103] : memref<1x64xf32, #tpu.memory_space<vmem>>, vector<1x64xf32>
    %225 = vector.broadcast %224 : vector<1x64xf32> to vector<16x64xf32>
    %226 = arith.addf %223, %225 : vector<16x64xf32>
    %cst_104 = arith.constant 0.000000e+00 : f32
    %227 = vector.broadcast %cst_104 : f32 to vector<16x64xf32>
    %228 = arith.maximumf %226, %227 : vector<16x64xf32>
    %229 = arith.truncf %228 : vector<16x64xf32> to vector<16x64xbf16>
    %c0_105 = arith.constant 0 : index
    %c0_106 = arith.constant 0 : index
    %230 = vector.load %arg32[%c0_105, %c0_106] : memref<64x32xbf16, #tpu.memory_space<vmem>>, vector<64x32xbf16>
    %cst_107 = arith.constant dense<0.000000e+00> : vector<16x32xf32>
    %231 = tpu.matmul %229, %230, %cst_107 {dimension_numbers = #tpu.dot_dimension_numbers<[1], [0], [0], [1], [0, 0, 1, 1], [], []>} : vector<16x64xbf16>, vector<64x32xbf16>, vector<16x32xf32> -> vector<16x32xf32>
    %c0_108 = arith.constant 0 : index
    %c0_109 = arith.constant 0 : index
    %232 = vector.load %arg33[%c0_108, %c0_109] : memref<1x32xf32, #tpu.memory_space<vmem>>, vector<1x32xf32>
    %233 = vector.broadcast %232 : vector<1x32xf32> to vector<16x32xf32>
    %234 = arith.addf %231, %233 : vector<16x32xf32>
    %235 = arith.addf %220, %234 : vector<16x32xf32>
    %c0_110 = arith.constant 0 : index
    %c0_111 = arith.constant 0 : index
    %236 = vector.load %arg34[%c0_110, %c0_111] : memref<1x32xf32, #tpu.memory_space<vmem>>, vector<1x32xf32>
    %c0_112 = arith.constant 0 : index
    %c0_113 = arith.constant 0 : index
    %237 = vector.load %arg35[%c0_112, %c0_113] : memref<1x32xf32, #tpu.memory_space<vmem>>, vector<1x32xf32>
    %cst_114 = arith.constant dense<0.000000e+00> : vector<16xf32>
    %238 = vector.multi_reduction <add>, %235, %cst_114 [1] : vector<16x32xf32> to vector<16xf32>
    %239 = vector.shape_cast %238 : vector<16xf32> to vector<16x1xf32>
    %cst_115 = arith.constant 3.200000e+01 : f32
    %240 = vector.broadcast %cst_115 : f32 to vector<16x1xf32>
    %241 = arith.divf %239, %240 : vector<16x1xf32>
    %242 = vector.broadcast %241 : vector<16x1xf32> to vector<16x32xf32>
    %243 = arith.subf %235, %242 : vector<16x32xf32>
    %244 = arith.mulf %243, %243 : vector<16x32xf32>
    %cst_116 = arith.constant dense<0.000000e+00> : vector<16xf32>
    %245 = vector.multi_reduction <add>, %244, %cst_116 [1] : vector<16x32xf32> to vector<16xf32>
    %246 = vector.shape_cast %245 : vector<16xf32> to vector<16x1xf32>
    %cst_117 = arith.constant 3.200000e+01 : f32
    %247 = vector.broadcast %cst_117 : f32 to vector<16x1xf32>
    %248 = arith.divf %246, %247 : vector<16x1xf32>
    %cst_118 = arith.constant 9.99999974E-6 : f32
    %249 = vector.broadcast %cst_118 : f32 to vector<16x1xf32>
    %250 = arith.addf %248, %249 : vector<16x1xf32>
    %251 = math.rsqrt %250 : vector<16x1xf32>
    %252 = vector.broadcast %251 : vector<16x1xf32> to vector<16x32xf32>
    %253 = arith.mulf %243, %252 : vector<16x32xf32>
    %254 = vector.broadcast %236 : vector<1x32xf32> to vector<16x32xf32>
    %255 = arith.mulf %253, %254 : vector<16x32xf32>
    %256 = vector.broadcast %237 : vector<1x32xf32> to vector<16x32xf32>
    %257 = arith.addf %255, %256 : vector<16x32xf32>
    %258 = vector.broadcast %3 : vector<16x1xf32> to vector<16x32xf32>
    %259 = arith.mulf %257, %258 : vector<16x32xf32>
    %260 = vector.shape_cast %259 : vector<16x32xf32> to vector<2x8x32xf32>
    %c0_119 = arith.constant 0 : index
    %c0_120 = arith.constant 0 : index
    %c0_121 = arith.constant 0 : index
    %261 = vector.load %arg36[%c0_119, %c0_120, %c0_121] : memref<2x8x32xf32, #tpu.memory_space<vmem>>, vector<2x8x32xf32>
    tpu.vector_store %arg36[%c0_119, %c0_120, %c0_121], %260 {strides = array<i32>} : memref<2x8x32xf32, #tpu.memory_space<vmem>>, vector<2x8x32xf32>,
    return
  }
  func.func @transform_0(%arg0: i32) -> (i32, i32, i32) {
    %c0_i32 = arith.constant 0 : i32
    %c0_i32_0 = arith.constant 0 : i32
    %c0_i32_1 = arith.constant 0 : i32
    return %arg0, %c0_i32, %c0_i32_0 : i32, i32, i32
  }
  func.func @transform_1(%arg0: i32) -> (i32, i32, i32) {
    %c0_i32 = arith.constant 0 : i32
    %c0_i32_0 = arith.constant 0 : i32
    %c0_i32_1 = arith.constant 0 : i32
    return %arg0, %c0_i32, %c0_i32_0 : i32, i32, i32
  }
  func.func @transform_2(%arg0: i32) -> (i32, i32, i32) {
    %c0_i32 = arith.constant 0 : i32
    %c0_i32_0 = arith.constant 0 : i32
    %c0_i32_1 = arith.constant 0 : i32
    return %arg0, %c0_i32, %c0_i32_0 : i32, i32, i32
  }
  func.func @transform_3(%arg0: i32) -> (i32, i32, i32) {
    %c0_i32 = arith.constant 0 : i32
    %c0_i32_0 = arith.constant 0 : i32
    %c0_i32_1 = arith.constant 0 : i32
    return %arg0, %c0_i32, %c0_i32_0 : i32, i32, i32
  }
  func.func @transform_4(%arg0: i32) -> (i32, i32, i32) {
    %c0_i32 = arith.constant 0 : i32
    %c0_i32_0 = arith.constant 0 : i32
    %c0_i32_1 = arith.constant 0 : i32
    return %arg0, %c0_i32, %c0_i32_0 : i32, i32, i32
  }
  func.func @transform_5(%arg0: i32) -> (i32, i32) {
    %c0_i32 = arith.constant 0 : i32
    %c0_i32_0 = arith.constant 0 : i32
    %c0_i32_1 = arith.constant 0 : i32
    return %c0_i32, %c0_i32_0 : i32, i32
  }
  func.func @transform_6(%arg0: i32) -> (i32, i32) {
    %c0_i32 = arith.constant 0 : i32
    %c0_i32_0 = arith.constant 0 : i32
    %c0_i32_1 = arith.constant 0 : i32
    return %c0_i32, %c0_i32_0 : i32, i32
  }
  func.func @transform_7(%arg0: i32) -> (i32, i32) {
    %c0_i32 = arith.constant 0 : i32
    %c0_i32_0 = arith.constant 0 : i32
    %c0_i32_1 = arith.constant 0 : i32
    return %c0_i32, %c0_i32_0 : i32, i32
  }
  func.func @transform_8(%arg0: i32) -> (i32, i32) {
    %c0_i32 = arith.constant 0 : i32
    %c0_i32_0 = arith.constant 0 : i32
    %c0_i32_1 = arith.constant 0 : i32
    return %c0_i32, %c0_i32_0 : i32, i32
  }
  func.func @transform_9(%arg0: i32) -> (i32, i32) {
    %c0_i32 = arith.constant 0 : i32
    %c0_i32_0 = arith.constant 0 : i32
    %c0_i32_1 = arith.constant 0 : i32
    return %c0_i32, %c0_i32_0 : i32, i32
  }
  func.func @transform_10(%arg0: i32) -> (i32, i32) {
    %c0_i32 = arith.constant 0 : i32
    %c0_i32_0 = arith.constant 0 : i32
    %c0_i32_1 = arith.constant 0 : i32
    return %c0_i32, %c0_i32_0 : i32, i32
  }
  func.func @transform_11(%arg0: i32) -> (i32, i32) {
    %c0_i32 = arith.constant 0 : i32
    %c0_i32_0 = arith.constant 0 : i32
    %c0_i32_1 = arith.constant 0 : i32
    return %c0_i32, %c0_i32_0 : i32, i32
  }
  func.func @transform_12(%arg0: i32) -> (i32, i32) {
    %c0_i32 = arith.constant 0 : i32
    %c0_i32_0 = arith.constant 0 : i32
    %c0_i32_1 = arith.constant 0 : i32
    return %c0_i32, %c0_i32_0 : i32, i32
  }
  func.func @transform_13(%arg0: i32) -> (i32, i32) {
    %c0_i32 = arith.constant 0 : i32
    %c0_i32_0 = arith.constant 0 : i32
    %c0_i32_1 = arith.constant 0 : i32
    return %c0_i32, %c0_i32_0 : i32, i32
  }
  func.func @transform_14(%arg0: i32) -> (i32, i32) {
    %c0_i32 = arith.constant 0 : i32
    %c0_i32_0 = arith.constant 0 : i32
    %c0_i32_1 = arith.constant 0 : i32
    return %c0_i32, %c0_i32_0 : i32, i32
  }
  func.func @transform_15(%arg0: i32) -> (i32, i32) {
    %c0_i32 = arith.constant 0 : i32
    %c0_i32_0 = arith.constant 0 : i32
    %c0_i32_1 = arith.constant 0 : i32
    return %c0_i32, %c0_i32_0 : i32, i32
  }
  func.func @transform_16(%arg0: i32) -> (i32, i32) {
    %c0_i32 = arith.constant 0 : i32
    %c0_i32_0 = arith.constant 0 : i32
    %c0_i32_1 = arith.constant 0 : i32
    return %c0_i32, %c0_i32_0 : i32, i32
  }
  func.func @transform_17(%arg0: i32) -> (i32, i32) {
    %c0_i32 = arith.constant 0 : i32
    %c0_i32_0 = arith.constant 0 : i32
    %c0_i32_1 = arith.constant 0 : i32
    return %c0_i32, %c0_i32_0 : i32, i32
  }
  func.func @transform_18(%arg0: i32) -> (i32, i32) {
    %c0_i32 = arith.constant 0 : i32
    %c0_i32_0 = arith.constant 0 : i32
    %c0_i32_1 = arith.constant 0 : i32
    return %c0_i32, %c0_i32_0 : i32, i32
  }
  func.func @transform_19(%arg0: i32) -> (i32, i32) {
    %c0_i32 = arith.constant 0 : i32
    %c0_i32_0 = arith.constant 0 : i32
    %c0_i32_1 = arith.constant 0 : i32
    return %c0_i32, %c0_i32_0 : i32, i32
  }
  func.func @transform_20(%arg0: i32) -> (i32, i32) {
    %c0_i32 = arith.constant 0 : i32
    %c0_i32_0 = arith.constant 0 : i32
    %c0_i32_1 = arith.constant 0 : i32
    return %c0_i32, %c0_i32_0 : i32, i32
  }
  func.func @transform_21(%arg0: i32) -> (i32, i32) {
    %c0_i32 = arith.constant 0 : i32
    %c0_i32_0 = arith.constant 0 : i32
    %c0_i32_1 = arith.constant 0 : i32
    return %c0_i32, %c0_i32_0 : i32, i32
  }
  func.func @transform_22(%arg0: i32) -> (i32, i32) {
    %c0_i32 = arith.constant 0 : i32
    %c0_i32_0 = arith.constant 0 : i32
    %c0_i32_1 = arith.constant 0 : i32
    return %c0_i32, %c0_i32_0 : i32, i32
  }
  func.func @transform_23(%arg0: i32) -> (i32, i32) {
    %c0_i32 = arith.constant 0 : i32
    %c0_i32_0 = arith.constant 0 : i32
    %c0_i32_1 = arith.constant 0 : i32
    return %c0_i32, %c0_i32_0 : i32, i32
  }
  func.func @transform_24(%arg0: i32) -> (i32, i32) {
    %c0_i32 = arith.constant 0 : i32
    %c0_i32_0 = arith.constant 0 : i32
    %c0_i32_1 = arith.constant 0 : i32
    return %c0_i32, %c0_i32_0 : i32, i32
  }
  func.func @transform_25(%arg0: i32) -> (i32, i32) {
    %c0_i32 = arith.constant 0 : i32
    %c0_i32_0 = arith.constant 0 : i32
    %c0_i32_1 = arith.constant 0 : i32
    return %c0_i32, %c0_i32_0 : i32, i32
  }
  func.func @transform_26(%arg0: i32) -> (i32, i32) {
    %c0_i32 = arith.constant 0 : i32
    %c0_i32_0 = arith.constant 0 : i32
    %c0_i32_1 = arith.constant 0 : i32
    return %c0_i32, %c0_i32_0 : i32, i32
  }
  func.func @transform_27(%arg0: i32) -> (i32, i32) {
    %c0_i32 = arith.constant 0 : i32
    %c0_i32_0 = arith.constant 0 : i32
    %c0_i32_1 = arith.constant 0 : i32
    return %c0_i32, %c0_i32_0 : i32, i32
  }
  func.func @transform_28(%arg0: i32) -> (i32, i32) {
    %c0_i32 = arith.constant 0 : i32
    %c0_i32_0 = arith.constant 0 : i32
    %c0_i32_1 = arith.constant 0 : i32
    return %c0_i32, %c0_i32_0 : i32, i32
  }
  func.func @transform_29(%arg0: i32) -> (i32, i32) {
    %c0_i32 = arith.constant 0 : i32
    %c0_i32_0 = arith.constant 0 : i32
    %c0_i32_1 = arith.constant 0 : i32
    return %c0_i32, %c0_i32_0 : i32, i32
  }
  func.func @transform_30(%arg0: i32) -> (i32, i32) {
    %c0_i32 = arith.constant 0 : i32
    %c0_i32_0 = arith.constant 0 : i32
    %c0_i32_1 = arith.constant 0 : i32
    return %c0_i32, %c0_i32_0 : i32, i32
  }
  func.func @transform_31(%arg0: i32) -> (i32, i32) {
    %c0_i32 = arith.constant 0 : i32
    %c0_i32_0 = arith.constant 0 : i32
    %c0_i32_1 = arith.constant 0 : i32
    return %c0_i32, %c0_i32_0 : i32, i32
  }
  func.func @transform_32(%arg0: i32) -> (i32, i32) {
    %c0_i32 = arith.constant 0 : i32
    %c0_i32_0 = arith.constant 0 : i32
    %c0_i32_1 = arith.constant 0 : i32
    return %c0_i32, %c0_i32_0 : i32, i32
  }
  func.func @transform_33(%arg0: i32) -> (i32, i32) {
    %c0_i32 = arith.constant 0 : i32
    %c0_i32_0 = arith.constant 0 : i32
    %c0_i32_1 = arith.constant 0 : i32
    return %c0_i32, %c0_i32_0 : i32, i32
  }
  func.func @transform_34(%arg0: i32) -> (i32, i32) {
    %c0_i32 = arith.constant 0 : i32
    %c0_i32_0 = arith.constant 0 : i32
    %c0_i32_1 = arith.constant 0 : i32
    return %c0_i32, %c0_i32_0 : i32, i32
  }
  func.func @transform_35(%arg0: i32) -> (i32, i32, i32) {
    %c0_i32 = arith.constant 0 : i32
    %c0_i32_0 = arith.constant 0 : i32
    %c0_i32_1 = arith.constant 0 : i32
    return %arg0, %c0_i32, %c0_i32_0 : i32, i32, i32
  }
}

</mosaic_0001>

<bundles_post_ra>
// kernel: tpu_custom_call.1
= control target key start
LH: loop header
LB: loop body
LE: loop exit
PB: predicated region body
PF: predicated region fallthrough
CT: control target
= control target key end

     0   :  { %s7208_s6 = smov 1   ;;  %s7209_s10 = smov 2   ;;  %s8551_s0 = inlined_call_operand.smem [shape: u32[36], index: -1, kind: input, shape index: {}] }
   0x1   :  { %s7284_s5 = sld [smem:[%s8551_s0]]   ;;  %s7210_s14 = smov 3  }
   0x2   :  { %s7289_s9 = sld [smem:[%s8551_s0 + %s7208_s6]]   ;;  %s7211_s18 = smov 4  }
   0x3   :  { %s7294_s13 = sld [smem:[%s8551_s0 + %s7209_s10]]   ;;  %s7212_s22 = smov 5  }
   0x4   :  { %s7299_s17 = sld [smem:[%s8551_s0 + %s7210_s14]]   ;;  %s7213_s26 = smov 6  }
   0x5   :  { %s7304_s21 = sld [smem:[%s8551_s0 + %s7211_s18]]   ;;  %s7214_s30 = smov 7  }
   0x6   :  { %s7309_s25 = sld [smem:[%s8551_s0 + %s7212_s22]]   ;;  %s7215_s4 = smov 8  }
   0x7   :  { %8566 = sst [smem:[#allocation43_spill]] %s7284_s5  ;;  %s7216_s10 = smov 9  }
   0x8   :  { %8567 = sst [smem:[#allocation44_spill]] %s7289_s9  ;;  %s7217_s15 = smov 10  }
   0x9   :  { %s7314_s29 = sld [smem:[%s8551_s0 + %s7213_s26]]   ;;  %s7218_s20 = smov 11  }
   0xa   :  { %s7319_s3 = sld [smem:[%s8551_s0 + %s7214_s30]]   ;;  %s7219_s26 = smov 12  }
   0xb   :  { %8568 = sst [smem:[#allocation45_spill]] %s7304_s21  ;;  %s7220_s1 = smov 13  }
   0xc   :  { %8569 = sst [smem:[#allocation46_spill]] %s7309_s25  ;;  %s7221_s7 = smov 14  }
   0xd   :  { %s7324_s8 = sld [smem:[%s8551_s0 + %s7215_s4]]   ;;  %s7223_s22 = smov 16  }
   0xe   :  { %s7329_s14 = sld [smem:[%s8551_s0 + %s7216_s10]]   ;;  %s7224_s28 = smov 17  }
   0xf   :  { %s7334_s19 = sld [smem:[%s8551_s0 + %s7217_s15]]   ;;  %s7222_s15 = smov 15  }
  0x10   :  { %s7339_s24 = sld [smem:[%s8551_s0 + %s7218_s20]]  }
  0x11   :  { %s7344_s30 = sld [smem:[%s8551_s0 + %s7219_s26]]  }
  0x12   :  { %s7349_s6 = sld [smem:[%s8551_s0 + %s7220_s1]]  }
  0x13   :  { %s7354_s12 = sld [smem:[%s8551_s0 + %s7221_s7]]   ;;  %s7225_s7 = smov 18  }
  0x14   :  { %8570 = sst [smem:[#allocation47_spill]] %s7329_s14 }
  0x15   :  { %s7359_s20 = sld [smem:[%s8551_s0 + %s7222_s15]]   ;;  %s7226_s15 = smov 19  }
  0x16   :  { %s7364_s27 = sld [smem:[%s8551_s0 + %s7223_s22]]   ;;  %s7227_s22 = smov 20  }
  0x17   :  { %s7369_s4 = sld [smem:[%s8551_s0 + %s7224_s28]]   ;;  %s7228_s28 = smov 21  }
  0x18   :  { %s7374_s21 = sld [smem:[%s8551_s0 + %s7225_s7]]   ;;  %s7229_s7 = smov 22  }
  0x19   :  { %s7379_s9 = sld [smem:[%s8551_s0 + %s7226_s15]]   ;;  %s7230_s15 = smov 23  }
  0x1a   :  { %s7384_s14 = sld [smem:[%s8551_s0 + %s7227_s22]]   ;;  %s7231_s22 = smov 24  }
  0x1b   :  { %s7394_s5 = sld [smem:[%s8551_s0 + %s7229_s7]]   ;;  %s7233_s7 = smov 26  }
  0x1c   :  { %s7404_s25 = sld [smem:[%s8551_s0 + %s7231_s22]]   ;;  %s7235_s22 = smov 28  }
  0x1d   :  { %8571 = sst [smem:[#allocation48_spill]] %s7369_s4 }
  0x1e   :  { %8572 = sst [smem:[#allocation49_spill]] %s7374_s21 }
  0x1f   :  { %8573 = sst [smem:[#allocation50_spill]] %s7379_s9 }
  0x20   :  { %s7389_s4 = sld [smem:[%s8551_s0 + %s7228_s28]]   ;;  %s7232_s28 = smov 25  }
  0x21   :  { %8575 = sst [smem:[#allocation52_spill]] %s7394_s5 }
  0x22   :  { %s7399_s9 = sld [smem:[%s8551_s0 + %s7230_s15]]   ;;  %s7234_s15 = smov 27  }
  0x23   :  { %8576 = sst [smem:[#allocation53_spill]] %s7404_s25 }
  0x24   :  { %s7414_s5 = sld [smem:[%s8551_s0 + %s7233_s7]]   ;;  %s7237_s7 = smov 30  }
  0x25   :  { %s7419_s21 = sld [smem:[%s8551_s0 + %s7234_s15]]   ;;  %s7238_s15 = smov 31  }
  0x26   :  { %8574 = sst [smem:[#allocation51_spill]] %s7389_s4 }
  0x27   :  { %s7409_s4 = sld [smem:[%s8551_s0 + %s7232_s28]]   ;;  %s7236_s28 = smov 29  }
  0x28   :  { %s7424_s25 = sld [smem:[%s8551_s0 + %s7235_s22]]   ;;  %s7239_s22 = smov 32  }
  0x2a   :  { %8578 = sst [smem:[#allocation55_spill]] %s7414_s5 }
  0x2b   :  { %8579 = sst [smem:[#allocation56_spill]] %s7419_s21 }
  0x2c   :  { %s7434_s5 = sld [smem:[%s8551_s0 + %s7237_s7]]   ;;  %s7241_s7 = smov 34  }
  0x2d   :  { %8577 = sst [smem:[#allocation54_spill]] %s7409_s4 }
  0x2e   :  { %8580 = sst [smem:[#allocation57_spill]] %s7424_s25 }
  0x2f   :  { %s7429_s4 = sld [smem:[%s8551_s0 + %s7236_s28]]   ;;  %s7240_s28 = smov 33  }
  0x30   :  { %s7439_s21 = sld [smem:[%s8551_s0 + %s7238_s15]]   ;;  %s7242_s15 = smov 35  }
  0x31   :  { %s7444_s25 = sld [smem:[%s8551_s0 + %s7239_s22]]  }
  0x32   :  { %8582 = sst [smem:[#allocation59_spill]] %s7434_s5 }
  0x33   :  { %s7454_s5 = sld [smem:[%s8551_s0 + %s7241_s7]]  }
  0x35   :  { %8581 = sst [smem:[#allocation58_spill]] %s7429_s4 }
  0x36   :  { %8583 = sst [smem:[#allocation60_spill]] %s7439_s21 }
  0x37   :  { %s7449_s4 = sld [smem:[%s8551_s0 + %s7240_s28]]  }
  0x38   :  { %s7459_s21 = sld [smem:[%s8551_s0 + %s7242_s15]]  }
  0x39   :  { %76 = vsyncpa [#allocation3], 0 }
  0x3a   :  { %77 = vsyncpa [#allocation6], 0 }
  0x3b   :  { %78 = vsyncpa [#allocation9], 0 }
  0x3c   :  { %79 = vsyncpa [#allocation12], 0 }
  0x3d   :  { %80 = vsyncpa [#allocation15], 0 }
  0x3e   :  { %81 = vsyncpa [#allocation18], 0 }
  0x3f   :  { %82 = vsyncpa [#allocation21], 0 }
  0x40   :  { %83 = vsyncpa [#allocation24], 0 }
  0x41   :  { %84 = vsyncpa [#allocation27], 0 }
  0x42   :  { %85 = vsyncpa [#allocation30], 0 }
  0x43   :  { %86 = vsyncpa [#allocation4], 0  ;;  %s7243_s22 = smov [#allocation5]   ;;  %s7244_s26 = smov [#allocation8]  }
  0x44   :  { %s108_s23 = sshll.u32 %s7243_s22, 4  ;;  %s134_s28 = sshll.u32 %s7244_s26, 4  ;;  %s109_s23 = int_to_ptr.vmem [resolvable:$true] %s108_s23  ;;  %s7461_s28 = int_to_ptr.vmem [resolvable:$true] %s134_s28 }
  0x45   :  { %s6768_s0 = scalar_lea.hbm %s7299_s17, 128 }
  0x46   :  { %p6769_p0 = scmp.ne.s32.totalorder %s7299_s17, %s6768_s0  ;;  %p6772_p1 = scmp.lt.u32.totalorder %s6768_s0, %s7299_s17 }
  0x48   :  { %p6774_p2 = pnand %p6772_p1, %p6769_p0 }
  0x4a   :  { %6777 = shalt.err (!%p6774_p2)
}
  0x4b   :  { %s6778_s1 = scalar_lea.vmem %s109_s23, 128  ;;  %p6783_p4 = scmp.lt.s32.totalorder %s109_s23, %s109_s23 }
  0x4c   :  { %p6779_p3 = scmp.ne.s32.totalorder %s109_s23, %s6778_s1  ;;  %p6784_p5 = scmp.lt.s32.totalorder %s6778_s1, %s6778_s1 }
  0x4e   :  { %p6785_p6 = por %p6784_p5, %p6783_p4 }
  0x50   :  { %p6786_p7 = pnand %p6785_p6, %p6779_p3 }
  0x52   :  { %6789 = shalt.err (!%p6786_p7)
}
  0x53   :  { %s7245_s2 = smov 64   ;;  %s7246_s7 = smov 4  }
  0x54   :  { %114 = dma.hbm_to_vmem [thread:$0]  %s7299_s17, 128, %s109_s23, [#allocation6], %s7245_s2, %s7245_s2, %s7246_s7  }
  0x55   :  { %s6790_s10 = scalar_lea.hbm %s7319_s3, 256 }
  0x56   :  { %p6791_p8 = scmp.ne.s32.totalorder %s7319_s3, %s6790_s10  ;;  %p6794_p9 = scmp.lt.u32.totalorder %s6790_s10, %s7319_s3 }
  0x58   :  { %p6796_p10 = pnand %p6794_p9, %p6791_p8 }
  0x5a   :  { %6799 = shalt.err (!%p6796_p10)
}
  0x5b   :  { %s6800_s11 = scalar_lea.vmem %s7461_s28, 256  ;;  %p6805_p12 = scmp.lt.s32.totalorder %s7461_s28, %s7461_s28 }
  0x5c   :  { %p6801_p11 = scmp.ne.s32.totalorder %s7461_s28, %s6800_s11  ;;  %p6806_p13 = scmp.lt.s32.totalorder %s6800_s11, %s6800_s11 }
  0x5e   :  { %p6807_p0 = por %p6806_p13, %p6805_p12 }
  0x60   :  { %p6808_p1 = pnand %p6807_p0, %p6801_p11 }
  0x62   :  { %6811 = shalt.err (!%p6808_p1)
}
  0x63   :  { %140 = dma.hbm_to_vmem [thread:$0]  %s7319_s3, 256, %s7461_s28, [#allocation9], %s7245_s2, %s7245_s2, %s7246_s7  }
  0x64   :  { %s7247_s17 = smov [#allocation11]   ;;  %s7248_s16 = smov [#allocation14]  }
  0x65   :  { %s159_s15 = sshll.u32 %s7247_s17, 4  ;;  %s181_s18 = sshll.u32 %s7248_s16, 4  ;;  %s160_s15 = int_to_ptr.vmem [resolvable:$true] %s159_s15  ;;  %s182_s18 = int_to_ptr.vmem [resolvable:$true] %s181_s18 }
  0x66   :  { %s6812_s22 = scalar_lea.hbm %s7334_s19, 16 }
  0x67   :  { %p6813_p2 = scmp.ne.s32.totalorder %s7334_s19, %s6812_s22  ;;  %p6816_p3 = scmp.lt.u32.totalorder %s6812_s22, %s7334_s19 }
  0x69   :  { %p6818_p4 = pnand %p6816_p3, %p6813_p2 }
  0x6b   :  { %6821 = shalt.err (!%p6818_p4)
}
  0x6c   :  { %s6822_s23 = scalar_lea.vmem %s160_s15, 16  ;;  %s6826_s26 = scalar_lea.vmem %s160_s15, 32 }
  0x6d   :  { %p6823_p5 = scmp.ne.s32.totalorder %s160_s15, %s6822_s23  ;;  %p6827_p6 = scmp.lt.s32.totalorder %s160_s15, %s160_s15 }
  0x6e   :  { %p6828_p7 = scmp.lt.s32.totalorder %s6826_s26, %s6822_s23 }
  0x70   :  { %p6829_p8 = por %p6828_p7, %p6827_p6 }
  0x72   :  { %p6830_p9 = pnand %p6829_p8, %p6823_p5 }
  0x74   :  { %6833 = shalt.err (!%p6830_p9)
}
  0x75   :  { %162 = dma.hbm_to_vmem [thread:$0]  %s7334_s19, 16, %s160_s15, [#allocation12]  }
  0x76   :  { %s6834_s3 = scalar_lea.hbm %s7344_s30, 16 }
  0x77   :  { %p6835_p10 = scmp.ne.s32.totalorder %s7344_s30, %s6834_s3  ;;  %p6838_p11 = scmp.lt.u32.totalorder %s6834_s3, %s7344_s30 }
  0x79   :  { %p6840_p12 = pnand %p6838_p11, %p6835_p10 }
  0x7b   :  { %6843 = shalt.err (!%p6840_p12)
}
  0x7c   :  { %s6844_s28 = scalar_lea.vmem %s182_s18, 16  ;;  %s6848_s0 = scalar_lea.vmem %s182_s18, 32 }
  0x7d   :  { %p6845_p13 = scmp.ne.s32.totalorder %s182_s18, %s6844_s28  ;;  %p6849_p0 = scmp.lt.s32.totalorder %s182_s18, %s182_s18 }
  0x7e   :  { %p6850_p1 = scmp.lt.s32.totalorder %s6848_s0, %s6844_s28 }
  0x80   :  { %p6851_p2 = por %p6850_p1, %p6849_p0 }
  0x82   :  { %p6852_p3 = pnand %p6851_p2, %p6845_p13 }
  0x84   :  { %6855 = shalt.err (!%p6852_p3)
}
  0x85   :  { %184 = dma.hbm_to_vmem [thread:$0]  %s7344_s30, 16, %s182_s18, [#allocation15]  }
  0x86   :  { %s7249_s1 = smov [#allocation17]   ;;  %s7250_s10 = smov [#allocation20]  }
  0x87   :  { %s201_s19 = sshll.u32 %s7249_s1, 4  ;;  %s221_s11 = sshll.u32 %s7250_s10, 4  ;;  %s202_s19 = int_to_ptr.vmem [resolvable:$true] %s201_s19  ;;  %s222_s11 = int_to_ptr.vmem [resolvable:$true] %s221_s11 }
  0x88   :  { %s6856_s17 = scalar_lea.hbm %s7354_s12, 16 }
  0x89   :  { %p6857_p4 = scmp.ne.s32.totalorder %s7354_s12, %s6856_s17  ;;  %p6860_p5 = scmp.lt.u32.totalorder %s6856_s17, %s7354_s12 }
  0x8b   :  { %p6862_p6 = pnand %p6860_p5, %p6857_p4 }
  0x8d   :  { %6865 = shalt.err (!%p6862_p6)
}
  0x8e   :  { %s6866_s15 = scalar_lea.vmem %s202_s19, 16  ;;  %s6870_s16 = scalar_lea.vmem %s202_s19, 32 }
  0x8f   :  { %p6867_p7 = scmp.ne.s32.totalorder %s202_s19, %s6866_s15  ;;  %p6871_p8 = scmp.lt.s32.totalorder %s202_s19, %s202_s19 }
  0x90   :  { %p6872_p9 = scmp.lt.s32.totalorder %s6870_s16, %s6866_s15 }
  0x92   :  { %p6873_p10 = por %p6872_p9, %p6871_p8 }
  0x94   :  { %p6874_p11 = pnand %p6873_p10, %p6867_p7 }
  0x96   :  { %6877 = shalt.err (!%p6874_p11)
}
  0x97   :  { %204 = dma.hbm_to_vmem [thread:$0]  %s7354_s12, 16, %s202_s19, [#allocation18]  }
  0x98   :  { %s6878_s30 = scalar_lea.hbm %s7364_s27, 16 }
  0x99   :  { %p6879_p12 = scmp.ne.s32.totalorder %s7364_s27, %s6878_s30  ;;  %p6882_p13 = scmp.lt.u32.totalorder %s6878_s30, %s7364_s27 }
  0x9b   :  { %p6884_p0 = pnand %p6882_p13, %p6879_p12 }
  0x9d   :  { %6887 = shalt.err (!%p6884_p0)
}
  0x9e   :  { %s6888_s18 = scalar_lea.vmem %s222_s11, 16  ;;  %s6892_s22 = scalar_lea.vmem %s222_s11, 32 }
  0x9f   :  { %p6889_p1 = scmp.ne.s32.totalorder %s222_s11, %s6888_s18  ;;  %p6893_p2 = scmp.lt.s32.totalorder %s222_s11, %s222_s11 }
  0xa0   :  { %p6894_p3 = scmp.lt.s32.totalorder %s6892_s22, %s6888_s18 }
  0xa2   :  { %p6895_p4 = por %p6894_p3, %p6893_p2 }
  0xa4   :  { %p6896_p5 = pnand %p6895_p4, %p6889_p1 }
  0xa6   :  { %6899 = shalt.err (!%p6896_p5)
}
  0xa7   :  { %224 = dma.hbm_to_vmem [thread:$0]  %s7364_s27, 16, %s222_s11, [#allocation21]  }
  0xa8   :  { %s7251_s23 = smov [#allocation23]   ;;  %s7252_s26 = smov [#allocation26]  }
  0xa9   :  { %s245_s12 = sshll.u32 %s7251_s23, 4  ;;  %s266_s3 = sshll.u32 %s7252_s26, 4  ;;  %s246_s12 = int_to_ptr.vmem [resolvable:$true] %s245_s12  ;;  %s7498_s3 = int_to_ptr.vmem [resolvable:$true] %s266_s3 }
  0xaa   :  { %s6900_s28 = scalar_lea.hbm %s7384_s14, 16 }
  0xab   :  { %p6901_p6 = scmp.ne.s32.totalorder %s7384_s14, %s6900_s28  ;;  %p6904_p7 = scmp.lt.u32.totalorder %s6900_s28, %s7384_s14 }
  0xad   :  { %p6906_p8 = pnand %p6904_p7, %p6901_p6 }
  0xaf   :  { %6909 = shalt.err (!%p6906_p8)
}
  0xb0   :  { %s6910_s0 = scalar_lea.vmem %s246_s12, 16  ;;  %s6914_s1 = scalar_lea.vmem %s246_s12, 32 }
  0xb1   :  { %p6911_p9 = scmp.ne.s32.totalorder %s246_s12, %s6910_s0  ;;  %p6915_p10 = scmp.lt.s32.totalorder %s246_s12, %s246_s12 }
  0xb2   :  { %p6916_p11 = scmp.lt.s32.totalorder %s6914_s1, %s6910_s0 }
  0xb4   :  { %p6917_p12 = por %p6916_p11, %p6915_p10 }
  0xb6   :  { %p6918_p13 = pnand %p6917_p12, %p6911_p9 }
  0xb8   :  { %6921 = shalt.err (!%p6918_p13)
}
  0xb9   :  { %248 = dma.hbm_to_vmem [thread:$0]  %s7384_s14, 16, %s246_s12, [#allocation24]  }
  0xba   :  { %s6922_s27 = scalar_lea.hbm %s7399_s9, 256 }
  0xbb   :  { %p6923_p0 = scmp.ne.s32.totalorder %s7399_s9, %s6922_s27  ;;  %p6926_p1 = scmp.lt.u32.totalorder %s6922_s27, %s7399_s9 }
  0xbd   :  { %p6928_p2 = pnand %p6926_p1, %p6923_p0 }
  0xbf   :  { %6931 = shalt.err (!%p6928_p2)
}
  0xc0   :  { %s6932_s19 = scalar_lea.vmem %s7498_s3, 256  ;;  %p6937_p4 = scmp.lt.s32.totalorder %s7498_s3, %s7498_s3 }
  0xc1   :  { %p6933_p3 = scmp.ne.s32.totalorder %s7498_s3, %s6932_s19  ;;  %p6938_p5 = scmp.lt.s32.totalorder %s6932_s19, %s6932_s19 }
  0xc3   :  { %p6939_p6 = por %p6938_p5, %p6937_p4 }
  0xc5   :  { %p6940_p7 = pnand %p6939_p6, %p6933_p3 }
  0xc7   :  { %6943 = shalt.err (!%p6940_p7)
}
  0xc8   :  { %272 = dma.hbm_to_vmem [thread:$0]  %s7399_s9, 256, %s7498_s3, [#allocation27], %s7245_s2, %s7245_s2, %s7246_s7  }
  0xc9   :  { %s7253_s14 = smov [#allocation2]   ;;  %s7254_s11 = smov [#allocation7]  }
  0xca   :  { %s96_s10 = sshll.u32 %s7253_s14, 4  ;;  %s125_s17 = sshll.u32 %s7254_s11, 4  ;;  %s97_s10 = int_to_ptr.vmem [resolvable:$true] %s96_s10  ;;  %s126_s17 = int_to_ptr.vmem [resolvable:$true] %s125_s17 }
  0xcb   :  { %s6944_s15 = scalar_lea.hbm %s7294_s13, 128 }
  0xcc   :  { %p6945_p8 = scmp.ne.s32.totalorder %s7294_s13, %s6944_s15  ;;  %p6948_p9 = scmp.lt.u32.totalorder %s6944_s15, %s7294_s13 }
  0xce   :  { %p6950_p10 = pnand %p6948_p9, %p6945_p8 }
  0xd0   :  { %6953 = shalt.err (!%p6950_p10)
}
  0xd1   :  { %s6954_s16 = scalar_lea.vmem %s97_s10, 128  ;;  %p6959_p12 = scmp.lt.s32.totalorder %s97_s10, %s97_s10 }
  0xd2   :  { %p6955_p11 = scmp.ne.s32.totalorder %s97_s10, %s6954_s16  ;;  %p6960_p13 = scmp.lt.s32.totalorder %s6954_s16, %s6954_s16 }
  0xd4   :  { %p6961_p0 = por %p6960_p13, %p6959_p12 }
  0xd6   :  { %p6962_p1 = pnand %p6961_p0, %p6955_p11 }
  0xd8   :  { %6965 = shalt.err (!%p6962_p1)
}
  0xd9   :  { %102 = dma.hbm_to_vmem [thread:$0]  %s7294_s13, 128, %s97_s10, [#allocation3], %s7245_s2, %s7245_s2, %s7246_s7  }
  0xda   :  { %s6966_s9 = scalar_lea.hbm %s7314_s29, 16 }
  0xdb   :  { %p6967_p2 = scmp.ne.s32.totalorder %s7314_s29, %s6966_s9  ;;  %p6970_p3 = scmp.lt.u32.totalorder %s6966_s9, %s7314_s29 }
  0xdd   :  { %p6972_p4 = pnand %p6970_p3, %p6967_p2 }
  0xdf   :  { %6975 = shalt.err (!%p6972_p4)
}
  0xe0   :  { %s6976_s30 = scalar_lea.vmem %s126_s17, 16  ;;  %s6980_s18 = scalar_lea.vmem %s126_s17, 32 }
  0xe1   :  { %p6977_p5 = scmp.ne.s32.totalorder %s126_s17, %s6976_s30  ;;  %p6981_p6 = scmp.lt.s32.totalorder %s126_s17, %s126_s17 }
  0xe2   :  { %p6982_p7 = scmp.lt.s32.totalorder %s6980_s18, %s6976_s30 }
  0xe4   :  { %p6983_p8 = por %p6982_p7, %p6981_p6 }
  0xe6   :  { %p6984_p9 = pnand %p6983_p8, %p6977_p5 }
  0xe8   :  { %6987 = shalt.err (!%p6984_p9)
}
  0xe9   :  { %128 = dma.hbm_to_vmem [thread:$0]  %s7314_s29, 16, %s126_s17, [#allocation6]  }
  0xea   :  { %s7255_s22 = smov [#allocation10]   ;;  %s7256_s23 = smov [#allocation13]  }
  0xeb   :  { %s147_s13 = sshll.u32 %s7255_s22, 4  ;;  %s168_s12 = sshll.u32 %s7256_s23, 4  ;;  %s148_s13 = int_to_ptr.vmem [resolvable:$true] %s147_s13  ;;  %s7527_s12 = int_to_ptr.vmem [resolvable:$true] %s168_s12 }
  0xec   :  { %s6988_s26 = scalar_lea.hbm %s7324_s8, 16 }
  0xed   :  { %p6989_p10 = scmp.ne.s32.totalorder %s7324_s8, %s6988_s26  ;;  %p6992_p11 = scmp.lt.u32.totalorder %s6988_s26, %s7324_s8 }
  0xef   :  { %p6994_p12 = pnand %p6992_p11, %p6989_p10 }
  0xf1   :  { %6997 = shalt.err (!%p6994_p12)
}
  0xf2   :  { %s6998_s3 = scalar_lea.vmem %s148_s13, 16  ;;  %s7002_s28 = scalar_lea.vmem %s148_s13, 32 }
  0xf3   :  { %p6999_p13 = scmp.ne.s32.totalorder %s148_s13, %s6998_s3  ;;  %p7003_p0 = scmp.lt.s32.totalorder %s148_s13, %s148_s13 }
  0xf4   :  { %p7004_p1 = scmp.lt.s32.totalorder %s7002_s28, %s6998_s3 }
  0xf6   :  { %p7005_p2 = por %p7004_p1, %p7003_p0 }
  0xf8   :  { %p7006_p3 = pnand %p7005_p2, %p6999_p13 }
  0xfa   :  { %7009 = shalt.err (!%p7006_p3)
}
  0xfb   :  { %150 = dma.hbm_to_vmem [thread:$0]  %s7324_s8, 16, %s148_s13, [#allocation9]  }
  0xfc   :  { %s7010_s29 = scalar_lea.hbm %s7339_s24, 256 }
  0xfd   :  { %p7011_p4 = scmp.ne.s32.totalorder %s7339_s24, %s7010_s29  ;;  %p7014_p5 = scmp.lt.u32.totalorder %s7010_s29, %s7339_s24 }
  0xff   :  { %p7016_p6 = pnand %p7014_p5, %p7011_p4 }
 0x101   :  { %7019 = shalt.err (!%p7016_p6)
}
 0x102   :  { %s7020_s0 = scalar_lea.vmem %s7527_s12, 256  ;;  %p7025_p8 = scmp.lt.s32.totalorder %s7527_s12, %s7527_s12 }
 0x103   :  { %p7021_p7 = scmp.ne.s32.totalorder %s7527_s12, %s7020_s0  ;;  %p7026_p9 = scmp.lt.s32.totalorder %s7020_s0, %s7020_s0 }
 0x105   :  { %p7027_p10 = por %p7026_p9, %p7025_p8 }
 0x107   :  { %p7028_p11 = pnand %p7027_p10, %p7021_p7 }
 0x109   :  { %7031 = shalt.err (!%p7028_p11)
}
 0x10a   :  { %174 = dma.hbm_to_vmem [thread:$0]  %s7339_s24, 256, %s7527_s12, [#allocation12], %s7245_s2, %s7245_s2, %s7246_s7  }
 0x10b   :  { %s7257_s8 = smov [#allocation16]   ;;  %s7258_s27 = smov [#allocation19]  }
 0x10c   :  { %s191_s1 = sshll.u32 %s7257_s8, 4  ;;  %s211_s19 = sshll.u32 %s7258_s27, 4  ;;  %s192_s1 = int_to_ptr.vmem [resolvable:$true] %s191_s1  ;;  %s212_s19 = int_to_ptr.vmem [resolvable:$true] %s211_s19 }
 0x10d   :  { %s7032_s14 = scalar_lea.hbm %s7349_s6, 16 }
 0x10e   :  { %p7033_p12 = scmp.ne.s32.totalorder %s7349_s6, %s7032_s14  ;;  %p7036_p13 = scmp.lt.u32.totalorder %s7032_s14, %s7349_s6 }
 0x110   :  { %p7038_p0 = pnand %p7036_p13, %p7033_p12 }
 0x112   :  { %7041 = shalt.err (!%p7038_p0)
}
 0x113   :  { %s7042_s10 = scalar_lea.vmem %s192_s1, 16  ;;  %s7046_s11 = scalar_lea.vmem %s192_s1, 32 }
 0x114   :  { %p7043_p1 = scmp.ne.s32.totalorder %s192_s1, %s7042_s10  ;;  %p7047_p2 = scmp.lt.s32.totalorder %s192_s1, %s192_s1 }
 0x115   :  { %p7048_p3 = scmp.lt.s32.totalorder %s7046_s11, %s7042_s10 }
 0x117   :  { %p7049_p4 = por %p7048_p3, %p7047_p2 }
 0x119   :  { %p7050_p5 = pnand %p7049_p4, %p7043_p1 }
 0x11b   :  { %7053 = shalt.err (!%p7050_p5)
}
 0x11c   :  { %194 = dma.hbm_to_vmem [thread:$0]  %s7349_s6, 16, %s192_s1, [#allocation15]  }
 0x11d   :  { %s7054_s24 = scalar_lea.hbm %s7359_s20, 16 }
 0x11e   :  { %p7055_p6 = scmp.ne.s32.totalorder %s7359_s20, %s7054_s24  ;;  %p7058_p7 = scmp.lt.u32.totalorder %s7054_s24, %s7359_s20 }
 0x120   :  { %p7060_p8 = pnand %p7058_p7, %p7055_p6 }
 0x122   :  { %7063 = shalt.err (!%p7060_p8)
}
 0x123   :  { %s7064_s2 = scalar_lea.vmem %s212_s19, 16  ;;  %s7068_s7 = scalar_lea.vmem %s212_s19, 32 }
 0x124   :  { %p7065_p9 = scmp.ne.s32.totalorder %s212_s19, %s7064_s2  ;;  %p7069_p10 = scmp.lt.s32.totalorder %s212_s19, %s212_s19 }
 0x125   :  { %p7070_p11 = scmp.lt.s32.totalorder %s7068_s7, %s7064_s2 }
 0x127   :  { %p7071_p12 = por %p7070_p11, %p7069_p10 }
 0x129   :  { %p7072_p13 = pnand %p7071_p12, %p7065_p9 }
 0x12b   :  { %7075 = shalt.err (!%p7072_p13)
}
 0x12c   :  { %s8584_s17 = sld [smem:[#allocation49_spill]]  ;;  %s7259_s15 = smov [#allocation22]  }
 0x12d   :  { %214 = dma.hbm_to_vmem [thread:$0]  %s7359_s20, 16, %s212_s19, [#allocation18]  }
 0x12e   :  { %s233_s6 = sshll.u32 %s7259_s15, 4  ;;  %s7260_s16 = smov [#allocation25]   ;;  %s234_s6 = int_to_ptr.vmem [resolvable:$true] %s233_s6 }
 0x12f   :  { %s257_s9 = sshll.u32 %s7260_s16, 4  ;;  %s258_s9 = int_to_ptr.vmem [resolvable:$true] %s257_s9 }
 0x132   :  { %s7076_s30 = scalar_lea.hbm %s8584_s17, 16 }
 0x133   :  { %p7077_p0 = scmp.ne.s32.totalorder %s8584_s17, %s7076_s30  ;;  %p7080_p1 = scmp.lt.u32.totalorder %s7076_s30, %s8584_s17 }
 0x135   :  { %p7082_p2 = pnand %p7080_p1, %p7077_p0 }
 0x137   :  { %7085 = shalt.err (!%p7082_p2)
}
 0x138   :  { %s7086_s18 = scalar_lea.vmem %s234_s6, 16  ;;  %s7090_s22 = scalar_lea.vmem %s234_s6, 32 }
 0x139   :  { %p7087_p3 = scmp.ne.s32.totalorder %s234_s6, %s7086_s18  ;;  %p7091_p4 = scmp.lt.s32.totalorder %s234_s6, %s234_s6 }
 0x13a   :  { %p7092_p5 = scmp.lt.s32.totalorder %s7090_s22, %s7086_s18 }
 0x13c   :  { %p7093_p6 = por %p7092_p5, %p7091_p4 }
 0x13e   :  { %p7094_p7 = pnand %p7093_p6, %p7087_p3 }
 0x140   :  { %7097 = shalt.err (!%p7094_p7)
}
 0x141   :  { %s8585_s20 = sld [smem:[#allocation52_spill]] }
 0x142   :  { %236 = dma.hbm_to_vmem [thread:$0]  %s8584_s17, 16, %s234_s6, [#allocation21]  }
 0x147   :  { %s7098_s13 = scalar_lea.hbm %s8585_s20, 16 }
 0x148   :  { %p7099_p8 = scmp.ne.s32.totalorder %s8585_s20, %s7098_s13  ;;  %p7102_p9 = scmp.lt.u32.totalorder %s7098_s13, %s8585_s20 }
 0x14a   :  { %p7104_p10 = pnand %p7102_p9, %p7099_p8 }
 0x14c   :  { %7107 = shalt.err (!%p7104_p10)
}
 0x14d   :  { %s7108_s23 = scalar_lea.vmem %s258_s9, 16  ;;  %s7112_s12 = scalar_lea.vmem %s258_s9, 32 }
 0x14e   :  { %p7109_p11 = scmp.ne.s32.totalorder %s258_s9, %s7108_s23  ;;  %p7113_p12 = scmp.lt.s32.totalorder %s258_s9, %s258_s9 }
 0x14f   :  { %p7114_p13 = scmp.lt.s32.totalorder %s7112_s12, %s7108_s23 }
 0x151   :  { %p7115_p0 = por %p7114_p13, %p7113_p12 }
 0x153   :  { %p7116_p1 = pnand %p7115_p0, %p7109_p11 }
 0x155   :  { %7119 = shalt.err (!%p7116_p1)
}
 0x156   :  { %s8586_s26 = sld [smem:[#allocation53_spill]]  ;;  %s7261_s3 = smov [#allocation28]  }
 0x157   :  { %260 = dma.hbm_to_vmem [thread:$0]  %s8585_s20, 16, %s258_s9, [#allocation24]  }
 0x158   :  { %s279_s28 = sshll.u32 %s7261_s3, 4  ;;  %s7262_s29 = smov [#allocation29]   ;;  %s280_s28 = int_to_ptr.vmem [resolvable:$true] %s279_s28 }
 0x159   :  { %s289_s0 = sshll.u32 %s7262_s29, 4  ;;  %s290_s0 = int_to_ptr.vmem [resolvable:$true] %s289_s0 }
 0x15c   :  { %s7120_s8 = scalar_lea.hbm %s8586_s26, 16 }
 0x15d   :  { %p7121_p2 = scmp.ne.s32.totalorder %s8586_s26, %s7120_s8  ;;  %p7124_p3 = scmp.lt.u32.totalorder %s7120_s8, %s8586_s26 }
 0x15f   :  { %p7126_p4 = pnand %p7124_p3, %p7121_p2 }
 0x161   :  { %7129 = shalt.err (!%p7126_p4)
}
 0x162   :  { %s7130_s1 = scalar_lea.vmem %s280_s28, 16  ;;  %s7134_s27 = scalar_lea.vmem %s280_s28, 32 }
 0x163   :  { %p7131_p5 = scmp.ne.s32.totalorder %s280_s28, %s7130_s1  ;;  %p7135_p6 = scmp.lt.s32.totalorder %s280_s28, %s280_s28 }
 0x164   :  { %p7136_p7 = scmp.lt.s32.totalorder %s7134_s27, %s7130_s1 }
 0x166   :  { %p7137_p8 = por %p7136_p7, %p7135_p6 }
 0x168   :  { %p7138_p9 = pnand %p7137_p8, %p7131_p5 }
 0x16a   :  { %7141 = shalt.err (!%p7138_p9)
}
 0x16b   :  { %s8587_s19 = sld [smem:[#allocation54_spill]] }
 0x16c   :  { %282 = dma.hbm_to_vmem [thread:$0]  %s8586_s26, 16, %s280_s28, [#allocation27]  }
 0x171   :  { %s7142_s14 = scalar_lea.hbm %s8587_s19, 16 }
 0x172   :  { %p7143_p10 = scmp.ne.s32.totalorder %s8587_s19, %s7142_s14  ;;  %p7146_p11 = scmp.lt.u32.totalorder %s7142_s14, %s8587_s19 }
 0x174   :  { %p7148_p12 = pnand %p7146_p11, %p7143_p10 }
 0x176   :  { %7151 = shalt.err (!%p7148_p12)
}
 0x177   :  { %s7152_s10 = scalar_lea.vmem %s290_s0, 16  ;;  %s7156_s11 = scalar_lea.vmem %s290_s0, 32 }
 0x178   :  { %p7153_p13 = scmp.ne.s32.totalorder %s290_s0, %s7152_s10  ;;  %p7157_p0 = scmp.lt.s32.totalorder %s290_s0, %s290_s0 }
 0x179   :  { %p7158_p1 = scmp.lt.s32.totalorder %s7156_s11, %s7152_s10 }
 0x17b   :  { %p7159_p2 = por %p7158_p1, %p7157_p0 }
 0x17d   :  { %p7160_p3 = pnand %p7159_p2, %p7153_p13 }
 0x17f   :  { %7163 = shalt.err (!%p7160_p3)
}
 0x180   :  { %292 = dma.hbm_to_vmem [thread:$0]  %s8587_s19, 16, %s290_s0, [#allocation30]  }
 0x181   :  { %7186 = dma.done.wait [#allocation3], 128  }
 0x182   :  { %7187 = vsyncadd [#allocation3], 4294967168 }
 0x183   :  { %7188 = dma.done.wait [#allocation6], 144  }
 0x184   :  { %7189 = vsyncadd [#allocation6], 4294967152 }
 0x185   :  { %7190 = dma.done.wait [#allocation9], 272  }
 0x186   :  { %7191 = vsyncadd [#allocation9], 4294967024 }
 0x187   :  { %7192 = dma.done.wait [#allocation12], 272  }
 0x188   :  { %7193 = vsyncadd [#allocation12], 4294967024 }
 0x189   :  { %7194 = dma.done.wait [#allocation15], 32  }
 0x18a   :  { %7195 = vsyncadd [#allocation15], 4294967264 }
 0x18b   :  { %7196 = dma.done.wait [#allocation18], 32  }
 0x18c   :  { %7197 = vsyncadd [#allocation18], 4294967264 }
 0x18d   :  { %7198 = dma.done.wait [#allocation21], 32  }
 0x18e   :  { %7199 = vsyncadd [#allocation21], 4294967264 }
 0x18f   :  { %7200 = dma.done.wait [#allocation24], 32  }
 0x190   :  { %7201 = vsyncadd [#allocation24], 4294967264 }
 0x191   :  { %7202 = dma.done.wait [#allocation27], 272  }
 0x192   :  { %7203 = vsyncadd [#allocation27], 4294967024 }
 0x193   :  { %7204 = dma.done.wait [#allocation30], 16  }
 0x194   :  { %7205 = vsyncadd [#allocation30], 4294967280  ;;  %s8588_s24 = sld [smem:[#allocation46_spill]]  ;;  %s8589_s2 = sld [smem:[#allocation43_spill]]  ;;  %v7263_v0 = vmov 0.0   ;;  %vm7264_vm0 = vmmov 0   ;;  %v603_v28 = vlaneseq }
 0x195   :  { %6292 = vmatprep.subr.bf16.mxu1 %v7263_v0  ;;  %6284 = vmatprep.subr.bf16.mxu0 %v7263_v0  ;;  %v6660_v1 = vld [vmem:[#allocation8] sm:$0xff]   ;;  %v6662_v3 = vld [vmem:[#allocation8 + $0x8] sm:$0xff]   ;;  %s8590_s7 = sld [smem:[#allocation47_spill]]  ;;  %vm413_vm1 = vcmask 261120   ;;  %v6056_v10 = vld [vmem:[#allocation10] ss:$0 sm:$0xff] }
 0x196   :  { %6296 = vmatprep.mubr.msk.bf16.mxu1 %vm7264_vm0, %v7263_v0  ;;  %6288 = vmatprep.mubr.msk.bf16.mxu0 %vm7264_vm0, %v7263_v0  ;;  %v6052_v11 = vld [vmem:[#allocation7] ss:$0 sm:$0xff]  ;;  %s7265_s17 = smov 104   ;;  %s7266_s15 = smov 120   ;;  %v7268_v26 = vmov 1983009808  }
 0x197   :  { %6293 = vmatpush3.bf16.msra.mxu1 %v6660_v1  ;;  %s7267_s6 = smov 112   ;;  %v601_v27 = vunpack.c.l.s4 %v7268_v26  ;;  %v6060_v29 = vld [vmem:[#allocation11] ss:$0 sm:$0xff]  ;;  %v7269_v30 = vmov 1934713408   ;;  %v604_v34 = vshrl.u32 %v603_v28, 7 }
 0x198   :  { %6294 = vmatprep.subr.bf16.mxu1 %v7263_v0  ;;  %v633_v31 = vunpack.c.l.s4 %v7269_v30  ;;  %vm1470_vm2 = vcmask 64512   ;;  %vm1954_vm3 = vcmask 1043456   ;;  %s7270_s16 = smov 16   ;;  %s7271_s9 = smov 8   ;;  %vm2618_vm4 = vcmask 130048  }
 0x199   :  { %v602_v33 = vunpack.c.0.s8 %v601_v27  ;;  %s7272_s30 = smov 24   ;;  %vm2621_vm5 = vcmask 195584   ;;  %s8591_s18 = sld [smem:[#allocation50_spill]]  ;;  %vm5896_vm6 = vcmask 523264  }
 0x19a   :  { %v6661_v2 = vld [vmem:[%s8588_s24] sm:$0xff]   ;;  %v6663_v4 = vld [vmem:[%s8588_s24 + $0x8] sm:$0xff]   ;;  %v634_v40 = vunpack.c.0.s8 %v633_v31  ;;  %s8592_s22 = sld [smem:[#allocation44_spill]]  ;;  %s8593_s20 = sld [smem:[#allocation45_spill]] }
 0x19b   :  { %6285 = vmatpush3.bf16.msra.mxu0 %v6661_v2  ;;  %v366_v5 = vld [vmem:[%s8589_s2] sm:$0xff]  ;;  %v367_v6 = vld [vmem:[%s8589_s2 + $0x8] sm:$0xff]  ;;  %6295 = vmatpush3.bf16.msra.mxu1 %v6662_v3  ;;  %v7624_v43 = vsub.s32 %v602_v33, %v604_v34  ;;  %s8594_s13 = sld [smem:[#allocation48_spill]]  ;;  %s8595_s23 = sld [smem:[#allocation51_spill]] }
 0x19c   :  { %6286 = vmatprep.subr.bf16.mxu0 %v7263_v0  ;;  %v394_v7 = vpack.c.bf16 %v367_v6, %v366_v5  ;;  %6308 = vmatprep.subr.bf16.mxu1 %v7263_v0  ;;  %v6664_v8 = vld [vmem:[%s8590_s7] sm:$0xff]   ;;  %v6665_v9 = vld [vmem:[%s8590_s7 + $0x8] sm:$0xff]   ;;  %v7626_v50 = vsub.s32 %v634_v40, %v604_v34  ;;  %s8596_s12 = sld [smem:[#allocation55_spill]]  ;;  %s8597_s26 = sld [smem:[#allocation58_spill]] }
 0x19d   :  { %s8598_s3 = sld [smem:[#allocation60_spill]]  ;;  %s8599_s28 = sld [smem:[#allocation56_spill]] }
 0x19e   :  { %6297 = vmatmul.mubr.msk.bf16.vlgmr.msra.gmra.mrb[0].mxu1 %vm413_vm1, %v394_v7  ;;  %s8600_s29 = sld [smem:[#allocation57_spill]]  ;;  %s8601_s0 = sld [smem:[#allocation59_spill]] }
 0x19f   :  { %6287 = vmatpush3.bf16.msra.mxu0 %v6663_v4  ;;  %6310 = vmatprep.mubr.msk.bf16.mxu1 %vm7264_vm0, %v7263_v0 }
 0x1a0   :  { %6300 = vmatprep.subr.bf16.mxu0 %v7263_v0 }
 0x1a2   :  { %6289 = vmatmul.mubr.msk.bf16.vlgmr.msra.gmra.mrb[0].mxu0 %vm413_vm1, %v394_v7 }
 0x1a3   :  { %6304 = vmatprep.mubr.msk.bf16.mxu0 %vm7264_vm0, %v7263_v0  ;;  %6301 = vmatpush3.bf16.msra.mxu0 %v6664_v8 }
 0x1a4   :  { %6302 = vmatprep.subr.bf16.mxu0 %v7263_v0 }
 0x1a7   :  { %6303 = vmatpush3.bf16.msra.mxu0 %v6665_v9 }
 0x1a8   :  { %6314 = vmatprep.subr.bf16.mxu0 %v7263_v0 }
 0x1aa   :  { %6305 = vmatmul.mubr.msk.bf16.vlgmr.msra.gmra.mrb[4].mxu0 %vm413_vm1, %v394_v7 }
 0x1ab   :  { %6316 = vmatprep.mubr.msk.bf16.mxu0 %vm7264_vm0, %v7263_v0 }
 0x271   :  { %v512_v12 = vpop.f32.mrb[0].mxu1 }
 0x272   :  { %v513_v13 = vadd.f32 %v6056_v10, %v512_v12  ;;  %v6298_v14 = vpop.f32.mrb[1].mxu1 }
 0x273   :  { %v515_v17 = vpop.f32.mrb[2].mxu1 }
 0x274   :  { %884 = vrot.lane.b32.xlu1 %v513_v13, %s7265_s17  ;;  %872 = vrot.lane.b32.xlu0 %v513_v13, %s7266_s15  ;;  %v6299_v19 = vpop.f32.mrb[3].mxu1  ;;  %v7602_v23 = vadd.f32 %v6056_v10, %v515_v17 }
 0x275   :  { %v451_v15 = vpop.f32.mrb[0].mxu0 }
 0x276   :  { %v452_v16 = vadd.f32 %v6052_v11, %v451_v15  ;;  %v6290_v18 = vpop.f32.mrb[1].mxu0 }
 0x277   :  { %v454_v20 = vpop.f32.mrb[2].mxu0 }
 0x278   :  { %v458_v21 = vmul.f32 0.35355338, %v452_v16  ;;  %v6291_v22 = vpop.f32.mrb[3].mxu0  ;;  %878 = vrot.lane.b32.xlu0 %v513_v13, %s7267_s6  ;;  %v455_v24 = vadd.f32 %v6052_v11, %v454_v20 }
 0x27a   :  { %580 = vrot.lane.b32.xlu1 %v458_v21, %s7266_s15  ;;  %v7608_v25 = vmul.f32 0.35355338, %v455_v24 }
 0x27c   :  { %586 = vrot.lane.b32.xlu0 %v458_v21, %s7267_s6 }
 0x27d   :  { %v571_v32 = vpop.f32.mrb[4].mxu0 }
 0x27e   :  { %592 = vrot.lane.b32.xlu1 %v458_v21, %s7265_s17  ;;  %v7618_v35 = vadd.f32 %v6060_v29, %v571_v32  ;;  %v6306_v36 = vpop.f32.mrb[5].mxu0 }
 0x27f   :  { %v574_v39 = vpop.f32.mrb[6].mxu0 }
 0x280   :  { %874 = vrot.lane.b32.xlu0 %v7602_v23, %s7266_s15  ;;  %v7622_v41 = vadd.f32 %v6060_v29, %v574_v39  ;;  %v6307_v42 = vpop.f32.mrb[7].mxu0 }
 0x282   :  { %880 = vrot.lane.b32.xlu1 %v7602_v23, %s7267_s6 }
 0x284   :  { %886 = vrot.lane.b32.xlu0 %v7602_v23, %s7265_s17 }
 0x286   :  { %582 = vrot.lane.b32.xlu1 %v7608_v25, %s7266_s15 }
 0x288   :  { %588 = vrot.lane.b32.xlu0 %v7608_v25, %s7267_s6 }
 0x28a   :  { %594 = vrot.lane.b32.xlu1 %v7608_v25, %s7265_s17 }
 0x28e   :  { %1164 = vrot.lane.b32.xlu1 %v7618_v35, %s7266_s15 }
 0x2e6   :  { %v885_v37 = vpop.permute.xlu1 %884  ;;  %v873_v38 = vpop.permute.xlu0 %872 }
 0x2e7   :  { %v906_v44 = vcombine.low %v873_v38, %v885_v37  ;;  %v907_v45 = vcombine.high %v873_v38, %v885_v37 }
 0x2e9   :  { %v914_v51 = vrot.slane %v906_v44, %v7624_v43  ;;  %v921_v52 = vrot.slane %v907_v45, %v7624_v43 }
 0x2ea   :  { %v879_v46 = vpop.permute.xlu0 %878 }
 0x2eb   :  { %v890_v48 = vcombine.low %v513_v13, %v879_v46  ;;  %v891_v49 = vcombine.high %v513_v13, %v879_v46 }
 0x2ec   :  { %v581_v47 = vpop.permute.xlu1 %580 }
 0x2ed   :  { %v898_v53 = vrot.slane %v890_v48, %v7624_v43  ;;  %v905_v54 = vrot.slane %v891_v49, %v7624_v43 }
 0x2ee   :  { %v587_v55 = vpop.permute.xlu0 %586 }
 0x2ef   :  { %v922_v57 = vcombine.low %v898_v53, %v914_v51  ;;  %v923_v58 = vcombine.high %v898_v53, %v914_v51  ;;  %v938_v59 = vcombine.low %v905_v54, %v921_v52  ;;  %v939_v60 = vcombine.high %v905_v54, %v921_v52 }
 0x2f0   :  { %v593_v56 = vpop.permute.xlu1 %592  ;;  %v598_v61 = vcombine.low %v458_v21, %v587_v55  ;;  %v599_v62 = vcombine.high %v458_v21, %v587_v55 }
 0x2f1   :  { %v614_v63 = vcombine.low %v581_v47, %v593_v56  ;;  %v615_v1 = vcombine.high %v581_v47, %v593_v56  ;;  %v930_v2 = vrot.slane %v922_v57, %v7626_v50  ;;  %v937_v3 = vrot.slane %v923_v58, %v7626_v50 }
 0x2f2   :  { %v606_v4 = vrot.slane %v598_v61, %v7624_v43  ;;  %v613_v5 = vrot.slane %v599_v62, %v7624_v43  ;;  %v875_v8 = vpop.permute.xlu0 %874  ;;  %v946_v10 = vrot.slane %v938_v59, %v7626_v50  ;;  %v953_v11 = vrot.slane %v939_v60, %v7626_v50 }
 0x2f3   :  { %v622_v6 = vrot.slane %v614_v63, %v7624_v43  ;;  %v629_v7 = vrot.slane %v615_v1, %v7624_v43  ;;  %v1026_v16 = vcombine.low %v930_v2, %v937_v3  ;;  %v6068_v17 = vcombine.high %v930_v2, %v937_v3 }
 0x2f4   :  { %v881_v9 = vpop.permute.xlu1 %880  ;;  %v1042_v28 = vcombine.low %v946_v10, %v953_v11  ;;  %v6069_v29 = vcombine.high %v946_v10, %v953_v11 }
 0x2f5   :  { %v630_v12 = vcombine.low %v606_v4, %v622_v6  ;;  %v631_v13 = vcombine.high %v606_v4, %v622_v6  ;;  %v646_v14 = vcombine.low %v613_v5, %v629_v7  ;;  %v647_v15 = vcombine.high %v613_v5, %v629_v7 }
 0x2f6   :  { %v958_v18 = vcombine.low %v7602_v23, %v881_v9  ;;  %v959_v19 = vcombine.high %v7602_v23, %v881_v9  ;;  %v887_v26 = vpop.permute.xlu0 %886  ;;  %v1033_v48 = vrot.slane %v1026_v16, %v7624_v43  ;;  %v1041_v49 = vrot.slane %v6068_v17, %v7624_v43 }
 0x2f7   :  { %v638_v20 = vrot.slane %v630_v12, %v7626_v50  ;;  %v645_v21 = vrot.slane %v631_v13, %v7626_v50  ;;  %v654_v22 = vrot.slane %v646_v14, %v7626_v50  ;;  %v661_v24 = vrot.slane %v647_v15, %v7626_v50 }
 0x2f8   :  { %v583_v27 = vpop.permute.xlu1 %582  ;;  %v974_v30 = vcombine.low %v875_v8, %v887_v26  ;;  %v975_v31 = vcombine.high %v875_v8, %v887_v26  ;;  %v966_v34 = vrot.slane %v958_v18, %v7624_v43  ;;  %v973_v23 = vrot.slane %v959_v19, %v7624_v43 }
 0x2f9   :  { %v734_v32 = vcombine.low %v638_v20, %v645_v21  ;;  %v6064_v33 = vcombine.high %v638_v20, %v645_v21  ;;  %v750_v36 = vcombine.low %v654_v22, %v661_v24  ;;  %v6065_v37 = vcombine.high %v654_v22, %v661_v24 }
 0x2fa   :  { %v982_v38 = vrot.slane %v974_v30, %v7624_v43  ;;  %v989_v39 = vrot.slane %v975_v31, %v7624_v43  ;;  %v589_v46 = vpop.permute.xlu0 %588  ;;  %v1049_v51 = vrot.slane %v1042_v28, %v7624_v43  ;;  %v1057_v52 = vrot.slane %v6069_v29, %v7624_v43 }
 0x2fb   :  { %v7655_v53 = vrot.slane %v734_v32, %v7624_v43  ;;  %v7658_v54 = vrot.slane %v6064_v33, %v7624_v43  ;;  %v7661_v55 = vrot.slane %v750_v36, %v7624_v43  ;;  %v7664_v56 = vrot.slane %v6065_v37, %v7624_v43 }
 0x2fc   :  { %v990_v40 = vcombine.low %v966_v34, %v982_v38  ;;  %v991_v42 = vcombine.high %v966_v34, %v982_v38  ;;  %v1006_v44 = vcombine.low %v973_v23, %v989_v39  ;;  %v1007_v45 = vcombine.high %v973_v23, %v989_v39  ;;  %v595_v47 = vpop.permute.xlu1 %594 }
 0x2fd   :  { %v666_v57 = vcombine.low %v7608_v25, %v589_v46  ;;  %v667_v58 = vcombine.high %v7608_v25, %v589_v46  ;;  %v682_v59 = vcombine.low %v583_v27, %v595_v47  ;;  %v683_v60 = vcombine.high %v583_v27, %v595_v47 }
 0x2fe   :  { %v998_v61 = vrot.slane %v990_v40, %v7626_v50  ;;  %v1005_v62 = vrot.slane %v991_v42, %v7626_v50  ;;  %v1014_v63 = vrot.slane %v1006_v44, %v7626_v50  ;;  %v1021_v1 = vrot.slane %v1007_v45, %v7626_v50 }
 0x2ff   :  { %v674_v2 = vrot.slane %v666_v57, %v7624_v43  ;;  %v681_v3 = vrot.slane %v667_v58, %v7624_v43  ;;  %v690_v4 = vrot.slane %v682_v59, %v7624_v43  ;;  %v697_v5 = vrot.slane %v683_v60, %v7624_v43 }
 0x300   :  { %v766_v25 = vcombine.low %v7655_v53, %v7658_v54  ;;  %v782_v6 = vcombine.low %v7661_v55, %v7664_v56  ;;  %v1094_v9 = vcombine.low %v998_v61, %v1005_v62  ;;  %v6070_v10 = vcombine.high %v998_v61, %v1005_v62 }
 0x301   :  { %v698_v7 = vcombine.low %v674_v2, %v690_v4  ;;  %v699_v8 = vcombine.high %v674_v2, %v690_v4  ;;  %v1058_v11 = vcombine.low %v1033_v48, %v1041_v49  ;;  %v1074_v12 = vcombine.low %v1049_v51, %v1057_v52 }
 0x302   :  { %v1110_v13 = vcombine.low %v1014_v63, %v1021_v1  ;;  %v6071_v14 = vcombine.high %v1014_v63, %v1021_v1  ;;  %v714_v15 = vcombine.low %v681_v3, %v697_v5  ;;  %v715_v16 = vcombine.high %v681_v3, %v697_v5 }
 0x303   :  { %v767_v17 = vcombine.high %v7655_v53, %v7658_v54  ;;  %v783_v18 = vcombine.high %v7661_v55, %v7664_v56  ;;  %v1066_v19 = vrot.slane %v1058_v11, %v7626_v50  ;;  %v1082_v20 = vrot.slane %v1074_v12, %v7626_v50 }
 0x304   :  { %v706_v21 = vrot.slane %v698_v7, %v7626_v50  ;;  %v713_v22 = vrot.slane %v699_v8, %v7626_v50  ;;  %v774_v24 = vrot.slane %v766_v25, %v7626_v50  ;;  %v790_v26 = vrot.slane %v782_v6, %v7626_v50 }
 0x305   :  { %v7691_v27 = vrot.slane %v1094_v9, %v7624_v43  ;;  %v1109_v28 = vrot.slane %v6070_v10, %v7624_v43  ;;  %v1090_v29 = vcombine.low %v1066_v19, %v1082_v20  ;;  %v1091_v30 = vcombine.high %v1066_v19, %v1082_v20 }
 0x306   :  { %v1117_v31 = vrot.slane %v1110_v13, %v7624_v43  ;;  %v1125_v32 = vrot.slane %v6071_v14, %v7624_v43  ;;  %v722_v33 = vrot.slane %v714_v15, %v7626_v50  ;;  %v729_v34 = vrot.slane %v715_v16, %v7626_v50 }
 0x307   :  { %v1462_v23 = vpack.c.bf16 %v1090_v29, %v1090_v29  ;;  %v1463_v36 = vpack.c.bf16 %v1091_v30, %v1091_v30  ;;  %v1059_v37 = vcombine.high %v1033_v48, %v1041_v49  ;;  %v1075_v38 = vcombine.high %v1049_v51, %v1057_v52 }
 0x308   :  { %v802_v39 = vcombine.low %v706_v21, %v713_v22  ;;  %v6066_v40 = vcombine.high %v706_v21, %v713_v22  ;;  %v798_v42 = vcombine.low %v774_v24, %v790_v26  ;;  %v799_v44 = vcombine.high %v774_v24, %v790_v26 }
 0x309   :  { %v1475_v45 = vsel %vm1470_vm2, %v1462_v23, 0  ;;  %v1521_v46 = vsel %vm1470_vm2, %v1463_v36, 0  ;;  %v1073_v47 = vrot.slane %v1059_v37, %v7626_v50  ;;  %v1089_v53 = vrot.slane %v1075_v38, %v7626_v50 }
 0x30a   :  { %v818_v54 = vcombine.low %v722_v33, %v729_v34  ;;  %v6067_v55 = vcombine.high %v722_v33, %v729_v34  ;;  %6309 = vmatpush3.bf16.xpose.msra.mxu1 %v1475_v45  ;;  %6315 = vmatpush3.bf16.xpose.msra.mxu0 %v1521_v46  ;;  %v1126_v56 = vcombine.low %v7691_v27, %v1109_v28  ;;  %v6179_v46 = vld [vmem:[#allocation2] sm:$0xff]  }
 0x30b   :  { %6320 = vmatprep.subr.bf16.mxu1 %v7263_v0  ;;  %6326 = vmatprep.subr.bf16.mxu0 %v7263_v0  ;;  %v1092_v48 = vcombine.low %v1073_v47, %v1089_v53  ;;  %v1093_v49 = vcombine.high %v1073_v47, %v1089_v53  ;;  %v1142_v51 = vcombine.low %v1117_v31, %v1125_v32  ;;  %v6180_v47 = vunpack.c.l.bf16 %v6179_v46 }
 0x30c   :  { %v1134_v58 = vrot.slane %v1126_v56, %v7626_v50  ;;  %v809_v60 = vrot.slane %v802_v39, %v7624_v43  ;;  %v817_v61 = vrot.slane %v6066_v40, %v7624_v43  ;;  %v1454_v62 = vpack.c.bf16 %v798_v42, %v798_v42 }
 0x30d   :  { %v1464_v52 = vpack.c.bf16 %v1092_v48, %v1092_v48  ;;  %v1465_v57 = vpack.c.bf16 %v1093_v49, %v1093_v49  ;;  %v1150_v59 = vrot.slane %v1142_v51, %v7626_v50  ;;  %v1455_v63 = vpack.c.bf16 %v799_v44, %v799_v44 }
 0x30e   :  { %v825_v1 = vrot.slane %v818_v54, %v7624_v43  ;;  %v833_v2 = vrot.slane %v6067_v55, %v7624_v43  ;;  %v781_v3 = vrot.slane %v767_v17, %v7626_v50  ;;  %v797_v4 = vrot.slane %v783_v18, %v7626_v50 }
 0x30f   :  { %v1127_v5 = vcombine.high %v7691_v27, %v1109_v28  ;;  %v1143_v25 = vcombine.high %v1117_v31, %v1125_v32  ;;  %v1567_v6 = vsel %vm1470_vm2, %v1464_v52, 0  ;;  %v1613_v7 = vsel %vm1470_vm2, %v1465_v57, 0 }
 0x310   :  { %v1158_v8 = vcombine.low %v1134_v58, %v1150_v59  ;;  %v1159_v9 = vcombine.high %v1134_v58, %v1150_v59  ;;  %v834_v10 = vcombine.low %v809_v60, %v817_v61  ;;  %v850_v11 = vcombine.low %v825_v1, %v833_v2 }
 0x311   :  { %6311 = vmatmul.mubr.msk.bf16.vlgmr.msra.gmra.mrb[4].mxu1 %vm1470_vm2, %v1454_v62  ;;  %6317 = vmatmul.mubr.msk.bf16.vlgmr.msra.gmra.mrb[8].mxu0 %vm1470_vm2, %v1455_v63  ;;  %v800_v12 = vcombine.low %v781_v3, %v797_v4  ;;  %v801_v13 = vcombine.high %v781_v3, %v797_v4  ;;  %v1141_v16 = vrot.slane %v1127_v5, %v7626_v50 }
 0x312   :  { %6321 = vmatpush3.bf16.xpose.msra.mxu1 %v1567_v6  ;;  %6327 = vmatpush3.bf16.xpose.msra.mxu0 %v1613_v7  ;;  %v1466_v14 = vpack.c.bf16 %v1158_v8, %v1158_v8  ;;  %v1467_v15 = vpack.c.bf16 %v1159_v9, %v1159_v9  ;;  %v1157_v17 = vrot.slane %v1143_v25, %v7626_v50  ;;  %v6181_v8 = vunpack.c.h.bf16 %v6179_v46 }
 0x313   :  { %6322 = vmatprep.mubr.msk.bf16.mxu1 %vm7264_vm0, %v7263_v0  ;;  %6328 = vmatprep.mubr.msk.bf16.mxu0 %vm7264_vm0, %v7263_v0  ;;  %v1456_v18 = vpack.c.bf16 %v800_v12, %v800_v12  ;;  %v1457_v19 = vpack.c.bf16 %v801_v13, %v801_v13  ;;  %v842_v20 = vrot.slane %v834_v10, %v7626_v50 }
 0x314   :  { %6332 = vmatprep.subr.bf16.mxu1 %v7263_v0  ;;  %6338 = vmatprep.subr.bf16.mxu0 %v7263_v0  ;;  %v858_v21 = vrot.slane %v850_v11, %v7626_v50  ;;  %v1659_v22 = vsel %vm1470_vm2, %v1466_v14, 0  ;;  %v1705_v24 = vsel %vm1470_vm2, %v1467_v15, 0  ;;  %v1160_v26 = vcombine.low %v1141_v16, %v1157_v17 }
 0x315   :  { %v1161_v27 = vcombine.high %v1141_v16, %v1157_v17  ;;  %v835_v28 = vcombine.high %v809_v60, %v817_v61  ;;  %v851_v29 = vcombine.high %v825_v1, %v833_v2 }
 0x316   :  { %v866_v30 = vcombine.low %v842_v20, %v858_v21  ;;  %v867_v31 = vcombine.high %v842_v20, %v858_v21  ;;  %v1468_v32 = vpack.c.bf16 %v1160_v26, %v1160_v26 }
 0x317   :  { %v1469_v33 = vpack.c.bf16 %v1161_v27, %v1161_v27  ;;  %v849_v36 = vrot.slane %v835_v28, %v7626_v50  ;;  %v865_v37 = vrot.slane %v851_v29, %v7626_v50 }
 0x318   :  { %v1458_v34 = vpack.c.bf16 %v866_v30, %v866_v30  ;;  %v1459_v23 = vpack.c.bf16 %v867_v31, %v867_v31  ;;  %v1751_v38 = vsel %vm1470_vm2, %v1468_v32, 0 }
 0x319   :  { %6323 = vmatmul.mubr.msk.bf16.vlgmr.msra.gmra.mrb[8].mxu1 %vm1470_vm2, %v1456_v18  ;;  %6329 = vmatmul.mubr.msk.bf16.vlgmr.msra.gmra.mrb[12].mxu0 %vm1470_vm2, %v1457_v19  ;;  %v1797_v39 = vsel %vm1470_vm2, %v1469_v33, 0  ;;  %v868_v40 = vcombine.low %v849_v36, %v865_v37  ;;  %v869_v42 = vcombine.high %v849_v36, %v865_v37  ;;  %v1165_v36 = vpop.permute.xlu1 %1164 }
 0x31a   :  { %6333 = vmatpush3.bf16.xpose.msra.mxu1 %v1659_v22  ;;  %6339 = vmatpush3.bf16.xpose.msra.mxu0 %v1705_v24 }
 0x31b   :  { %6334 = vmatprep.mubr.msk.bf16.mxu1 %vm7264_vm0, %v7263_v0  ;;  %6340 = vmatprep.mubr.msk.bf16.mxu0 %vm7264_vm0, %v7263_v0  ;;  %v1460_v44 = vpack.c.bf16 %v868_v40, %v868_v40  ;;  %v1461_v45 = vpack.c.bf16 %v869_v42, %v869_v42 }
 0x31c   :  { %6344 = vmatprep.subr.bf16.mxu1 %v7263_v0  ;;  %6350 = vmatprep.subr.bf16.mxu0 %v7263_v0 }
 0x321   :  { %6335 = vmatmul.mubr.msk.bf16.vlgmr.msra.gmra.mrb[12].mxu1 %vm1470_vm2, %v1458_v34  ;;  %6341 = vmatmul.mubr.msk.bf16.vlgmr.msra.gmra.mrb[16].mxu0 %vm1470_vm2, %v1459_v23 }
 0x322   :  { %6345 = vmatpush3.bf16.xpose.msra.mxu1 %v1751_v38  ;;  %6351 = vmatpush3.bf16.xpose.msra.mxu0 %v1797_v39 }
 0x323   :  { %6346 = vmatprep.mubr.msk.bf16.mxu1 %vm7264_vm0, %v7263_v0  ;;  %6352 = vmatprep.mubr.msk.bf16.mxu0 %vm7264_vm0, %v7263_v0 }
 0x324   :  { %6356 = vmatprep.subr.bf16.mxu1 %v7263_v0  ;;  %6362 = vmatprep.subr.bf16.mxu0 %v7263_v0 }
 0x329   :  { %6347 = vmatmul.mubr.msk.bf16.vlgmr.msra.gmra.mrb[16].mxu1 %vm1470_vm2, %v1460_v44  ;;  %6353 = vmatmul.mubr.msk.bf16.vlgmr.msra.gmra.mrb[20].mxu0 %vm1470_vm2, %v1461_v45 }
 0x32a   :  { %6358 = vmatprep.mubr.msk.bf16.mxu1 %vm7264_vm0, %v7263_v0  ;;  %6364 = vmatprep.mubr.msk.bf16.mxu0 %vm7264_vm0, %v7263_v0 }
 0x3e4   :  { %v1511_v53 = vpop.f32.mrb[4].mxu1  ;;  %v1557_v54 = vpop.f32.mrb[8].mxu0 }
 0x3e5   :  { %v1839_v55 = vadd.f32 %v6180_v47, %v1511_v53  ;;  %v1840_v56 = vadd.f32 %v6180_v47, %v1557_v54  ;;  %v6312_v48 = vpop.f32.mrb[5].mxu1  ;;  %v6318_v49 = vpop.f32.mrb[9].mxu0 }
 0x3e6   :  { %v1514_v51 = vpop.f32.mrb[6].mxu1  ;;  %v1560_v52 = vpop.f32.mrb[10].mxu0 }
 0x3e7   :  { %v6313_v57 = vpop.f32.mrb[7].mxu1  ;;  %v6319_v58 = vpop.f32.mrb[11].mxu0  ;;  %v1847_v59 = vsel %vm1470_vm2, %v1839_v55, -inf  ;;  %v1850_v60 = vsel %vm1470_vm2, %v1840_v56, -inf }
 0x3e8   :  { %1848 = vmax.xlane.f32.xlu0 %v1847_v59  ;;  %1851 = vmax.xlane.f32.xlu1 %v1850_v60 }
 0x3ec   :  { %v1603_v61 = vpop.f32.mrb[8].mxu1  ;;  %v1649_v62 = vpop.f32.mrb[12].mxu0 }
 0x3ed   :  { %v1841_v63 = vadd.f32 %v6180_v47, %v1603_v61  ;;  %v6324_v1 = vpop.f32.mrb[9].mxu1  ;;  %v6330_v2 = vpop.f32.mrb[13].mxu0  ;;  %v1842_v5 = vadd.f32 %v6180_v47, %v1649_v62 }
 0x3ee   :  { %v1606_v3 = vpop.f32.mrb[10].mxu1  ;;  %v1652_v4 = vpop.f32.mrb[14].mxu0 }
 0x3ef   :  { %v6325_v25 = vpop.f32.mrb[11].mxu1  ;;  %v6331_v6 = vpop.f32.mrb[15].mxu0  ;;  %v1853_v7 = vsel %vm1470_vm2, %v1841_v63, -inf  ;;  %v1856_v9 = vsel %vm1470_vm2, %v1842_v5, -inf }
 0x3f0   :  { %1854 = vmax.xlane.f32.xlu0 %v1853_v7 }
 0x3f4   :  { %v1695_v10 = vpop.f32.mrb[12].mxu1  ;;  %1857 = vmax.xlane.f32.xlu0 %v1856_v9  ;;  %v1741_v11 = vpop.f32.mrb[16].mxu0 }
 0x3f5   :  { %v1843_v12 = vadd.f32 %v6181_v8, %v1695_v10  ;;  %v7760_v13 = vadd.f32 %v6181_v8, %v1741_v11  ;;  %v6336_v14 = vpop.f32.mrb[13].mxu1  ;;  %v6342_v15 = vpop.f32.mrb[17].mxu0 }
 0x3f6   :  { %v1698_v16 = vpop.f32.mrb[14].mxu1  ;;  %v1744_v17 = vpop.f32.mrb[18].mxu0 }
 0x3f7   :  { %v6337_v18 = vpop.f32.mrb[15].mxu1  ;;  %v6343_v19 = vpop.f32.mrb[19].mxu0  ;;  %v1859_v20 = vsel %vm1470_vm2, %v1843_v12, -inf  ;;  %v1862_v21 = vsel %vm1470_vm2, %v7760_v13, -inf }
 0x3f8   :  { %1860 = vmax.xlane.f32.xlu1 %v1859_v20  ;;  %1863 = vmax.xlane.f32.xlu0 %v1862_v21 }
 0x3fc   :  { %v1787_v22 = vpop.f32.mrb[16].mxu1  ;;  %v1833_v24 = vpop.f32.mrb[20].mxu0 }
 0x3fd   :  { %v7765_v26 = vadd.f32 %v6181_v8, %v1787_v22  ;;  %v7767_v27 = vadd.f32 %v6181_v8, %v1833_v24  ;;  %v6348_v28 = vpop.f32.mrb[17].mxu1  ;;  %v6354_v29 = vpop.f32.mrb[21].mxu0 }
 0x3fe   :  { %v1790_v30 = vpop.f32.mrb[18].mxu1  ;;  %v1836_v31 = vpop.f32.mrb[22].mxu0 }
 0x3ff   :  { %v6349_v32 = vpop.f32.mrb[19].mxu1  ;;  %v6355_v33 = vpop.f32.mrb[23].mxu0  ;;  %v1865_v34 = vsel %vm1470_vm2, %v7765_v26, -inf  ;;  %v1868_v23 = vsel %vm1470_vm2, %v7767_v27, -inf }
 0x400   :  { %1866 = vmax.xlane.f32.xlu1 %v1865_v34  ;;  %1869 = vmax.xlane.f32.xlu0 %v1868_v23 }
 0x411   :  { %1176 = vrot.lane.b32.xlu1 %v7618_v35, %s7265_s17 }
 0x416   :  { %1170 = vrot.lane.b32.xlu0 %v7618_v35, %s7267_s6 }
 0x475   :  { %v1849_v37 = vpop.xlane.xlu0 %1848  ;;  %v1852_v38 = vpop.xlane.xlu1 %1851 }
 0x476   :  { %v1871_v39 = vsub.f32 %v1839_v55, %v1849_v37  ;;  %v1872_v40 = vsub.f32 %v1840_v56, %v1852_v38 }
 0x478   :  { %v1879_v42 = vmul.f32 1.442695, %v1871_v39  ;;  %v1881_v44 = vmul.f32 1.442695, %v1872_v40 }
 0x47a   :  { %6682 = vpow2.f32 %v1879_v42 }
 0x47b   :  { %6684 = vpow2.f32 %v1881_v44 }
 0x47d   :  { %v1855_v45 = vpop.xlane.xlu0 %1854 }
 0x47e   :  { %v1873_v46 = vsub.f32 %v1841_v63, %v1855_v45 }
 0x480   :  { %v1883_v47 = vmul.f32 1.442695, %v1873_v46 }
 0x481   :  { %v1858_v53 = vpop.xlane.xlu0 %1857 }
 0x482   :  { %6686 = vpow2.f32 %v1883_v47  ;;  %v1874_v54 = vsub.f32 %v1842_v5, %v1858_v53 }
 0x484   :  { %v7777_v48 = vpop.eup %6682  ;;  %v1885_v49 = vmul.f32 1.442695, %v1874_v54 }
 0x485   :  { %v7779_v51 = vpop.eup %6684  ;;  %v1861_v52 = vpop.xlane.xlu1 %1860  ;;  %v1895_v55 = vsel %vm1470_vm2, %v7777_v48, 0.0 }
 0x486   :  { %6688 = vpow2.f32 %v1885_v49  ;;  %v1875_v56 = vsub.f32 %v1843_v12, %v1861_v52  ;;  %1896 = vadd.xlane.f32.xlu1 %v1895_v55  ;;  %v1898_v57 = vsel %vm1470_vm2, %v7779_v51, 0.0  ;;  %v7785_v59 = vpop.xlane.xlu0 %1863 }
 0x487   :  { %1899 = vadd.xlane.f32.xlu0 %v1898_v57  ;;  %v1876_v55 = vsub.f32 %v7760_v13, %v7785_v59 }
 0x488   :  { %v1887_v58 = vmul.f32 1.442695, %v1875_v56 }
 0x489   :  { %v1889_v56 = vmul.f32 1.442695, %v1876_v55 }
 0x48a   :  { %6690 = vpow2.f32 %v1887_v58 }
 0x48b   :  { %6692 = vpow2.f32 %v1889_v56 }
 0x48c   :  { %v7787_v60 = vpop.eup %6686 }
 0x48d   :  { %v7789_v61 = vpop.xlane.xlu1 %1866  ;;  %v7791_v62 = vpop.xlane.xlu0 %1869  ;;  %v1901_v63 = vsel %vm1470_vm2, %v7787_v60, 0.0 }
 0x48e   :  { %1902 = vadd.xlane.f32.xlu1 %v1901_v63  ;;  %v1877_v57 = vsub.f32 %v7765_v26, %v7789_v61  ;;  %v1878_v13 = vsub.f32 %v7767_v27, %v7791_v62 }
 0x490   :  { %v7795_v1 = vpop.eup %6688  ;;  %v1891_v58 = vmul.f32 1.442695, %v1877_v57  ;;  %v1893_v26 = vmul.f32 1.442695, %v1878_v13 }
 0x491   :  { %v1177_v2 = vpop.permute.xlu1 %1176  ;;  %v1171_v3 = vpop.permute.xlu0 %1170  ;;  %v1904_v4 = vsel %vm1470_vm2, %v7795_v1, 0.0 }
 0x492   :  { %v1198_v5 = vcombine.low %v1165_v36, %v1177_v2  ;;  %v1199_v25 = vcombine.high %v1165_v36, %v1177_v2  ;;  %v1182_v6 = vcombine.low %v7618_v35, %v1171_v3  ;;  %1905 = vadd.xlane.f32.xlu0 %v1904_v4  ;;  %v1183_v7 = vcombine.high %v7618_v35, %v1171_v3 }
 0x493   :  { %6694 = vpow2.f32 %v1891_v58 }
 0x494   :  { %v7801_v8 = vpop.eup %6690  ;;  %v1206_v9 = vrot.slane %v1198_v5, %v7624_v43  ;;  %v1213_v10 = vrot.slane %v1199_v25, %v7624_v43  ;;  %v1190_v11 = vrot.slane %v1182_v6, %v7624_v43  ;;  %v1197_v12 = vrot.slane %v1183_v7, %v7624_v43 }
 0x495   :  { %v1907_v14 = vsel %vm1470_vm2, %v7801_v8, 0.0  ;;  %v7833_v63 = vpop.eup %6692  ;;  %6696 = vpow2.f32 %v1893_v26 }
 0x496   :  { %v1214_v15 = vcombine.low %v1190_v11, %v1206_v9  ;;  %v1215_v16 = vcombine.high %v1190_v11, %v1206_v9  ;;  %1908 = vadd.xlane.f32.xlu0 %v1907_v14  ;;  %v1230_v17 = vcombine.low %v1197_v12, %v1213_v10  ;;  %v1231_v18 = vcombine.high %v1197_v12, %v1213_v10 }
 0x497   :  { %v1910_v2 = vsel %vm1470_vm2, %v7833_v63, 0.0 }
 0x498   :  { %v1222_v35 = vrot.slane %v1214_v15, %v7626_v50  ;;  %v1229_v19 = vrot.slane %v1215_v16, %v7626_v50  ;;  %v1238_v20 = vrot.slane %v1230_v17, %v7626_v50  ;;  %v1245_v21 = vrot.slane %v1231_v18, %v7626_v50 }
 0x49a   :  { %v1318_v22 = vcombine.low %v1222_v35, %v1229_v19  ;;  %v6072_v24 = vcombine.high %v1222_v35, %v1229_v19  ;;  %v1334_v28 = vcombine.low %v1238_v20, %v1245_v21  ;;  %v6073_v29 = vcombine.high %v1238_v20, %v1245_v21 }
 0x49c   :  { %v1325_v30 = vrot.slane %v1318_v22, %v7624_v43  ;;  %v1333_v31 = vrot.slane %v6072_v24, %v7624_v43  ;;  %v1341_v32 = vrot.slane %v1334_v28, %v7624_v43  ;;  %v1349_v33 = vrot.slane %v6073_v29, %v7624_v43 }
 0x49d   :  { %v7837_v3 = vpop.eup %6694 }
 0x49e   :  { %v1350_v34 = vcombine.low %v1325_v30, %v1333_v31  ;;  %v1351_v23 = vcombine.high %v1325_v30, %v1333_v31  ;;  %v1366_v36 = vcombine.low %v1341_v32, %v1349_v33  ;;  %v1367_v37 = vcombine.high %v1341_v32, %v1349_v33 }
 0x49f   :  { %1172 = vrot.lane.b32.xlu1 %v7622_v41, %s7267_s6  ;;  %v1913_v4 = vsel %vm1470_vm2, %v7837_v3, 0.0  ;;  %v7845_v59 = vpop.eup %6696 }
 0x4a0   :  { %v1358_v38 = vrot.slane %v1350_v34, %v7626_v50  ;;  %v1365_v39 = vrot.slane %v1351_v23, %v7626_v50  ;;  %v1374_v40 = vrot.slane %v1366_v36, %v7626_v50  ;;  %v1381_v42 = vrot.slane %v1367_v37, %v7626_v50 }
 0x4a1   :  { %v1916_v61 = vsel %vm1470_vm2, %v7845_v59, 0.0 }
 0x4a2   :  { %v1382_v44 = vcombine.low %v1358_v38, %v1374_v40  ;;  %v1383_v45 = vcombine.high %v1358_v38, %v1374_v40  ;;  %v1384_v46 = vcombine.low %v1365_v39, %v1381_v42  ;;  %v1385_v47 = vcombine.high %v1365_v39, %v1381_v42 }
 0x4a4   :  { %v1943_v53 = vpack.c.bf16 %v1382_v44, %v1382_v44  ;;  %v1944_v54 = vpack.c.bf16 %v1383_v45, %v1383_v45  ;;  %v1945_v27 = vpack.c.bf16 %v1384_v46, %v1384_v46  ;;  %v1946_v12 = vpack.c.bf16 %v1385_v47, %v1385_v47 }
 0x4a6   :  { %v1956_v49 = vsel %vm1954_vm3, %v1943_v53, 0  ;;  %v2002_v52 = vsel %vm1954_vm3, %v1944_v54, 0  ;;  %v2048_v16 = vsel %vm1954_vm3, %v1945_v27, 0  ;;  %v2094_v17 = vsel %vm1954_vm3, %v1946_v12, 0 }
 0x4a7   :  { %6357 = vmatpush3.bf16.msra.mxu1 %v1956_v49  ;;  %6363 = vmatpush3.bf16.msra.mxu0 %v2002_v52 }
 0x4a8   :  { %6368 = vmatprep.subr.bf16.mxu1 %v7263_v0  ;;  %6374 = vmatprep.subr.bf16.mxu0 %v7263_v0 }
 0x4ac   :  { %1166 = vrot.lane.b32.xlu0 %v7622_v41, %s7266_s15 }
 0x4c3   :  { %1911 = vadd.xlane.f32.xlu1 %v1910_v2 }
 0x4cb   :  { %1914 = vadd.xlane.f32.xlu0 %v1913_v4 }
 0x4d4   :  { %1178 = vrot.lane.b32.xlu1 %v7622_v41, %s7265_s17 }
 0x4f8   :  { %1917 = vadd.xlane.f32.xlu1 %v1916_v61 }
 0x513   :  { %v1897_v5 = vpop.xlane.xlu1 %1896 }
 0x514   :  { %6698 = vrcp.f32 %v1897_v5  ;;  %v1900_v25 = vpop.xlane.xlu0 %1899 }
 0x515   :  { %6700 = vrcp.f32 %v1900_v25 }
 0x51b   :  { %v1903_v6 = vpop.xlane.xlu1 %1902 }
 0x51c   :  { %6702 = vrcp.f32 %v1903_v6 }
 0x51e   :  { %v6699_v7 = vpop.eup %6698 }
 0x51f   :  { %v6701_v9 = vpop.eup %6700  ;;  %v1927_v10 = vmul.f32 %v6699_v7, %v7777_v48  ;;  %v1906_v11 = vpop.xlane.xlu0 %1905 }
 0x520   :  { %v1928_v62 = vmul.f32 %v6701_v9, %v7779_v51  ;;  %6704 = vrcp.f32 %v1906_v11  ;;  %v1173_v21 = vpop.permute.xlu1 %1172 }
 0x521   :  { %v1935_v14 = vpack.c.bf16 %v1927_v10, %v1927_v10  ;;  %v1250_v24 = vcombine.low %v7622_v41, %v1173_v21  ;;  %v1251_v28 = vcombine.high %v7622_v41, %v1173_v21 }
 0x522   :  { %v1936_v15 = vpack.c.bf16 %v1928_v62, %v1928_v62 }
 0x523   :  { %6359 = vmatmul.mubr.msk.bf16.vlgmr.msra.gmra.mrb[20].mxu1 %vm1470_vm2, %v1935_v14  ;;  %v1909_v22 = vpop.xlane.xlu0 %1908  ;;  %v1258_v32 = vrot.slane %v1250_v24, %v7624_v43  ;;  %v1265_v33 = vrot.slane %v1251_v28, %v7624_v43 }
 0x524   :  { %6365 = vmatmul.mubr.msk.bf16.vlgmr.msra.gmra.mrb[24].mxu0 %vm1470_vm2, %v1936_v15  ;;  %6369 = vmatpush3.bf16.msra.mxu1 %v2048_v16  ;;  %6706 = vrcp.f32 %v1909_v22 }
 0x525   :  { %6375 = vmatpush3.bf16.msra.mxu0 %v2094_v17  ;;  %6370 = vmatprep.mubr.msk.bf16.mxu1 %vm7264_vm0, %v7263_v0 }
 0x526   :  { %v6703_v48 = vpop.eup %6702  ;;  %6376 = vmatprep.mubr.msk.bf16.mxu0 %vm7264_vm0, %v7263_v0  ;;  %6380 = vmatprep.subr.bf16.mxu1 %v7263_v0 }
 0x527   :  { %v1929_v51 = vmul.f32 %v6703_v48, %v7787_v60  ;;  %6386 = vmatprep.subr.bf16.mxu0 %v7263_v0  ;;  %v1167_v29 = vpop.permute.xlu0 %1166 }
 0x529   :  { %v1937_v18 = vpack.c.bf16 %v1929_v51, %v1929_v51 }
 0x52a   :  { %v6705_v35 = vpop.eup %6704 }
 0x52b   :  { %v1930_v19 = vmul.f32 %v6705_v35, %v7795_v1  ;;  %6371 = vmatmul.mubr.msk.bf16.vlgmr.msra.gmra.mrb[24].mxu1 %vm1470_vm2, %v1937_v18 }
 0x52c   :  { %6382 = vmatprep.mubr.msk.bf16.mxu1 %vm7264_vm0, %v7263_v0 }
 0x52d   :  { %v1938_v20 = vpack.c.bf16 %v1930_v19, %v1930_v19 }
 0x52e   :  { %v6707_v13 = vpop.eup %6706 }
 0x52f   :  { %6377 = vmatmul.mubr.msk.bf16.vlgmr.msra.gmra.mrb[28].mxu0 %vm1470_vm2, %v1938_v20  ;;  %v1931_v27 = vmul.f32 %v6707_v13, %v7801_v8 }
 0x530   :  { %6388 = vmatprep.mubr.msk.bf16.mxu0 %vm7264_vm0, %v7263_v0 }
 0x531   :  { %v1939_v51 = vpack.c.bf16 %v1931_v27, %v1931_v27 }
 0x550   :  { %v1912_v60 = vpop.xlane.xlu1 %1911 }
 0x551   :  { %6708 = vrcp.f32 %v1912_v60 }
 0x554   :  { %v1179_v1 = vpop.permute.xlu1 %1178 }
 0x555   :  { %v1266_v30 = vcombine.low %v1167_v29, %v1179_v1  ;;  %v1267_v31 = vcombine.high %v1167_v29, %v1179_v1 }
 0x557   :  { %v1274_v34 = vrot.slane %v1266_v30, %v7624_v43  ;;  %v1281_v23 = vrot.slane %v1267_v31, %v7624_v43 }
 0x558   :  { %v1915_v56 = vpop.xlane.xlu0 %1914 }
 0x559   :  { %v1282_v36 = vcombine.low %v1258_v32, %v1274_v34  ;;  %v1283_v37 = vcombine.high %v1258_v32, %v1274_v34  ;;  %v1298_v38 = vcombine.low %v1265_v33, %v1281_v23  ;;  %v1299_v39 = vcombine.high %v1265_v33, %v1281_v23 }
 0x55a   :  { %6710 = vrcp.f32 %v1915_v56 }
 0x55b   :  { %v1290_v41 = vrot.slane %v1282_v36, %v7626_v50  ;;  %v1297_v40 = vrot.slane %v1283_v37, %v7626_v50  ;;  %v1306_v42 = vrot.slane %v1298_v38, %v7626_v50  ;;  %v1313_v44 = vrot.slane %v1299_v39, %v7626_v50  ;;  %v6709_v6 = vpop.eup %6708 }
 0x55c   :  { %v1932_v62 = vmul.f32 %v6709_v6, %v7833_v63 }
 0x55d   :  { %v1386_v45 = vcombine.low %v1290_v41, %v1297_v40  ;;  %v6074_v46 = vcombine.high %v1290_v41, %v1297_v40  ;;  %v1402_v47 = vcombine.low %v1306_v42, %v1313_v44  ;;  %v6075_v53 = vcombine.high %v1306_v42, %v1313_v44 }
 0x55e   :  { %v1940_v18 = vpack.c.bf16 %v1932_v62, %v1932_v62 }
 0x55f   :  { %v1393_v54 = vrot.slane %v1386_v45, %v7624_v43  ;;  %v1401_v49 = vrot.slane %v6074_v46, %v7624_v43  ;;  %v1409_v52 = vrot.slane %v1402_v47, %v7624_v43  ;;  %v1417_v55 = vrot.slane %v6075_v53, %v7624_v43 }
 0x561   :  { %v1418_v57 = vcombine.low %v1393_v54, %v1401_v49  ;;  %v1434_v58 = vcombine.low %v1409_v52, %v1417_v55  ;;  %v1419_v2 = vcombine.high %v1393_v54, %v1401_v49  ;;  %v1435_v4 = vcombine.high %v1409_v52, %v1417_v55 }
 0x563   :  { %v1426_v26 = vrot.slane %v1418_v57, %v7626_v50  ;;  %v1442_v61 = vrot.slane %v1434_v58, %v7626_v50  ;;  %v1433_v5 = vrot.slane %v1419_v2, %v7626_v50  ;;  %v1449_v25 = vrot.slane %v1435_v4, %v7626_v50 }
 0x564   :  { %v6711_v35 = vpop.eup %6710 }
 0x565   :  { %v1450_v7 = vcombine.low %v1426_v26, %v1442_v61  ;;  %v1451_v9 = vcombine.high %v1426_v26, %v1442_v61  ;;  %v1452_v10 = vcombine.low %v1433_v5, %v1449_v25  ;;  %v1453_v11 = vcombine.high %v1433_v5, %v1449_v25 }
 0x566   :  { %v1933_v19 = vmul.f32 %v6711_v35, %v7837_v3 }
 0x567   :  { %v1947_v12 = vpack.c.bf16 %v1450_v7, %v1450_v7  ;;  %v1948_v14 = vpack.c.bf16 %v1451_v9, %v1451_v9  ;;  %v1949_v17 = vpack.c.bf16 %v1452_v10, %v1452_v10  ;;  %v1950_v48 = vpack.c.bf16 %v1453_v11, %v1453_v11 }
 0x568   :  { %v1941_v20 = vpack.c.bf16 %v1933_v19, %v1933_v19 }
 0x569   :  { %v2140_v15 = vsel %vm1954_vm3, %v1947_v12, 0  ;;  %v2186_v16 = vsel %vm1954_vm3, %v1948_v14, 0  ;;  %v2232_v8 = vsel %vm1954_vm3, %v1949_v17, 0  ;;  %v2278_v63 = vsel %vm1954_vm3, %v1950_v48, 0 }
 0x56a   :  { %6381 = vmatpush3.bf16.msra.mxu1 %v2140_v15  ;;  %6387 = vmatpush3.bf16.msra.mxu0 %v2186_v16 }
 0x56b   :  { %6392 = vmatprep.subr.bf16.mxu1 %v7263_v0  ;;  %6398 = vmatprep.subr.bf16.mxu0 %v7263_v0 }
 0x56d   :  { %6383 = vmatmul.mubr.msk.bf16.vlgmr.msra.gmra.mrb[28].mxu1 %vm1470_vm2, %v1939_v51  ;;  %6389 = vmatmul.mubr.msk.bf16.vlgmr.msra.gmra.mrb[32].mxu0 %vm1470_vm2, %v1940_v18 }
 0x56e   :  { %6393 = vmatpush3.bf16.msra.mxu1 %v2232_v8  ;;  %6399 = vmatpush3.bf16.msra.mxu0 %v2278_v63 }
 0x56f   :  { %6394 = vmatprep.mubr.msk.bf16.mxu1 %vm7264_vm0, %v7263_v0  ;;  %6400 = vmatprep.mubr.msk.bf16.mxu0 %vm7264_vm0, %v7263_v0 }
 0x570   :  { %6404 = vmatprep.subr.bf16.mxu1 %v7263_v0  ;;  %6412 = vmatprep.subr.bf16.mxu0 %v7263_v0 }
 0x575   :  { %6395 = vmatmul.mubr.msk.bf16.vlgmr.msra.gmra.mrb[32].mxu1 %vm1470_vm2, %v1941_v20 }
 0x576   :  { %6408 = vmatprep.mubr.msk.bf16.mxu1 %vm7264_vm0, %v7263_v0 }
 0x585   :  { %v1918_v21 = vpop.xlane.xlu1 %1917 }
 0x586   :  { %6712 = vrcp.f32 %v1918_v21 }
 0x590   :  { %v6713_v22 = vpop.eup %6712 }
 0x591   :  { %v1934_v3 = vmul.f32 %v6713_v22, %v7845_v59 }
 0x593   :  { %v1942_v60 = vpack.c.bf16 %v1934_v3, %v1934_v3 }
 0x595   :  { %6401 = vmatmul.mubr.msk.bf16.vlgmr.msra.gmra.mrb[36].mxu0 %vm1470_vm2, %v1942_v60 }
 0x596   :  { %6416 = vmatprep.mubr.msk.bf16.mxu0 %vm7264_vm0, %v7263_v0 }
 0x5f6   :  { %v1992_v24 = vpop.f32.mrb[20].mxu1 }
 0x5f7   :  { %v2038_v28 = vpop.f32.mrb[24].mxu0  ;;  %v6360_v29 = vpop.f32.mrb[21].mxu1 }
 0x5f8   :  { %v6366_v1 = vpop.f32.mrb[25].mxu0  ;;  %v1995_v30 = vpop.f32.mrb[22].mxu1 }
 0x5f9   :  { %v2041_v31 = vpop.f32.mrb[26].mxu0  ;;  %v6361_v32 = vpop.f32.mrb[23].mxu1 }
 0x5fa   :  { %v6367_v33 = vpop.f32.mrb[27].mxu0 }
 0x5fe   :  { %v2084_v34 = vpop.f32.mrb[24].mxu1 }
 0x5ff   :  { %v2320_v23 = vcombine.low %v1992_v24, %v2084_v34  ;;  %v2321_v36 = vcombine.high %v1992_v24, %v2084_v34  ;;  %v6372_v37 = vpop.f32.mrb[25].mxu1 }
 0x600   :  { %v2087_v38 = vpop.f32.mrb[26].mxu1 }
 0x601   :  { %v6373_v59 = vpop.f32.mrb[27].mxu1  ;;  %v2328_v45 = vrot.slane %v2320_v23, %v7624_v43  ;;  %v2335_v46 = vrot.slane %v2321_v36, %v7624_v43 }
 0x602   :  { %v2130_v39 = vpop.f32.mrb[28].mxu0 }
 0x603   :  { %v2336_v41 = vcombine.low %v2038_v28, %v2130_v39  ;;  %v2337_v40 = vcombine.high %v2038_v28, %v2130_v39  ;;  %v6378_v42 = vpop.f32.mrb[29].mxu0 }
 0x604   :  { %v2133_v44 = vpop.f32.mrb[30].mxu0 }
 0x605   :  { %v2344_v47 = vrot.slane %v2336_v41, %v7624_v43  ;;  %v2351_v53 = vrot.slane %v2337_v40, %v7624_v43  ;;  %v6379_v54 = vpop.f32.mrb[31].mxu0 }
 0x607   :  { %v2352_v49 = vcombine.low %v2328_v45, %v2344_v47  ;;  %v2353_v52 = vcombine.high %v2328_v45, %v2344_v47  ;;  %v2368_v55 = vcombine.low %v2335_v46, %v2351_v53  ;;  %v2369_v56 = vcombine.high %v2335_v46, %v2351_v53 }
 0x609   :  { %v2360_v57 = vrot.slane %v2352_v49, %v7626_v50  ;;  %v2367_v58 = vrot.slane %v2353_v52, %v7626_v50  ;;  %v2376_v2 = vrot.slane %v2368_v55, %v7626_v50  ;;  %v2383_v4 = vrot.slane %v2369_v56, %v7626_v50  ;;  %v6666_v56 = vld [vmem:[#allocation13] sm:$0xff]  }
 0x60a   :  { %6405 = vmatpush3.bf16.msra.mxu1 %v6666_v56 }
 0x60b   :  { %v2456_v13 = vcombine.low %v2360_v57, %v2367_v58  ;;  %v6092_v26 = vcombine.high %v2360_v57, %v2367_v58  ;;  %v2472_v61 = vcombine.low %v2376_v2, %v2383_v4  ;;  %v6093_v5 = vcombine.high %v2376_v2, %v2383_v4  ;;  %6406 = vmatprep.subr.bf16.mxu1 %v7263_v0 }
 0x60d   :  { %v2463_v25 = vrot.slane %v2456_v13, %v7624_v43  ;;  %v2471_v6 = vrot.slane %v6092_v26, %v7624_v43  ;;  %v2479_v7 = vrot.slane %v2472_v61, %v7624_v43  ;;  %v2487_v9 = vrot.slane %v6093_v5, %v7624_v43 }
 0x60f   :  { %v2489_v10 = vcombine.high %v2463_v25, %v2471_v6  ;;  %v2505_v11 = vcombine.high %v2479_v7, %v2487_v9  ;;  %v2488_v27 = vcombine.low %v2463_v25, %v2471_v6  ;;  %v2504_v62 = vcombine.low %v2479_v7, %v2487_v9 }
 0x611   :  { %v7924_v12 = vrot.slane %v2489_v10, %v7626_v50  ;;  %v7927_v14 = vrot.slane %v2505_v11, %v7626_v50  ;;  %v7930_v15 = vrot.slane %v2488_v27, %v7626_v50  ;;  %v7933_v16 = vrot.slane %v2504_v62, %v7626_v50  ;;  %v6667_v10 = vld [vmem:[#allocation13 + $0x8] sm:$0xff]  }
 0x612   :  { %6407 = vmatpush3.bf16.msra.mxu1 %v6667_v10 }
 0x613   :  { %v2522_v17 = vcombine.low %v7924_v12, %v7927_v14  ;;  %v2520_v48 = vcombine.low %v7930_v15, %v7933_v16  ;;  %v2521_v51 = vcombine.high %v7930_v15, %v7933_v16  ;;  %v2523_v18 = vcombine.high %v7924_v12, %v7927_v14  ;;  %v6096_v16 = vld [vmem:[#allocation14] ss:$0 sm:$0xff] }
 0x640   :  { %v2176_v35 = vpop.f32.mrb[28].mxu1  ;;  %v2222_v8 = vpop.f32.mrb[32].mxu0 }
 0x641   :  { %v6384_v63 = vpop.f32.mrb[29].mxu1  ;;  %v6390_v19 = vpop.f32.mrb[33].mxu0 }
 0x642   :  { %v2179_v20 = vpop.f32.mrb[30].mxu1  ;;  %v2225_v21 = vpop.f32.mrb[34].mxu0 }
 0x643   :  { %v6385_v22 = vpop.f32.mrb[31].mxu1  ;;  %v6391_v3 = vpop.f32.mrb[35].mxu0 }
 0x648   :  { %v2268_v60 = vpop.f32.mrb[32].mxu1 }
 0x649   :  { %v2388_v24 = vcombine.low %v2176_v35, %v2268_v60  ;;  %v2389_v28 = vcombine.high %v2176_v35, %v2268_v60  ;;  %v6396_v29 = vpop.f32.mrb[33].mxu1 }
 0x64a   :  { %v2271_v1 = vpop.f32.mrb[34].mxu1 }
 0x64b   :  { %v6397_v30 = vpop.f32.mrb[35].mxu1  ;;  %v2396_v36 = vrot.slane %v2388_v24, %v7624_v43  ;;  %v2403_v37 = vrot.slane %v2389_v28, %v7624_v43 }
 0x668   :  { %v2314_v31 = vpop.f32.mrb[36].mxu0 }
 0x669   :  { %v2404_v32 = vcombine.low %v2222_v8, %v2314_v31  ;;  %v2405_v33 = vcombine.high %v2222_v8, %v2314_v31  ;;  %v6402_v34 = vpop.f32.mrb[37].mxu0 }
 0x66a   :  { %v2317_v23 = vpop.f32.mrb[38].mxu0 }
 0x66b   :  { %v2412_v38 = vrot.slane %v2404_v32, %v7624_v43  ;;  %v2419_v59 = vrot.slane %v2405_v33, %v7624_v43  ;;  %v6403_v39 = vpop.f32.mrb[39].mxu0 }
 0x66d   :  { %v2420_v41 = vcombine.low %v2396_v36, %v2412_v38  ;;  %v2421_v40 = vcombine.high %v2396_v36, %v2412_v38  ;;  %v2436_v42 = vcombine.low %v2403_v37, %v2419_v59  ;;  %v2437_v44 = vcombine.high %v2403_v37, %v2419_v59  ;;  %v6766_v36 = vld [vmem:[%s8589_s2] sm:$0xff]  ;;  %v6767_v59 = vld [vmem:[%s8589_s2 + $0x8] sm:$0xff] }
 0x66f   :  { %v2428_v45 = vrot.slane %v2420_v41, %v7626_v50  ;;  %v2435_v46 = vrot.slane %v2421_v40, %v7626_v50  ;;  %v2444_v47 = vrot.slane %v2436_v42, %v7626_v50  ;;  %v2451_v53 = vrot.slane %v2437_v44, %v7626_v50 }
 0x671   :  { %v2524_v54 = vcombine.low %v2428_v45, %v2435_v46  ;;  %v6094_v49 = vcombine.high %v2428_v45, %v2435_v46  ;;  %v2540_v52 = vcombine.low %v2444_v47, %v2451_v53  ;;  %v6095_v55 = vcombine.high %v2444_v47, %v2451_v53 }
 0x673   :  { %v2531_v57 = vrot.slane %v2524_v54, %v7624_v43  ;;  %v2539_v58 = vrot.slane %v6094_v49, %v7624_v43  ;;  %v2547_v2 = vrot.slane %v2540_v52, %v7624_v43  ;;  %v2555_v4 = vrot.slane %v6095_v55, %v7624_v43 }
 0x675   :  { %v2557_v13 = vcombine.high %v2531_v57, %v2539_v58  ;;  %v2573_v26 = vcombine.high %v2547_v2, %v2555_v4  ;;  %v2556_v61 = vcombine.low %v2531_v57, %v2539_v58  ;;  %v2572_v5 = vcombine.low %v2547_v2, %v2555_v4 }
 0x677   :  { %v2571_v25 = vrot.slane %v2557_v13, %v7626_v50  ;;  %v2587_v6 = vrot.slane %v2573_v26, %v7626_v50  ;;  %v2564_v7 = vrot.slane %v2556_v61, %v7626_v50  ;;  %v2580_v9 = vrot.slane %v2572_v5, %v7626_v50  ;;  %v6100_v26 = vld [vmem:[#allocation16] ss:$0 sm:$0xff] }
 0x679   :  { %v2590_v11 = vcombine.low %v2571_v25, %v2587_v6  ;;  %v2589_v27 = vcombine.high %v2564_v7, %v2580_v9  ;;  %v2588_v62 = vcombine.low %v2564_v7, %v2580_v9  ;;  %v2591_v12 = vcombine.high %v2571_v25, %v2587_v6  ;;  %v6101_v25 = vld [vmem:[#allocation17] ss:$0 sm:$0xff] }
 0x67b   :  { %v6633_v14 = vpack.i.bf16 %v2590_v11, %v2522_v17  ;;  %v6628_v35 = vpack.i.bf16 %v2589_v27, %v2521_v51  ;;  %v6638_v8 = vpack.i.bf16 %v2591_v12, %v2523_v18 }
 0x67d   :  { %6634 = vrot.lane.b32.xlu1 %v6633_v14, %s7270_s16  ;;  %6629 = vrot.lane.b32.xlu0 %v6628_v35, %s7271_s9  ;;  %v6668_v35 = vld [vmem:[%s8591_s18] sm:$0xff]  }
 0x67e   :  { %6420 = vmatprep.subr.bf16.mxu1 %v6668_v35 }
 0x681   :  { %6639 = vrot.lane.b32.xlu0 %v6638_v8, %s7272_s30  ;;  %v6669_v8 = vld [vmem:[%s8591_s18 + $0x8] sm:$0xff]  }
 0x6ef   :  { %v6635_v63 = vpop.permute.xlu1 %6634  ;;  %v6630_v19 = vpop.permute.xlu0 %6629 }
 0x6f0   :  { %v6632_v20 = vunpack.i.h.bf16 %v6630_v19  ;;  %v6631_v21 = vunpack.i.l.bf16 %v6630_v19  ;;  %v6637_v22 = vunpack.i.h.bf16 %v6635_v63  ;;  %v6636_v3 = vunpack.i.l.bf16 %v6635_v63  ;;  %v2792_v63 = vld [vmem:[%s8592_s22] sm:$0xff]  ;;  %v2793_v19 = vld [vmem:[%s8592_s22 + $0x8] sm:$0xff] }
 0x6f2   :  { %v2616_v17 = vsel %vm1470_vm2, %v2520_v48, %v6631_v21  ;;  %v2617_v51 = vsel %vm1470_vm2, %v2588_v62, %v6632_v20  ;;  %v2794_v20 = vld [vmem:[%s8592_s22 + $0x10] sm:$0xff]  ;;  %v7986_v21 = vpack.c.bf16 %v2793_v19, %v2792_v63 }
 0x6f3   :  { %v6640_v18 = vpop.permute.xlu0 %6639  ;;  %v2619_v28 = vsel %vm2618_vm4, %v2616_v17, %v6636_v3  ;;  %v2620_v29 = vsel %vm2618_vm4, %v2617_v51, %v6637_v22  ;;  %v2795_v22 = vld [vmem:[%s8592_s22 + $0x18] sm:$0xff]  ;;  %v7273_v3 = vmov 0  }
 0x6f4   :  { %v6642_v60 = vunpack.i.h.bf16 %v6640_v18  ;;  %v6641_v24 = vunpack.i.l.bf16 %v6640_v18  ;;  %6643 = vset.pattern.permute.xlu0 %v7273_v3  ;;  %6644 = vset.pattern.permute.xlu1 %v7273_v3  ;;  %v7989_v17 = vpack.c.bf16 %v2795_v22, %v2794_v20 }
 0x6f6   :  { %v2622_v1 = vsel %vm2621_vm5, %v2619_v28, %v6641_v24  ;;  %v2623_v30 = vsel %vm2621_vm5, %v2620_v29, %v6642_v60 }
 0x6f7   :  { %v2624_v15 = vpack.c.bf16 %v2623_v30, %v2622_v1 }
 0x6f9   :  { %6409 = vmatmul.mubr.msk.bf16.vlgmr.msra.gmra.mrb[36].mxu1 %vm413_vm1, %v2624_v15 }
 0x6fa   :  { %6421 = vmatpush3.bf16.msra.mxu1 %v6668_v35  ;;  %6424 = vmatprep.mubr.msk.bf16.mxu1 %vm413_vm1, %v7986_v21 }
 0x6fb   :  { %6422 = vmatprep.subr.bf16.mxu1 %v6669_v8 }
 0x6fe   :  { %6423 = vmatpush3.bf16.msra.mxu1 %v6669_v8 }
 0x6ff   :  { %6436 = vmatprep.subr.bf16.mxu1 %v7263_v0 }
 0x701   :  { %6425 = vmatmul.mubr.msk.bf16.vlgmr.msra.gmra.mrb[40].mxu1 %vm413_vm1, %v7989_v17 }
 0x702   :  { %6438 = vmatprep.mubr.msk.bf16.mxu1 %vm7264_vm0, %v7263_v0 }
 0x7cc   :  { %v2680_v48 = vpop.f32.mrb[36].mxu1 }
 0x7cd   :  { %v2681_v31 = vadd.f32 %v6096_v16, %v2680_v48  ;;  %v6410_v32 = vpop.f32.mrb[37].mxu1  ;;  %v369_v48 = vld [vmem:[%s8593_s20 + $0x8] sm:$0xff] }
 0x7ce   :  { %v2683_v33 = vpop.f32.mrb[38].mxu1  ;;  %v6670_v32 = vld [vmem:[%s8594_s13] sm:$0xff]  }
 0x7cf   :  { %v2684_v34 = vadd.f32 %v6096_v16, %v2683_v33  ;;  %v6411_v23 = vpop.f32.mrb[39].mxu1  ;;  %v2687_v37 = vadd.f32 %v6766_v36, %v2681_v31  ;;  %v368_v31 = vld [vmem:[%s8593_s20] sm:$0xff]  ;;  %6413 = vmatpush3.bf16.msra.mxu0 %v6670_v32  ;;  %v6671_v33 = vld [vmem:[%s8594_s13 + $0x8] sm:$0xff]  }
 0x7d0   :  { %6414 = vmatprep.subr.bf16.mxu0 %v7263_v0 }
 0x7d1   :  { %v2691_v38 = vsel %vm413_vm1, %v2687_v37, 0.0  ;;  %v2688_v39 = vadd.f32 %v6767_v59, %v2684_v34  ;;  %v6108_v34 = vld [vmem:[#allocation23] ss:$0 sm:$0xff] }
 0x7d2   :  { %2692 = vadd.xlane.f32.xlu1 %v2691_v38 }
 0x7d3   :  { %v2694_v41 = vsel %vm413_vm1, %v2688_v39, 0.0  ;;  %6415 = vmatpush3.bf16.msra.mxu0 %v6671_v33 }
 0x7d4   :  { %2695 = vadd.xlane.f32.xlu0 %v2694_v41  ;;  %v6426_v23 = vpop.f32.mrb[40].mxu1 }
 0x85f   :  { %v2693_v40 = vpop.xlane.xlu1 %2692 }
 0x860   :  { %v2698_v42 = vmul.f32 0.03125, %v2693_v40  ;;  %v6672_v40 = vld [vmem:[%s8595_s23] sm:$0xff]  }
 0x861   :  { %v2696_v44 = vpop.xlane.xlu0 %2695  ;;  %6428 = vmatprep.subr.bf16.mxu0 %v6672_v40 }
 0x862   :  { %v2700_v45 = vsub.f32 %v2687_v37, %v2698_v42  ;;  %v2699_v46 = vmul.f32 0.03125, %v2696_v44  ;;  %v2945_v37 = vpop.f32.mrb[41].mxu1 }
 0x863   :  { %v2946_v38 = vadd.f32 %v6108_v34, %v2945_v37 }
 0x864   :  { %v2701_v47 = vsub.f32 %v2688_v39, %v2699_v46  ;;  %v2702_v53 = vmul.f32 %v2700_v45, %v2700_v45 }
 0x866   :  { %v2704_v54 = vsel %vm413_vm1, %v2702_v53, 0.0  ;;  %v2703_v49 = vmul.f32 %v2701_v47, %v2701_v47 }
 0x867   :  { %2705 = vadd.xlane.f32.xlu0 %v2704_v54 }
 0x868   :  { %v2707_v52 = vsel %vm413_vm1, %v2703_v49, 0.0 }
 0x869   :  { %2708 = vadd.xlane.f32.xlu1 %v2707_v52  ;;  %v6102_v52 = vld [vmem:[#allocation19] ss:$0 sm:$0xff] }
 0x8f4   :  { %v2706_v55 = vpop.xlane.xlu0 %2705 }
 0x8f5   :  { %v2710_v56 = vmul.f32 0.03125, %v2706_v55 }
 0x8f6   :  { %v2709_v57 = vpop.xlane.xlu1 %2708 }
 0x8f7   :  { %v2712_v58 = vadd.f32 1e-05, %v2710_v56  ;;  %v2711_v2 = vmul.f32 0.03125, %v2709_v57  ;;  %v6103_v57 = vld [vmem:[#allocation20] ss:$0 sm:$0xff] }
 0x8f9   :  { %6714 = vrsqrt.f32 %v2712_v58  ;;  %v2713_v4 = vadd.f32 1e-05, %v2711_v2 }
 0x8fb   :  { %6716 = vrsqrt.f32 %v2713_v4 }
 0x903   :  { %v6715_v13 = vpop.eup %6714 }
 0x904   :  { %v2716_v61 = vmul.f32 %v6715_v13, %v2700_v45 }
 0x905   :  { %v6717_v5 = vpop.eup %6716 }
 0x906   :  { %v2724_v6 = vmul.f32 %v6100_v26, %v2716_v61  ;;  %v2717_v7 = vmul.f32 %v6717_v5, %v2701_v47 }
 0x908   :  { %v2732_v9 = vadd.f32 %v6101_v25, %v2724_v6  ;;  %v2725_v10 = vmul.f32 %v6100_v26, %v2717_v7 }
 0x90a   :  { %v2734_v11 = vadd.f32 %v6766_v36, %v2732_v9  ;;  %v2733_v27 = vadd.f32 %v6101_v25, %v2725_v10  ;;  %v8005_v36 = vadd.f32 %v6426_v23, %v6108_v34  ;;  %v6673_v9 = vld [vmem:[%s8595_s23 + $0x8] sm:$0xff]  }
 0x90c   :  { %v2738_v62 = vsel %vm413_vm1, %v2734_v11, 0.0  ;;  %v2735_v12 = vadd.f32 %v6767_v59, %v2733_v27  ;;  %v6427_v59 = vpop.f32.mrb[42].mxu1 }
 0x90d   :  { %2739 = vadd.xlane.f32.xlu0 %v2738_v62  ;;  %v2948_v39 = vpop.f32.mrb[43].mxu1  ;;  %v8019_v42 = vadd.f32 %v6427_v59, %v6108_v34 }
 0x90e   :  { %v2741_v14 = vsel %vm413_vm1, %v2735_v12, 0.0  ;;  %v8010_v41 = vadd.f32 %v6108_v34, %v2948_v39 }
 0x90f   :  { %2742 = vadd.xlane.f32.xlu1 %v2741_v14 }
 0x99a   :  { %v2740_v51 = vpop.xlane.xlu0 %2739 }
 0x99b   :  { %v2744_v18 = vmul.f32 0.03125, %v2740_v51 }
 0x99c   :  { %v2743_v60 = vpop.xlane.xlu1 %2742 }
 0x99d   :  { %v2746_v24 = vsub.f32 %v2734_v11, %v2744_v18  ;;  %v2745_v28 = vmul.f32 0.03125, %v2743_v60 }
 0x99f   :  { %v2747_v29 = vsub.f32 %v2735_v12, %v2745_v28  ;;  %v2748_v1 = vmul.f32 %v2746_v24, %v2746_v24 }
 0x9a1   :  { %v2750_v30 = vsel %vm413_vm1, %v2748_v1, 0.0  ;;  %v2749_v15 = vmul.f32 %v2747_v29, %v2747_v29 }
 0x9a2   :  { %2751 = vadd.xlane.f32.xlu0 %v2750_v30 }
 0x9a3   :  { %v2753_v16 = vsel %vm413_vm1, %v2749_v15, 0.0 }
 0x9a4   :  { %2754 = vadd.xlane.f32.xlu1 %v2753_v16 }
 0x9b5   :  { %2787 = vperm.xlu1 %6644, %v369_v48  }
 0x9b8   :  { %2782 = vperm.xlu0 %6643, %v368_v31  }
 0x9b9   :  { %3323 = vrot.lane.b32.xlu1 %v2946_v38, %s7266_s15 }
 0x9bc   :  { %3327 = vrot.lane.b32.xlu0 %v8005_v36, %s7266_s15 }
 0x9bd   :  { %3325 = vrot.lane.b32.xlu1 %v8010_v41, %s7266_s15 }
 0x9c1   :  { %3335 = vrot.lane.b32.xlu1 %v2946_v38, %s7267_s6 }
 0x9c5   :  { %3337 = vrot.lane.b32.xlu1 %v8010_v41, %s7267_s6 }
 0x9c9   :  { %3347 = vrot.lane.b32.xlu1 %v2946_v38, %s7265_s17 }
 0x9cd   :  { %3349 = vrot.lane.b32.xlu1 %v8010_v41, %s7265_s17 }
 0x9d1   :  { %3329 = vrot.lane.b32.xlu1 %v8019_v42, %s7266_s15 }
 0xa2f   :  { %v2752_v44 = vpop.xlane.xlu0 %2751 }
 0xa30   :  { %v2756_v45 = vmul.f32 0.03125, %v2752_v44 }
 0xa31   :  { %v2755_v46 = vpop.xlane.xlu1 %2754 }
 0xa32   :  { %v2758_v47 = vadd.f32 1e-05, %v2756_v45  ;;  %v2757_v53 = vmul.f32 0.03125, %v2755_v46 }
 0xa34   :  { %6718 = vrsqrt.f32 %v2758_v47  ;;  %v2759_v54 = vadd.f32 1e-05, %v2757_v53 }
 0xa35   :  { %v8027_v61 = vpop.permute.xlu1 %2787 }
 0xa36   :  { %6720 = vrsqrt.f32 %v2759_v54 }
 0xa37   :  { %v8025_v26 = vpop.permute.xlu0 %2782 }
 0xa39   :  { %v3324_v10 = vpop.permute.xlu1 %3323 }
 0xa3d   :  { %v3326_v11 = vpop.permute.xlu1 %3325 }
 0xa3e   :  { %v6719_v49 = vpop.eup %6718 }
 0xa3f   :  { %v2762_v55 = vmul.f32 %v6719_v49, %v2746_v24 }
 0xa40   :  { %v6721_v56 = vpop.eup %6720 }
 0xa41   :  { %v2770_v58 = vmul.f32 %v6102_v52, %v2762_v55  ;;  %v2763_v2 = vmul.f32 %v6721_v56, %v2747_v29  ;;  %v3336_v27 = vpop.permute.xlu1 %3335 }
 0xa42   :  { %v3359_v12 = vcombine.low %v2946_v38, %v3336_v27  ;;  %v3360_v14 = vcombine.high %v2946_v38, %v3336_v27 }
 0xa43   :  { %v2778_v4 = vadd.f32 %v6103_v57, %v2770_v58  ;;  %v2771_v13 = vmul.f32 %v6102_v52, %v2763_v2 }
 0xa44   :  { %v3367_v8 = vrot.slane %v3359_v12, %v7624_v43  ;;  %v3374_v63 = vrot.slane %v3360_v14, %v7624_v43 }
 0xa45   :  { %v2779_v5 = vadd.f32 %v6103_v57, %v2771_v13  ;;  %v8030_v25 = vmul.f32 %v8025_v26, %v2778_v4  ;;  %v3338_v62 = vpop.permute.xlu1 %3337 }
 0xa46   :  { %v3428_v22 = vcombine.high %v8010_v41, %v3338_v62 }
 0xa47   :  { %v8033_v6 = vmul.f32 %v8027_v61, %v2779_v5 }
 0xa48   :  { %v3442_v1 = vrot.slane %v3428_v22, %v7624_v43 }
 0xa49   :  { %v2820_v7 = vpack.c.bf16 %v8033_v6, %v8030_v25  ;;  %v3348_v35 = vpop.permute.xlu1 %3347 }
 0xa4a   :  { %v3375_v19 = vcombine.low %v3324_v10, %v3348_v35  ;;  %v3376_v20 = vcombine.high %v3324_v10, %v3348_v35 }
 0xa4b   :  { %6417 = vmatmul.mubr.msk.bf16.vlgmr.msra.gmra.mrb[40].mxu0 %vm413_vm1, %v2820_v7 }
 0xa4c   :  { %6429 = vmatpush3.bf16.msra.mxu0 %v6672_v40  ;;  %6432 = vmatprep.mubr.msk.bf16.mxu0 %vm413_vm1, %v7986_v21  ;;  %v3427_v21 = vcombine.low %v8010_v41, %v3338_v62  ;;  %v3383_v3 = vrot.slane %v3375_v19, %v7624_v43 }
 0xa4d   :  { %6430 = vmatprep.subr.bf16.mxu0 %v6673_v9  ;;  %v3350_v51 = vpop.permute.xlu1 %3349 }
 0xa4e   :  { %v3391_v18 = vcombine.low %v3367_v8, %v3383_v3  ;;  %v3392_v60 = vcombine.high %v3367_v8, %v3383_v3  ;;  %v3435_v29 = vrot.slane %v3427_v21, %v7624_v43  ;;  %v3443_v30 = vcombine.low %v3326_v11, %v3350_v51 }
 0xa4f   :  { %v3444_v15 = vcombine.high %v3326_v11, %v3350_v51 }
 0xa50   :  { %6431 = vmatpush3.bf16.msra.mxu0 %v6673_v9  ;;  %v3399_v16 = vrot.slane %v3391_v18, %v7626_v50  ;;  %v3406_v48 = vrot.slane %v3392_v60, %v7626_v50  ;;  %v3451_v33 = vrot.slane %v3443_v30, %v7624_v43 }
 0xa51   :  { %6442 = vmatprep.subr.bf16.mxu0 %v7263_v0  ;;  %v3458_v34 = vrot.slane %v3444_v15, %v7624_v43 }
 0xa52   :  { %v3631_v23 = vcombine.low %v3399_v16, %v3406_v48  ;;  %v6122_v37 = vcombine.high %v3399_v16, %v3406_v48  ;;  %v3459_v39 = vcombine.low %v3435_v29, %v3451_v33  ;;  %v3460_v41 = vcombine.high %v3435_v29, %v3451_v33 }
 0xa53   :  { %6433 = vmatmul.mubr.msk.bf16.vlgmr.msra.gmra.mrb[44].mxu0 %vm413_vm1, %v7989_v17  ;;  %v3390_v17 = vrot.slane %v3376_v20, %v7624_v43  ;;  %v3475_v40 = vcombine.low %v3442_v1, %v3458_v34  ;;  %v3476_v44 = vcombine.high %v3442_v1, %v3458_v34  ;;  %v6104_v34 = vld [vmem:[#allocation22] ss:$0 sm:$0xff] }
 0xa54   :  { %6444 = vmatprep.mubr.msk.bf16.mxu0 %vm7264_vm0, %v7263_v0  ;;  %v3638_v45 = vrot.slane %v3631_v23, %v7624_v43  ;;  %v3646_v46 = vrot.slane %v6122_v37, %v7624_v43  ;;  %v3467_v54 = vrot.slane %v3459_v39, %v7626_v50  ;;  %v3474_v49 = vrot.slane %v3460_v41, %v7626_v50 }
 0xa55   :  { %v3407_v24 = vcombine.low %v3374_v63, %v3390_v17  ;;  %v3408_v28 = vcombine.high %v3374_v63, %v3390_v17  ;;  %v3483_v52 = vrot.slane %v3475_v40, %v7626_v50  ;;  %v3490_v55 = vrot.slane %v3476_v44, %v7626_v50 }
 0xa56   :  { %v3663_v56 = vcombine.low %v3638_v45, %v3646_v46  ;;  %v3699_v58 = vcombine.low %v3467_v54, %v3474_v49  ;;  %v6124_v2 = vcombine.high %v3467_v54, %v3474_v49  ;;  %v3664_v3 = vcombine.high %v3638_v45, %v3646_v46  ;;  %v6113_v46 = vld [vmem:[#allocation25] ss:$0 sm:$0xff] }
 0xa57   :  { %v3415_v31 = vrot.slane %v3407_v24, %v7626_v50  ;;  %v3422_v32 = vrot.slane %v3408_v28, %v7626_v50  ;;  %v3715_v4 = vcombine.low %v3483_v52, %v3490_v55  ;;  %v6125_v13 = vcombine.high %v3483_v52, %v3490_v55 }
 0xa58   :  { %v3671_v5 = vrot.slane %v3663_v56, %v7626_v50  ;;  %v3706_v9 = vrot.slane %v3699_v58, %v7624_v43  ;;  %v3714_v10 = vrot.slane %v6124_v2, %v7624_v43  ;;  %v3678_v28 = vrot.slane %v3664_v3, %v7626_v50  ;;  %v8131_v58 = vpop.permute.xlu1 %3329 }
 0xa59   :  { %v3647_v38 = vcombine.low %v3415_v31, %v3422_v32  ;;  %v6123_v59 = vcombine.high %v3415_v31, %v3422_v32  ;;  %v3722_v11 = vrot.slane %v3715_v4, %v7624_v43  ;;  %v3730_v27 = vrot.slane %v6125_v13, %v7624_v43 }
 0xa5a   :  { %v3731_v62 = vcombine.low %v3706_v9, %v3714_v10  ;;  %v3732_v51 = vcombine.high %v3706_v9, %v3714_v10 }
 0xa5b   :  { %v3654_v47 = vrot.slane %v3647_v38, %v7624_v43  ;;  %v3662_v53 = vrot.slane %v6123_v59, %v7624_v43  ;;  %v3747_v12 = vcombine.low %v3722_v11, %v3730_v27  ;;  %v3748_v18 = vcombine.high %v3722_v11, %v3730_v27 }
 0xa5c   :  { %v3739_v35 = vrot.slane %v3731_v62, %v7626_v50  ;;  %v3746_v1 = vrot.slane %v3732_v51, %v7626_v50 }
 0xa5d   :  { %v3679_v57 = vcombine.low %v3654_v47, %v3662_v53  ;;  %v3755_v8 = vrot.slane %v3747_v12, %v7626_v50  ;;  %v3680_v17 = vcombine.high %v3654_v47, %v3662_v53  ;;  %v3762_v30 = vrot.slane %v3748_v18, %v7626_v50 }
 0xa5f   :  { %v3687_v7 = vrot.slane %v3679_v57, %v7626_v50  ;;  %v3763_v19 = vcombine.low %v3739_v35, %v3755_v8  ;;  %v3764_v20 = vcombine.high %v3739_v35, %v3755_v8  ;;  %v3694_v29 = vrot.slane %v3680_v17, %v7626_v50  ;;  %v3328_v57 = vpop.permute.xlu0 %3327 }
 0xa60   :  { %v3765_v16 = vcombine.low %v3746_v1, %v3762_v30  ;;  %v3766_v31 = vcombine.high %v3746_v1, %v3762_v30 }
 0xa61   :  { %v3695_v14 = vcombine.low %v3671_v5, %v3687_v7  ;;  %v3696_v63 = vcombine.high %v3671_v5, %v3687_v7  ;;  %v3697_v15 = vcombine.low %v3678_v28, %v3694_v29  ;;  %v3698_v48 = vcombine.high %v3678_v28, %v3694_v29 }
 0xa63   :  { %v4495_v21 = vpack.c.bf16 %v3763_v19, %v3695_v14  ;;  %v4496_v22 = vpack.c.bf16 %v3764_v20, %v3696_v63  ;;  %v8084_v32 = vpack.c.bf16 %v3765_v16, %v3697_v15  ;;  %v8086_v33 = vpack.c.bf16 %v3766_v31, %v3698_v48 }
 0xa65   :  { %v4507_v60 = vsel %vm1470_vm2, %v4495_v21, 0  ;;  %v4553_v24 = vsel %vm1470_vm2, %v4496_v22, 0 }
 0xa66   :  { %6437 = vmatpush3.bf16.xpose.msra.mxu1 %v4507_v60  ;;  %6443 = vmatpush3.bf16.xpose.msra.mxu0 %v4553_v24 }
 0xa67   :  { %6448 = vmatprep.subr.bf16.mxu1 %v7263_v0  ;;  %6454 = vmatprep.subr.bf16.mxu0 %v7263_v0 }
 0xb1e   :  { %v2878_v23 = vpop.f32.mrb[40].mxu0 }
 0xb1f   :  { %v2879_v37 = vadd.f32 %v6104_v34, %v2878_v23  ;;  %v6418_v38 = vpop.f32.mrb[41].mxu0 }
 0xb20   :  { %v2881_v59 = vpop.f32.mrb[42].mxu0 }
 0xb21   :  { %v2885_v39 = vmul.f32 0.35355338, %v2879_v37  ;;  %v6419_v41 = vpop.f32.mrb[43].mxu0  ;;  %v2882_v40 = vadd.f32 %v6104_v34, %v2881_v59 }
 0xb23   :  { %3035 = vrot.lane.b32.xlu0 %v2885_v39, %s7267_s6  ;;  %3029 = vrot.lane.b32.xlu1 %v2885_v39, %s7266_s15  ;;  %v8097_v44 = vmul.f32 0.35355338, %v2882_v40 }
 0xb26   :  { %v6434_v45 = vpop.f32.mrb[44].mxu0 }
 0xb27   :  { %3339 = vrot.lane.b32.xlu0 %v8005_v36, %s7267_s6  ;;  %3041 = vrot.lane.b32.xlu1 %v2885_v39, %s7265_s17  ;;  %v8107_v47 = vadd.f32 %v6434_v45, %v6113_v46  ;;  %v3012_v53 = vpop.f32.mrb[45].mxu0 }
 0xb28   :  { %v8109_v54 = vadd.f32 %v6113_v46, %v3012_v53  ;;  %v6435_v49 = vpop.f32.mrb[46].mxu0 }
 0xb29   :  { %v3015_v52 = vpop.f32.mrb[47].mxu0  ;;  %v8119_v56 = vadd.f32 %v6435_v49, %v6113_v46 }
 0xb2a   :  { %v8117_v55 = vadd.f32 %v6113_v46, %v3015_v52 }
 0xb2b   :  { %3351 = vrot.lane.b32.xlu0 %v8005_v36, %s7265_s17  ;;  %3341 = vrot.lane.b32.xlu1 %v8019_v42, %s7267_s6 }
 0xb2f   :  { %3353 = vrot.lane.b32.xlu1 %v8019_v42, %s7265_s17  ;;  %3031 = vrot.lane.b32.xlu0 %v8097_v44, %s7266_s15 }
 0xb33   :  { %3037 = vrot.lane.b32.xlu1 %v8097_v44, %s7267_s6  ;;  %3043 = vrot.lane.b32.xlu0 %v8097_v44, %s7265_s17 }
 0xb37   :  { %3911 = vrot.lane.b32.xlu0 %v8107_v47, %s7266_s15  ;;  %3919 = vrot.lane.b32.xlu1 %v8109_v54, %s7267_s6 }
 0xb3b   :  { %3907 = vrot.lane.b32.xlu0 %v8109_v54, %s7266_s15  ;;  %3931 = vrot.lane.b32.xlu1 %v8109_v54, %s7265_s17 }
 0xb3f   :  { %3921 = vrot.lane.b32.xlu0 %v8117_v55, %s7267_s6  ;;  %3913 = vrot.lane.b32.xlu1 %v8119_v56, %s7266_s15 }
 0xb43   :  { %3933 = vrot.lane.b32.xlu0 %v8117_v55, %s7265_s17  ;;  %3909 = vrot.lane.b32.xlu1 %v8117_v55, %s7266_s15 }
 0xb95   :  { %v3036_v2 = vpop.permute.xlu0 %3035  ;;  %v3030_v4 = vpop.permute.xlu1 %3029 }
 0xb96   :  { %v3047_v13 = vcombine.low %v2885_v39, %v3036_v2  ;;  %v3048_v5 = vcombine.high %v2885_v39, %v3036_v2 }
 0xb98   :  { %v3055_v12 = vrot.slane %v3047_v13, %v7624_v43  ;;  %v3062_v14 = vrot.slane %v3048_v5, %v7624_v43 }
 0xb99   :  { %v3340_v7 = vpop.permute.xlu0 %3339  ;;  %v3042_v9 = vpop.permute.xlu1 %3041 }
 0xb9a   :  { %v3063_v10 = vcombine.low %v3030_v4, %v3042_v9  ;;  %v3064_v11 = vcombine.high %v3030_v4, %v3042_v9  ;;  %v3495_v27 = vcombine.low %v8005_v36, %v3340_v7  ;;  %v3496_v62 = vcombine.high %v8005_v36, %v3340_v7 }
 0xb9c   :  { %v3071_v35 = vrot.slane %v3063_v10, %v7624_v43  ;;  %v3078_v8 = vrot.slane %v3064_v11, %v7624_v43  ;;  %v3503_v17 = vrot.slane %v3495_v27, %v7624_v43  ;;  %v3510_v51 = vrot.slane %v3496_v62, %v7624_v43 }
 0xb9d   :  { %v3352_v63 = vpop.permute.xlu0 %3351  ;;  %v3342_v19 = vpop.permute.xlu1 %3341 }
 0xb9e   :  { %v3079_v20 = vcombine.low %v3055_v12, %v3071_v35  ;;  %v3080_v21 = vcombine.high %v3055_v12, %v3071_v35  ;;  %v3095_v22 = vcombine.low %v3062_v14, %v3078_v8  ;;  %v3096_v3 = vcombine.high %v3062_v14, %v3078_v8 }
 0xb9f   :  { %v3511_v18 = vcombine.low %v3328_v57, %v3352_v63  ;;  %v3512_v36 = vcombine.high %v3328_v57, %v3352_v63  ;;  %v3563_v15 = vcombine.low %v8019_v42, %v3342_v19  ;;  %v3564_v16 = vcombine.high %v8019_v42, %v3342_v19 }
 0xba0   :  { %v3087_v60 = vrot.slane %v3079_v20, %v7626_v50  ;;  %v3094_v24 = vrot.slane %v3080_v21, %v7626_v50  ;;  %v3103_v28 = vrot.slane %v3095_v22, %v7626_v50  ;;  %v3110_v29 = vrot.slane %v3096_v3, %v7626_v50 }
 0xba1   :  { %v3519_v1 = vrot.slane %v3511_v18, %v7624_v43  ;;  %v3526_v30 = vrot.slane %v3512_v36, %v7624_v43  ;;  %v3354_v48 = vpop.permute.xlu1 %3353  ;;  %v3032_v38 = vpop.permute.xlu0 %3031  ;;  %v3571_v7 = vrot.slane %v3563_v15, %v7624_v43  ;;  %v3578_v9 = vrot.slane %v3564_v16, %v7624_v43 }
 0xba2   :  { %v3183_v31 = vcombine.low %v3087_v60, %v3094_v24  ;;  %v6118_v34 = vcombine.high %v3087_v60, %v3094_v24  ;;  %v3199_v23 = vcombine.low %v3103_v28, %v3110_v29  ;;  %v6119_v37 = vcombine.high %v3103_v28, %v3110_v29 }
 0xba3   :  { %v3527_v59 = vcombine.low %v3503_v17, %v3519_v1  ;;  %v3528_v39 = vcombine.high %v3503_v17, %v3519_v1  ;;  %v3543_v41 = vcombine.low %v3510_v51, %v3526_v30  ;;  %v3544_v40 = vcombine.high %v3510_v51, %v3526_v30 }
 0xba4   :  { %v8150_v45 = vrot.slane %v3183_v31, %v7624_v43  ;;  %v8153_v46 = vrot.slane %v6118_v34, %v7624_v43  ;;  %v8156_v53 = vrot.slane %v3199_v23, %v7624_v43  ;;  %v8159_v42 = vrot.slane %v6119_v37, %v7624_v43 }
 0xba5   :  { %v3535_v49 = vrot.slane %v3527_v59, %v7626_v50  ;;  %v3542_v52 = vrot.slane %v3528_v39, %v7626_v50  ;;  %v3551_v57 = vrot.slane %v3543_v41, %v7626_v50  ;;  %v3558_v2 = vrot.slane %v3544_v40, %v7626_v50  ;;  %v3038_v4 = vpop.permute.xlu1 %3037  ;;  %v3044_v63 = vpop.permute.xlu0 %3043 }
 0xba6   :  { %v3215_v13 = vcombine.low %v8150_v45, %v8153_v46  ;;  %v3216_v5 = vcombine.high %v8150_v45, %v8153_v46  ;;  %v3231_v10 = vcombine.low %v8156_v53, %v8159_v42  ;;  %v3232_v11 = vcombine.high %v8156_v53, %v8159_v42 }
 0xba7   :  { %v3767_v27 = vcombine.low %v3535_v49, %v3542_v52  ;;  %v6126_v62 = vcombine.high %v3535_v49, %v3542_v52  ;;  %v3579_v12 = vcombine.low %v8131_v58, %v3354_v48  ;;  %v3580_v14 = vcombine.high %v8131_v58, %v3354_v48 }
 0xba8   :  { %v3115_v35 = vcombine.low %v8097_v44, %v3038_v4  ;;  %v3116_v8 = vcombine.high %v8097_v44, %v3038_v4  ;;  %v3783_v21 = vcombine.low %v3551_v57, %v3558_v2  ;;  %v6127_v22 = vcombine.high %v3551_v57, %v3558_v2 }
 0xba9   :  { %v8180_v19 = vrot.slane %v3767_v27, %v7624_v43  ;;  %v8183_v20 = vrot.slane %v6126_v62, %v7624_v43  ;;  %v3587_v3 = vrot.slane %v3579_v12, %v7624_v43  ;;  %v3594_v17 = vrot.slane %v3580_v14, %v7624_v43 }
 0xbaa   :  { %v3123_v51 = vrot.slane %v3115_v35, %v7624_v43  ;;  %v3130_v58 = vrot.slane %v3116_v8, %v7624_v43  ;;  %v3131_v18 = vcombine.low %v3032_v38, %v3044_v63  ;;  %v3132_v36 = vcombine.high %v3032_v38, %v3044_v63 }
 0xbab   :  { %v3223_v44 = vrot.slane %v3215_v13, %v7626_v50  ;;  %v3239_v60 = vrot.slane %v3231_v10, %v7626_v50  ;;  %v3595_v24 = vcombine.low %v3571_v7, %v3587_v3  ;;  %v3596_v28 = vcombine.high %v3571_v7, %v3587_v3 }
 0xbac   :  { %v3611_v29 = vcombine.low %v3578_v9, %v3594_v17  ;;  %v3612_v1 = vcombine.high %v3578_v9, %v3594_v17  ;;  %v3139_v30 = vrot.slane %v3131_v18, %v7624_v43  ;;  %v3146_v15 = vrot.slane %v3132_v36, %v7624_v43 }
 0xbad   :  { %v3247_v16 = vcombine.low %v3223_v44, %v3239_v60  ;;  %v3248_v48 = vcombine.high %v3223_v44, %v3239_v60  ;;  %v3603_v31 = vrot.slane %v3595_v24, %v7626_v50  ;;  %v3610_v34 = vrot.slane %v3596_v28, %v7626_v50 }
 0xbae   :  { %v3619_v23 = vrot.slane %v3611_v29, %v7626_v50  ;;  %v3626_v37 = vrot.slane %v3612_v1, %v7626_v50  ;;  %v3147_v38 = vcombine.low %v3123_v51, %v3139_v30  ;;  %v3148_v59 = vcombine.high %v3123_v51, %v3139_v30 }
 0xbaf   :  { %v3163_v39 = vcombine.low %v3130_v58, %v3146_v15  ;;  %v3164_v41 = vcombine.high %v3130_v58, %v3146_v15  ;;  %v3835_v40 = vcombine.low %v3603_v31, %v3610_v34  ;;  %v6128_v45 = vcombine.high %v3603_v31, %v3610_v34 }
 0xbb0   :  { %v3851_v46 = vcombine.low %v3619_v23, %v3626_v37  ;;  %v6129_v53 = vcombine.high %v3619_v23, %v3626_v37  ;;  %v3155_v42 = vrot.slane %v3147_v38, %v7626_v50  ;;  %v3162_v49 = vrot.slane %v3148_v59, %v7626_v50 }
 0xbb1   :  { %v3171_v52 = vrot.slane %v3163_v39, %v7626_v50  ;;  %v3178_v57 = vrot.slane %v3164_v41, %v7626_v50  ;;  %v3790_v2 = vrot.slane %v3783_v21, %v7624_v43  ;;  %v3798_v4 = vrot.slane %v6127_v22, %v7624_v43 }
 0xbb2   :  { %v3842_v13 = vrot.slane %v3835_v40, %v7624_v43  ;;  %v3850_v7 = vrot.slane %v6128_v45, %v7624_v43  ;;  %v3251_v9 = vcombine.low %v3155_v42, %v3162_v49  ;;  %v6120_v10 = vcombine.high %v3155_v42, %v3162_v49 }
 0xbb3   :  { %v3267_v27 = vcombine.low %v3171_v52, %v3178_v57  ;;  %v6121_v62 = vcombine.high %v3171_v52, %v3178_v57  ;;  %v4487_v12 = vpack.c.bf16 %v3247_v16, %v3247_v16  ;;  %v4488_v14 = vpack.c.bf16 %v3248_v48, %v3248_v48 }
 0xbb4   :  { %v3230_v35 = vrot.slane %v3216_v5, %v7626_v50  ;;  %v3246_v8 = vrot.slane %v3232_v11, %v7626_v50  ;;  %v3858_v63 = vrot.slane %v3851_v46, %v7624_v43  ;;  %v3866_v21 = vrot.slane %v6129_v53, %v7624_v43 }
 0xbb5   :  { %v8210_v22 = vrot.slane %v3251_v9, %v7624_v43  ;;  %v8213_v3 = vrot.slane %v6120_v10, %v7624_v43  ;;  %v8216_v17 = vrot.slane %v3267_v27, %v7624_v43  ;;  %v8219_v51 = vrot.slane %v6121_v62, %v7624_v43  ;;  %6439 = vmatmul.mubr.msk.bf16.vlgmr.msra.gmra.mrb[44].mxu1 %vm1470_vm2, %v4487_v12 }
 0xbb6   :  { %6445 = vmatmul.mubr.msk.bf16.vlgmr.msra.gmra.mrb[48].mxu0 %vm1470_vm2, %v4488_v14  ;;  %v4599_v5 = vsel %vm1470_vm2, %v8084_v32, 0  ;;  %v3799_v11 = vcombine.low %v8180_v19, %v8183_v20  ;;  %v4645_v58 = vsel %vm1470_vm2, %v8086_v33, 0  ;;  %v3249_v18 = vcombine.low %v3230_v35, %v3246_v8  ;;  %6450 = vmatprep.mubr.msk.bf16.mxu1 %vm7264_vm0, %v7263_v0  ;;  %v8265_v14 = vpop.permute.xlu0 %3911 }
 0xbb7   :  { %6449 = vmatpush3.bf16.xpose.msra.mxu1 %v4599_v5  ;;  %v3283_v36 = vcombine.low %v8210_v22, %v8213_v3  ;;  %6455 = vmatpush3.bf16.xpose.msra.mxu0 %v4645_v58  ;;  %v3250_v44 = vcombine.high %v3230_v35, %v3246_v8  ;;  %v3815_v32 = vcombine.low %v3790_v2, %v3798_v4 }
 0xbb8   :  { %v3807_v60 = vrot.slane %v3799_v11, %v7626_v50  ;;  %6456 = vmatprep.mubr.msk.bf16.mxu0 %vm7264_vm0, %v7263_v0  ;;  %6460 = vmatprep.subr.bf16.mxu1 %v7263_v0  ;;  %v3867_v24 = vcombine.low %v3842_v13, %v3850_v7  ;;  %v3883_v28 = vcombine.low %v3858_v63, %v3866_v21 }
 0xbb9   :  { %v3299_v33 = vcombine.low %v8216_v17, %v8219_v51  ;;  %6466 = vmatprep.subr.bf16.mxu0 %v7263_v0  ;;  %v3800_v29 = vcombine.high %v8180_v19, %v8183_v20  ;;  %v3816_v1 = vcombine.high %v3790_v2, %v3798_v4  ;;  %v3823_v30 = vrot.slane %v3815_v32, %v7626_v50 }
 0xbba   :  { %v3875_v15 = vrot.slane %v3867_v24, %v7626_v50  ;;  %v3891_v16 = vrot.slane %v3883_v28, %v7626_v50  ;;  %v3868_v48 = vcombine.high %v3842_v13, %v3850_v7  ;;  %v4489_v31 = vpack.c.bf16 %v3249_v18, %v3249_v18  ;;  %v3908_v11 = vpop.permute.xlu0 %3907 }
 0xbbb   :  { %v4490_v34 = vpack.c.bf16 %v3250_v44, %v3250_v44  ;;  %v3291_v23 = vrot.slane %v3283_v36, %v7626_v50  ;;  %v3831_v37 = vcombine.low %v3807_v60, %v3823_v30  ;;  %v3832_v59 = vcombine.high %v3807_v60, %v3823_v30 }
 0xbbc   :  { %v3899_v38 = vcombine.low %v3875_v15, %v3891_v16  ;;  %v3900_v39 = vcombine.high %v3875_v15, %v3891_v16  ;;  %v3307_v19 = vrot.slane %v3299_v33, %v7626_v50  ;;  %v3814_v20 = vrot.slane %v3800_v29, %v7626_v50 }
 0xbbd   :  { %v3830_v41 = vrot.slane %v3816_v1, %v7626_v50  ;;  %v3882_v40 = vrot.slane %v3868_v48, %v7626_v50  ;;  %v3884_v53 = vcombine.high %v3858_v63, %v3866_v21  ;;  %v3284_v42 = vcombine.high %v8210_v22, %v8213_v3  ;;  %v3920_v22 = vpop.permute.xlu1 %3919 }
 0xbbe   :  { %6451 = vmatmul.mubr.msk.bf16.vlgmr.msra.gmra.mrb[48].mxu1 %vm1470_vm2, %v4489_v31  ;;  %6457 = vmatmul.mubr.msk.bf16.vlgmr.msra.gmra.mrb[52].mxu0 %vm1470_vm2, %v4490_v34  ;;  %v4499_v45 = vpack.c.bf16 %v3899_v38, %v3831_v37  ;;  %v4500_v46 = vpack.c.bf16 %v3900_v39, %v3832_v59  ;;  %v3300_v49 = vcombine.high %v8216_v17, %v8219_v51  ;;  %v3922_v33 = vpop.permute.xlu0 %3921 }
 0xbbf   :  { %6462 = vmatprep.mubr.msk.bf16.mxu1 %vm7264_vm0, %v7263_v0  ;;  %6468 = vmatprep.mubr.msk.bf16.mxu0 %vm7264_vm0, %v7263_v0  ;;  %v3898_v2 = vrot.slane %v3884_v53, %v7626_v50  ;;  %v3315_v4 = vcombine.low %v3291_v23, %v3307_v19  ;;  %v3316_v13 = vcombine.high %v3291_v23, %v3307_v19 }
 0xbc0   :  { %v4691_v52 = vsel %vm1470_vm2, %v4499_v45, 0  ;;  %v4737_v57 = vsel %vm1470_vm2, %v4500_v46, 0  ;;  %v3833_v7 = vcombine.low %v3814_v20, %v3830_v41  ;;  %v3834_v10 = vcombine.high %v3814_v20, %v3830_v41 }
 0xbc1   :  { %6461 = vmatpush3.bf16.xpose.msra.mxu1 %v4691_v52  ;;  %6467 = vmatpush3.bf16.xpose.msra.mxu0 %v4737_v57  ;;  %v3901_v9 = vcombine.low %v3882_v40, %v3898_v2  ;;  %v3902_v27 = vcombine.high %v3882_v40, %v3898_v2  ;;  %v4491_v35 = vpack.c.bf16 %v3315_v4, %v3315_v4  ;;  %v3932_v36 = vpop.permute.xlu1 %3931 }
 0xbc2   :  { %6472 = vmatprep.subr.bf16.mxu1 %v7263_v0  ;;  %6478 = vmatprep.subr.bf16.mxu0 %v7263_v0  ;;  %v4492_v8 = vpack.c.bf16 %v3316_v13, %v3316_v13  ;;  %v3298_v63 = vrot.slane %v3284_v42, %v7626_v50  ;;  %v3314_v21 = vrot.slane %v3300_v49, %v7626_v50  ;;  %v3934_v19 = vpop.permute.xlu0 %3933 }
 0xbc3   :  { %v4501_v62 = vpack.c.bf16 %v3901_v9, %v3833_v7  ;;  %v4502_v12 = vpack.c.bf16 %v3902_v27, %v3834_v10  ;;  %v3943_v3 = vcombine.low %v8109_v54, %v3920_v22  ;;  %v3944_v17 = vcombine.high %v8109_v54, %v3920_v22 }
 0xbc4   :  { %v3317_v58 = vcombine.low %v3298_v63, %v3314_v21  ;;  %v3318_v18 = vcombine.high %v3298_v63, %v3314_v21  ;;  %v3959_v60 = vcombine.low %v3908_v11, %v3932_v36  ;;  %v3960_v32 = vcombine.high %v3908_v11, %v3932_v36 }
 0xbc5   :  { %v4783_v51 = vsel %vm1470_vm2, %v4501_v62, 0  ;;  %v4829_v5 = vsel %vm1470_vm2, %v4502_v12, 0  ;;  %v3951_v54 = vrot.slane %v3943_v3, %v7624_v43  ;;  %v3958_v44 = vrot.slane %v3944_v17, %v7624_v43  ;;  %v8285_v30 = vpop.permute.xlu1 %3913 }
 0xbc6   :  { %v3967_v24 = vrot.slane %v3959_v60, %v7624_v43  ;;  %v3974_v28 = vrot.slane %v3960_v32, %v7624_v43  ;;  %v4493_v29 = vpack.c.bf16 %v3317_v58, %v3317_v58  ;;  %v4494_v1 = vpack.c.bf16 %v3318_v18, %v3318_v18 }
 0xbc7   :  { %v4011_v34 = vcombine.low %v8117_v55, %v3922_v33  ;;  %v4012_v23 = vcombine.high %v8117_v55, %v3922_v33 }
 0xbc8   :  { %6463 = vmatmul.mubr.msk.bf16.vlgmr.msra.gmra.mrb[52].mxu1 %vm1470_vm2, %v4491_v35  ;;  %6469 = vmatmul.mubr.msk.bf16.vlgmr.msra.gmra.mrb[56].mxu0 %vm1470_vm2, %v4492_v8  ;;  %v3975_v15 = vcombine.low %v3951_v54, %v3967_v24  ;;  %v3976_v16 = vcombine.high %v3951_v54, %v3967_v24  ;;  %v3991_v48 = vcombine.low %v3958_v44, %v3974_v28 }
 0xbc9   :  { %6473 = vmatpush3.bf16.xpose.msra.mxu1 %v4783_v51  ;;  %6479 = vmatpush3.bf16.xpose.msra.mxu0 %v4829_v5  ;;  %v3992_v31 = vcombine.high %v3958_v44, %v3974_v28  ;;  %v3910_v20 = vpop.permute.xlu1 %3909  ;;  %v4019_v46 = vrot.slane %v4011_v34, %v7624_v43  ;;  %v4026_v53 = vrot.slane %v4012_v23, %v7624_v43 }
 0xbca   :  { %6474 = vmatprep.mubr.msk.bf16.mxu1 %vm7264_vm0, %v7263_v0  ;;  %6480 = vmatprep.mubr.msk.bf16.mxu0 %vm7264_vm0, %v7263_v0  ;;  %v3983_v37 = vrot.slane %v3975_v15, %v7626_v50  ;;  %v3990_v38 = vrot.slane %v3976_v16, %v7626_v50  ;;  %v3999_v59 = vrot.slane %v3991_v48, %v7626_v50 }
 0xbcb   :  { %6484 = vmatprep.subr.bf16.mxu1 %v7263_v0  ;;  %6490 = vmatprep.subr.bf16.mxu0 %v7263_v0  ;;  %v4006_v39 = vrot.slane %v3992_v31, %v7626_v50  ;;  %v4027_v42 = vcombine.low %v3910_v20, %v3934_v19  ;;  %v4028_v49 = vcombine.high %v3910_v20, %v3934_v19 }
 0xbcc   :  { %v4215_v41 = vcombine.low %v3983_v37, %v3990_v38  ;;  %v6130_v40 = vcombine.high %v3983_v37, %v3990_v38 }
 0xbcd   :  { %v4231_v45 = vcombine.low %v3999_v59, %v4006_v39  ;;  %v6131_v55 = vcombine.high %v3999_v59, %v4006_v39  ;;  %v4035_v13 = vrot.slane %v4027_v42, %v7624_v43  ;;  %v4042_v7 = vrot.slane %v4028_v49, %v7624_v43 }
 0xbce   :  { %v4222_v52 = vrot.slane %v4215_v41, %v7624_v43  ;;  %v4230_v57 = vrot.slane %v6130_v40, %v7624_v43 }
 0xbcf   :  { %v4238_v2 = vrot.slane %v4231_v45, %v7624_v43  ;;  %v4246_v4 = vrot.slane %v6131_v55, %v7624_v43  ;;  %v4043_v9 = vcombine.low %v4019_v46, %v4035_v13  ;;  %v4044_v10 = vcombine.high %v4019_v46, %v4035_v13 }
 0xbd0   :  { %6475 = vmatmul.mubr.msk.bf16.vlgmr.msra.gmra.mrb[56].mxu1 %vm1470_vm2, %v4493_v29  ;;  %6481 = vmatmul.mubr.msk.bf16.vlgmr.msra.gmra.mrb[60].mxu0 %vm1470_vm2, %v4494_v1  ;;  %v4059_v27 = vcombine.low %v4026_v53, %v4042_v7  ;;  %v4060_v62 = vcombine.high %v4026_v53, %v4042_v7  ;;  %v4247_v12 = vcombine.low %v4222_v52, %v4230_v57  ;;  %v6183_v53 = vld [vmem:[#allocation5] sm:$0xff]  }
 0xbd1   :  { %6486 = vmatprep.mubr.msk.bf16.mxu1 %vm7264_vm0, %v7263_v0  ;;  %6492 = vmatprep.mubr.msk.bf16.mxu0 %vm7264_vm0, %v7263_v0  ;;  %v4263_v35 = vcombine.low %v4238_v2, %v4246_v4  ;;  %v4051_v8 = vrot.slane %v4043_v9, %v7626_v50  ;;  %v4058_v63 = vrot.slane %v4044_v10, %v7626_v50  ;;  %v6184_v42 = vunpack.c.l.bf16 %v6183_v53 }
 0xbd2   :  { %v4067_v21 = vrot.slane %v4059_v27, %v7626_v50  ;;  %v4074_v22 = vrot.slane %v4060_v62, %v7626_v50  ;;  %v4255_v11 = vrot.slane %v4247_v12, %v7626_v50  ;;  %v4248_v31 = vcombine.high %v4222_v52, %v4230_v57 }
 0xbd3   :  { %v4283_v3 = vcombine.low %v4051_v8, %v4058_v63  ;;  %v6132_v17 = vcombine.high %v4051_v8, %v4058_v63  ;;  %v4271_v58 = vrot.slane %v4263_v35, %v7626_v50  ;;  %v4264_v34 = vcombine.high %v4238_v2, %v4246_v4 }
 0xbd4   :  { %v4299_v51 = vcombine.low %v4067_v21, %v4074_v22  ;;  %v6133_v5 = vcombine.high %v4067_v21, %v4074_v22  ;;  %v4262_v38 = vrot.slane %v4248_v31, %v7626_v50 }
 0xbd5   :  { %v4290_v18 = vrot.slane %v4283_v3, %v7624_v43  ;;  %v4298_v54 = vrot.slane %v6132_v17, %v7624_v43  ;;  %v4279_v24 = vcombine.low %v4255_v11, %v4271_v58  ;;  %v4280_v29 = vcombine.high %v4255_v11, %v4271_v58 }
 0xbd6   :  { %v4306_v36 = vrot.slane %v4299_v51, %v7624_v43  ;;  %v4314_v44 = vrot.slane %v6133_v5, %v7624_v43  ;;  %v4278_v59 = vrot.slane %v4264_v34, %v7626_v50 }
 0xbd7   :  { %v4315_v60 = vcombine.low %v4290_v18, %v4298_v54  ;;  %v4316_v23 = vcombine.high %v4290_v18, %v4298_v54  ;;  %v6185_v54 = vunpack.c.h.bf16 %v6183_v53 }
 0xbd8   :  { %v4331_v32 = vcombine.low %v4306_v36, %v4314_v44  ;;  %v4332_v37 = vcombine.high %v4306_v36, %v4314_v44  ;;  %v4282_v20 = vcombine.high %v4262_v38, %v4278_v59  ;;  %v4281_v40 = vcombine.low %v4262_v38, %v4278_v59 }
 0xbd9   :  { %v4323_v28 = vrot.slane %v4315_v60, %v7626_v50  ;;  %v4330_v39 = vrot.slane %v4316_v23, %v7626_v50 }
 0xbda   :  { %v4339_v33 = vrot.slane %v4331_v32, %v7626_v50  ;;  %v4346_v19 = vrot.slane %v4332_v37, %v7626_v50 }
 0xbdc   :  { %v4347_v1 = vcombine.low %v4323_v28, %v4339_v33  ;;  %v4348_v15 = vcombine.high %v4323_v28, %v4339_v33  ;;  %v4350_v41 = vcombine.high %v4330_v39, %v4346_v19  ;;  %v4349_v45 = vcombine.low %v4330_v39, %v4346_v19 }
 0xbde   :  { %v4975_v16 = vpack.c.bf16 %v4347_v1, %v4279_v24  ;;  %v4976_v48 = vpack.c.bf16 %v4348_v15, %v4280_v29  ;;  %v8325_v55 = vpack.c.bf16 %v4350_v41, %v4282_v20  ;;  %v8327_v46 = vpack.c.bf16 %v4349_v45, %v4281_v40 }
 0xbe0   :  { %6485 = vmatpush3.bf16.msra.mxu1 %v4975_v16  ;;  %6491 = vmatpush3.bf16.msra.mxu0 %v4976_v48 }
 0xbe1   :  { %6496 = vmatprep.subr.bf16.mxu1 %v7263_v0  ;;  %6502 = vmatprep.subr.bf16.mxu0 %v7263_v0 }
 0xc88   :  { %v4543_v49 = vpop.f32.mrb[44].mxu1 }
 0xc89   :  { %v4589_v52 = vpop.f32.mrb[48].mxu0  ;;  %v4871_v57 = vadd.f32 %v6184_v42, %v4543_v49  ;;  %v6440_v4 = vpop.f32.mrb[45].mxu1 }
 0xc8a   :  { %v4872_v2 = vadd.f32 %v6184_v42, %v4589_v52  ;;  %v6446_v13 = vpop.f32.mrb[49].mxu0  ;;  %v4546_v7 = vpop.f32.mrb[46].mxu1 }
 0xc8b   :  { %v4592_v9 = vpop.f32.mrb[50].mxu0  ;;  %v6441_v10 = vpop.f32.mrb[47].mxu1  ;;  %v4879_v62 = vsel %vm2618_vm4, %v4871_v57, -inf }
 0xc8c   :  { %v6447_v27 = vpop.f32.mrb[51].mxu0  ;;  %v4882_v12 = vsel %vm2618_vm4, %v4872_v2, -inf  ;;  %4880 = vmax.xlane.f32.xlu1 %v4879_v62 }
 0xc8d   :  { %4883 = vmax.xlane.f32.xlu0 %v4882_v12 }
 0xc91   :  { %v4635_v35 = vpop.f32.mrb[48].mxu1  ;;  %v4681_v63 = vpop.f32.mrb[52].mxu0 }
 0xc92   :  { %v4873_v8 = vadd.f32 %v6184_v42, %v4635_v35  ;;  %v6452_v21 = vpop.f32.mrb[49].mxu1  ;;  %v4874_v22 = vadd.f32 %v6184_v42, %v4681_v63  ;;  %v6458_v3 = vpop.f32.mrb[53].mxu0 }
 0xc93   :  { %v4638_v17 = vpop.f32.mrb[50].mxu1  ;;  %v4684_v51 = vpop.f32.mrb[54].mxu0 }
 0xc94   :  { %v6453_v5 = vpop.f32.mrb[51].mxu1  ;;  %v4885_v11 = vsel %vm2618_vm4, %v4873_v8, -inf  ;;  %v6459_v58 = vpop.f32.mrb[55].mxu0  ;;  %v4888_v18 = vsel %vm2618_vm4, %v4874_v22, -inf }
 0xc95   :  { %4886 = vmax.xlane.f32.xlu0 %v4885_v11  ;;  %4889 = vmax.xlane.f32.xlu1 %v4888_v18 }
 0xc9b   :  { %v4727_v36 = vpop.f32.mrb[52].mxu1  ;;  %v4773_v44 = vpop.f32.mrb[56].mxu0 }
 0xc9c   :  { %v4875_v60 = vadd.f32 %v6185_v54, %v4727_v36  ;;  %v4876_v32 = vadd.f32 %v6185_v54, %v4773_v44  ;;  %v6464_v24 = vpop.f32.mrb[53].mxu1  ;;  %v6470_v28 = vpop.f32.mrb[57].mxu0 }
 0xc9d   :  { %v4730_v33 = vpop.f32.mrb[54].mxu1  ;;  %v4776_v29 = vpop.f32.mrb[58].mxu0 }
 0xc9e   :  { %v6465_v1 = vpop.f32.mrb[55].mxu1  ;;  %v6471_v15 = vpop.f32.mrb[59].mxu0  ;;  %v4894_v16 = vsel %vm2618_vm4, %v4876_v32, -inf  ;;  %v4891_v48 = vsel %vm2618_vm4, %v4875_v60, -inf }
 0xc9f   :  { %4895 = vmax.xlane.f32.xlu1 %v4894_v16  ;;  %4892 = vmax.xlane.f32.xlu0 %v4891_v48 }
 0xca3   :  { %v4819_v31 = vpop.f32.mrb[56].mxu1  ;;  %v4865_v34 = vpop.f32.mrb[60].mxu0 }
 0xca4   :  { %v4877_v23 = vadd.f32 %v6185_v54, %v4819_v31  ;;  %v4878_v37 = vadd.f32 %v6185_v54, %v4865_v34  ;;  %v6476_v38 = vpop.f32.mrb[57].mxu1  ;;  %v6482_v59 = vpop.f32.mrb[61].mxu0 }
 0xca5   :  { %v4822_v39 = vpop.f32.mrb[58].mxu1  ;;  %v4868_v19 = vpop.f32.mrb[62].mxu0 }
 0xca6   :  { %v6477_v20 = vpop.f32.mrb[59].mxu1  ;;  %v6483_v41 = vpop.f32.mrb[63].mxu0  ;;  %v4900_v40 = vsel %vm2618_vm4, %v4878_v37, -inf  ;;  %v4897_v45 = vsel %vm2618_vm4, %v4877_v23, -inf }
 0xca7   :  { %4901 = vmax.xlane.f32.xlu1 %v4900_v40  ;;  %4898 = vmax.xlane.f32.xlu0 %v4897_v45 }
 0xcb8   :  { %3923 = vrot.lane.b32.xlu1 %v8107_v47, %s7267_s6 }
 0xcbd   :  { %3925 = vrot.lane.b32.xlu0 %v8119_v56, %s7267_s6 }
 0xd19   :  { %v4881_v53 = vpop.xlane.xlu1 %4880 }
 0xd1a   :  { %v4884_v42 = vpop.xlane.xlu0 %4883  ;;  %v4903_v49 = vsub.f32 %v4871_v57, %v4881_v53 }
 0xd1b   :  { %v4904_v52 = vsub.f32 %v4872_v2, %v4884_v42 }
 0xd1c   :  { %v4911_v4 = vmul.f32 1.442695, %v4903_v49 }
 0xd1d   :  { %v4913_v13 = vmul.f32 1.442695, %v4904_v52 }
 0xd1e   :  { %6722 = vpow2.f32 %v4911_v4 }
 0xd1f   :  { %6724 = vpow2.f32 %v4913_v13 }
 0xd22   :  { %v4887_v7 = vpop.xlane.xlu0 %4886  ;;  %v4890_v9 = vpop.xlane.xlu1 %4889 }
 0xd23   :  { %v4905_v10 = vsub.f32 %v4873_v8, %v4887_v7  ;;  %v4906_v27 = vsub.f32 %v4874_v22, %v4890_v9 }
 0xd25   :  { %v4915_v62 = vmul.f32 1.442695, %v4905_v10  ;;  %v4917_v12 = vmul.f32 1.442695, %v4906_v27 }
 0xd27   :  { %6726 = vpow2.f32 %v4915_v62 }
 0xd28   :  { %6728 = vpow2.f32 %v4917_v12  ;;  %v6723_v35 = vpop.eup %6722 }
 0xd29   :  { %v6725_v63 = vpop.eup %6724  ;;  %v4927_v21 = vsel %vm2618_vm4, %v6723_v35, 0.0 }
 0xd2a   :  { %4928 = vadd.xlane.f32.xlu0 %v4927_v21  ;;  %v4930_v57 = vsel %vm2618_vm4, %v6725_v63, 0.0 }
 0xd2b   :  { %4931 = vadd.xlane.f32.xlu1 %v4930_v57 }
 0xd2c   :  { %v4896_v2 = vpop.xlane.xlu1 %4895  ;;  %v4893_v3 = vpop.xlane.xlu0 %4892 }
 0xd2d   :  { %v4908_v17 = vsub.f32 %v4876_v32, %v4896_v2  ;;  %v4907_v51 = vsub.f32 %v4875_v60, %v4893_v3 }
 0xd2f   :  { %v4921_v5 = vmul.f32 1.442695, %v4908_v17  ;;  %v4919_v11 = vmul.f32 1.442695, %v4907_v51 }
 0xd31   :  { %v6727_v8 = vpop.eup %6726  ;;  %6730 = vpow2.f32 %v4921_v5 }
 0xd32   :  { %v6729_v22 = vpop.eup %6728  ;;  %v4933_v58 = vsel %vm2618_vm4, %v6727_v8, 0.0  ;;  %6732 = vpow2.f32 %v4919_v11 }
 0xd33   :  { %v4936_v18 = vsel %vm2618_vm4, %v6729_v22, 0.0  ;;  %4934 = vadd.xlane.f32.xlu1 %v4933_v58 }
 0xd34   :  { %4937 = vadd.xlane.f32.xlu0 %v4936_v18  ;;  %v4899_v32 = vpop.xlane.xlu0 %4898  ;;  %v4902_v24 = vpop.xlane.xlu1 %4901 }
 0xd35   :  { %v4909_v28 = vsub.f32 %v4877_v23, %v4899_v32  ;;  %v4910_v33 = vsub.f32 %v4878_v37, %v4902_v24 }
 0xd37   :  { %v4923_v29 = vmul.f32 1.442695, %v4909_v28  ;;  %v4925_v1 = vmul.f32 1.442695, %v4910_v33 }
 0xd38   :  { %v3926_v34 = vpop.permute.xlu0 %3925  ;;  %v3924_v38 = vpop.permute.xlu1 %3923 }
 0xd39   :  { %6734 = vpow2.f32 %v4923_v29  ;;  %v4147_v10 = vcombine.low %v8119_v56, %v3926_v34  ;;  %v4148_v27 = vcombine.high %v8119_v56, %v3926_v34 }
 0xd3a   :  { %6736 = vpow2.f32 %v4925_v1 }
 0xd3b   :  { %v8345_v54 = vpop.eup %6730  ;;  %v4155_v17 = vrot.slane %v4147_v10, %v7624_v43 }
 0xd3c   :  { %v8347_v36 = vpop.eup %6732  ;;  %v4942_v44 = vsel %vm2618_vm4, %v8345_v54, 0.0 }
 0xd3d   :  { %4943 = vadd.xlane.f32.xlu1 %v4942_v44  ;;  %v4939_v60 = vsel %vm2618_vm4, %v8347_v36, 0.0 }
 0xd3e   :  { %4940 = vadd.xlane.f32.xlu0 %v4939_v60 }
 0xd43   :  { %v8357_v15 = vpop.eup %6734 }
 0xd44   :  { %v8359_v16 = vpop.eup %6736  ;;  %v4945_v48 = vsel %vm2618_vm4, %v8357_v15, 0.0 }
 0xd45   :  { %v4948_v31 = vsel %vm2618_vm4, %v8359_v16, 0.0 }
 0xd4e   :  { %3935 = vrot.lane.b32.xlu1 %v8107_v47, %s7265_s17 }
 0xd54   :  { %3937 = vrot.lane.b32.xlu0 %v8119_v56, %s7265_s17 }
 0xd72   :  { %4946 = vadd.xlane.f32.xlu1 %v4945_v48 }
 0xd73   :  { %4949 = vadd.xlane.f32.xlu0 %v4948_v31 }
 0xdb7   :  { %v4929_v23 = vpop.xlane.xlu0 %4928 }
 0xdb8   :  { %v4932_v37 = vpop.xlane.xlu1 %4931  ;;  %6738 = vrcp.f32 %v4929_v23 }
 0xdb9   :  { %6740 = vrcp.f32 %v4932_v37 }
 0xdc0   :  { %v4935_v59 = vpop.xlane.xlu1 %4934 }
 0xdc1   :  { %6742 = vrcp.f32 %v4935_v59  ;;  %v4938_v39 = vpop.xlane.xlu0 %4937 }
 0xdc2   :  { %6744 = vrcp.f32 %v4938_v39  ;;  %v6739_v19 = vpop.eup %6738 }
 0xdc3   :  { %v6741_v20 = vpop.eup %6740  ;;  %v4959_v41 = vmul.f32 %v6739_v19, %v6723_v35 }
 0xdc4   :  { %v4960_v40 = vmul.f32 %v6741_v20, %v6725_v63 }
 0xdc5   :  { %v4967_v45 = vpack.c.bf16 %v4959_v41, %v4959_v41 }
 0xdc6   :  { %v4968_v53 = vpack.c.bf16 %v4960_v40, %v4960_v40 }
 0xdc7   :  { %6487 = vmatmul.mubr.msk.bf16.vlgmr.msra.gmra.mrb[60].mxu1 %vm2618_vm4, %v4967_v45 }
 0xdc8   :  { %6493 = vmatmul.mubr.msk.bf16.vlgmr.msra.gmra.mrb[64].mxu0 %vm2618_vm4, %v4968_v53  ;;  %6497 = vmatpush3.bf16.msra.mxu1 %v8327_v46  ;;  %v4079_v46 = vcombine.low %v8107_v47, %v3924_v38 }
 0xdc9   :  { %6503 = vmatpush3.bf16.msra.mxu0 %v8325_v55  ;;  %6498 = vmatprep.mubr.msk.bf16.mxu1 %vm7264_vm0, %v7263_v0  ;;  %v4080_v55 = vcombine.high %v8107_v47, %v3924_v38 }
 0xdca   :  { %v4944_v49 = vpop.xlane.xlu1 %4943  ;;  %6504 = vmatprep.mubr.msk.bf16.mxu0 %vm7264_vm0, %v7263_v0  ;;  %6508 = vmatprep.subr.bf16.mxu1 %v7263_v0  ;;  %v4087_v47 = vrot.slane %v4079_v46, %v7624_v43 }
 0xdcb   :  { %v6743_v42 = vpop.eup %6742  ;;  %v4941_v13 = vpop.xlane.xlu0 %4940  ;;  %6514 = vmatprep.subr.bf16.mxu0 %v7263_v0  ;;  %v4094_v56 = vrot.slane %v4080_v55, %v7624_v43  ;;  %6746 = vrcp.f32 %v4944_v49 }
 0xdcc   :  { %v6745_v52 = vpop.eup %6744  ;;  %v4961_v4 = vmul.f32 %v6743_v42, %v6727_v8  ;;  %6748 = vrcp.f32 %v4941_v13 }
 0xdcd   :  { %v4962_v7 = vmul.f32 %v6745_v52, %v6729_v22 }
 0xdce   :  { %v4969_v9 = vpack.c.bf16 %v4961_v4, %v4961_v4  ;;  %v3936_v62 = vpop.permute.xlu1 %3935 }
 0xdcf   :  { %v4970_v12 = vpack.c.bf16 %v4962_v7, %v4962_v7  ;;  %v4095_v35 = vcombine.low %v8265_v14, %v3936_v62  ;;  %v4096_v63 = vcombine.high %v8265_v14, %v3936_v62  ;;  %v3938_v21 = vpop.permute.xlu0 %3937 }
 0xdd0   :  { %6499 = vmatmul.mubr.msk.bf16.vlgmr.msra.gmra.mrb[64].mxu1 %vm2618_vm4, %v4969_v9  ;;  %v4163_v57 = vcombine.low %v8285_v30, %v3938_v21  ;;  %v4164_v2 = vcombine.high %v8285_v30, %v3938_v21  ;;  %v4162_v30 = vrot.slane %v4148_v27, %v7624_v43 }
 0xdd1   :  { %6505 = vmatmul.mubr.msk.bf16.vlgmr.msra.gmra.mrb[68].mxu0 %vm2618_vm4, %v4970_v12  ;;  %6510 = vmatprep.mubr.msk.bf16.mxu1 %vm7264_vm0, %v7263_v0  ;;  %v4103_v3 = vrot.slane %v4095_v35, %v7624_v43  ;;  %v4110_v14 = vrot.slane %v4096_v63, %v7624_v43 }
 0xdd2   :  { %6516 = vmatprep.mubr.msk.bf16.mxu0 %vm7264_vm0, %v7263_v0  ;;  %v4171_v51 = vrot.slane %v4163_v57, %v7624_v43  ;;  %v4178_v5 = vrot.slane %v4164_v2, %v7624_v43 }
 0xdd3   :  { %v4111_v11 = vcombine.low %v4087_v47, %v4103_v3  ;;  %v4112_v8 = vcombine.high %v4087_v47, %v4103_v3  ;;  %v4127_v22 = vcombine.low %v4094_v56, %v4110_v14  ;;  %v4128_v58 = vcombine.high %v4094_v56, %v4110_v14 }
 0xdd4   :  { %v4179_v18 = vcombine.low %v4155_v17, %v4171_v51  ;;  %v4180_v44 = vcombine.high %v4155_v17, %v4171_v51  ;;  %v4195_v60 = vcombine.low %v4162_v30, %v4178_v5  ;;  %v4196_v32 = vcombine.high %v4162_v30, %v4178_v5 }
 0xdd5   :  { %v4119_v24 = vrot.slane %v4111_v11, %v7626_v50  ;;  %v4126_v28 = vrot.slane %v4112_v8, %v7626_v50  ;;  %v4135_v33 = vrot.slane %v4127_v22, %v7626_v50  ;;  %v4142_v29 = vrot.slane %v4128_v58, %v7626_v50  ;;  %v6747_v57 = vpop.eup %6746 }
 0xdd6   :  { %v4187_v1 = vrot.slane %v4179_v18, %v7626_v50  ;;  %v4194_v48 = vrot.slane %v4180_v44, %v7626_v50  ;;  %v4203_v31 = vrot.slane %v4195_v60, %v7626_v50  ;;  %v4210_v59 = vrot.slane %v4196_v32, %v7626_v50  ;;  %v6749_v3 = vpop.eup %6748 }
 0xdd7   :  { %v4351_v34 = vcombine.low %v4119_v24, %v4126_v28  ;;  %v6134_v38 = vcombine.high %v4119_v24, %v4126_v28  ;;  %v4367_v23 = vcombine.low %v4135_v33, %v4142_v29  ;;  %v6135_v37 = vcombine.high %v4135_v33, %v4142_v29 }
 0xdd8   :  { %v4419_v39 = vcombine.low %v4187_v1, %v4194_v48  ;;  %v6136_v19 = vcombine.high %v4187_v1, %v4194_v48  ;;  %v4435_v49 = vcombine.low %v4203_v31, %v4210_v59  ;;  %v6137_v52 = vcombine.high %v4203_v31, %v4210_v59 }
 0xdd9   :  { %v4358_v20 = vrot.slane %v4351_v34, %v7624_v43  ;;  %v4366_v41 = vrot.slane %v6134_v38, %v7624_v43  ;;  %v4374_v40 = vrot.slane %v4367_v23, %v7624_v43  ;;  %v4382_v45 = vrot.slane %v6135_v37, %v7624_v43 }
 0xdda   :  { %v4426_v53 = vrot.slane %v4419_v39, %v7624_v43  ;;  %v4434_v42 = vrot.slane %v6136_v19, %v7624_v43  ;;  %v4442_v7 = vrot.slane %v4435_v49, %v7624_v43  ;;  %v4450_v10 = vrot.slane %v6137_v52, %v7624_v43 }
 0xddb   :  { %v4383_v4 = vcombine.low %v4358_v20, %v4366_v41  ;;  %v4384_v13 = vcombine.high %v4358_v20, %v4366_v41  ;;  %v4399_v46 = vcombine.low %v4374_v40, %v4382_v45  ;;  %v4400_v9 = vcombine.high %v4374_v40, %v4382_v45 }
 0xddc   :  { %v4451_v55 = vcombine.low %v4426_v53, %v4434_v42  ;;  %v4452_v62 = vcombine.high %v4426_v53, %v4434_v42  ;;  %v4467_v63 = vcombine.low %v4442_v7, %v4450_v10  ;;  %v4468_v21 = vcombine.high %v4442_v7, %v4450_v10 }
 0xddd   :  { %v4391_v27 = vrot.slane %v4383_v4, %v7626_v50  ;;  %v4407_v12 = vrot.slane %v4399_v46, %v7626_v50  ;;  %v4398_v2 = vrot.slane %v4384_v13, %v7626_v50  ;;  %v4414_v47 = vrot.slane %v4400_v9, %v7626_v50 }
 0xdde   :  { %v4459_v35 = vrot.slane %v4451_v55, %v7626_v50  ;;  %v4466_v56 = vrot.slane %v4452_v62, %v7626_v50  ;;  %v4475_v17 = vrot.slane %v4467_v63, %v7626_v50  ;;  %v4482_v51 = vrot.slane %v4468_v21, %v7626_v50 }
 0xddf   :  { %v4415_v14 = vcombine.low %v4391_v27, %v4407_v12  ;;  %v4416_v30 = vcombine.high %v4391_v27, %v4407_v12  ;;  %v4964_v8 = vmul.f32 %v6747_v57, %v8345_v54  ;;  %v4963_v22 = vmul.f32 %v6749_v3, %v8347_v36 }
 0xde0   :  { %v4483_v5 = vcombine.low %v4459_v35, %v4475_v17  ;;  %v4484_v11 = vcombine.high %v4459_v35, %v4475_v17  ;;  %v4417_v58 = vcombine.low %v4398_v2, %v4414_v47  ;;  %v4418_v18 = vcombine.high %v4398_v2, %v4414_v47 }
 0xde1   :  { %v4485_v32 = vcombine.low %v4466_v56, %v4482_v51  ;;  %v4486_v24 = vcombine.high %v4466_v56, %v4482_v51  ;;  %v4971_v28 = vpack.c.bf16 %v4963_v22, %v4963_v22  ;;  %v4972_v33 = vpack.c.bf16 %v4964_v8, %v4964_v8 }
 0xde2   :  { %v4979_v44 = vpack.c.bf16 %v4483_v5, %v4415_v14  ;;  %v4980_v60 = vpack.c.bf16 %v4484_v11, %v4416_v30 }
 0xde3   :  { %v4981_v29 = vpack.c.bf16 %v4485_v32, %v4417_v58  ;;  %v4982_v1 = vpack.c.bf16 %v4486_v24, %v4418_v18 }
 0xde4   :  { %6509 = vmatpush3.bf16.msra.mxu1 %v4979_v44  ;;  %6515 = vmatpush3.bf16.msra.mxu0 %v4980_v60 }
 0xde5   :  { %6520 = vmatprep.subr.bf16.mxu1 %v7263_v0  ;;  %6526 = vmatprep.subr.bf16.mxu0 %v7263_v0 }
 0xde7   :  { %6511 = vmatmul.mubr.msk.bf16.vlgmr.msra.gmra.mrb[68].mxu1 %vm2618_vm4, %v4971_v28  ;;  %6517 = vmatmul.mubr.msk.bf16.vlgmr.msra.gmra.mrb[72].mxu0 %vm2618_vm4, %v4972_v33 }
 0xde8   :  { %6521 = vmatpush3.bf16.msra.mxu1 %v4981_v29  ;;  %6527 = vmatpush3.bf16.msra.mxu0 %v4982_v1 }
 0xde9   :  { %6522 = vmatprep.mubr.msk.bf16.mxu1 %vm7264_vm0, %v7263_v0  ;;  %6528 = vmatprep.mubr.msk.bf16.mxu0 %vm7264_vm0, %v7263_v0 }
 0xdea   :  { %6532 = vmatprep.subr.bf16.mxu1 %v7263_v0  ;;  %6540 = vmatprep.subr.bf16.mxu0 %v7263_v0 }
 0xdff   :  { %v4947_v54 = vpop.xlane.xlu1 %4946 }
 0xe00   :  { %6750 = vrcp.f32 %v4947_v54  ;;  %v4950_v36 = vpop.xlane.xlu0 %4949 }
 0xe01   :  { %6752 = vrcp.f32 %v4950_v36 }
 0xe0a   :  { %v6751_v48 = vpop.eup %6750 }
 0xe0b   :  { %v6753_v31 = vpop.eup %6752  ;;  %v4965_v34 = vmul.f32 %v6751_v48, %v8357_v15 }
 0xe0c   :  { %v4966_v38 = vmul.f32 %v6753_v31, %v8359_v16 }
 0xe0d   :  { %v4973_v23 = vpack.c.bf16 %v4965_v34, %v4965_v34 }
 0xe0e   :  { %v4974_v37 = vpack.c.bf16 %v4966_v38, %v4966_v38 }
 0xe0f   :  { %6523 = vmatmul.mubr.msk.bf16.vlgmr.msra.gmra.mrb[72].mxu1 %vm2618_vm4, %v4973_v23 }
 0xe10   :  { %6529 = vmatmul.mubr.msk.bf16.vlgmr.msra.gmra.mrb[76].mxu0 %vm2618_vm4, %v4974_v37  ;;  %6536 = vmatprep.mubr.msk.bf16.mxu1 %vm7264_vm0, %v7263_v0 }
 0xe11   :  { %6544 = vmatprep.mubr.msk.bf16.mxu0 %vm7264_vm0, %v7263_v0 }
 0xe9a   :  { %v5020_v59 = vpop.f32.mrb[60].mxu1 }
 0xe9b   :  { %v5063_v39 = vpop.f32.mrb[64].mxu0  ;;  %v6488_v19 = vpop.f32.mrb[61].mxu1 }
 0xe9c   :  { %v6494_v20 = vpop.f32.mrb[65].mxu0  ;;  %v5023_v41 = vpop.f32.mrb[62].mxu1 }
 0xe9d   :  { %v5066_v15 = vpop.f32.mrb[66].mxu0  ;;  %v6489_v40 = vpop.f32.mrb[63].mxu1 }
 0xe9e   :  { %v6495_v16 = vpop.f32.mrb[67].mxu0 }
 0xea3   :  { %v5106_v45 = vpop.f32.mrb[64].mxu1 }
 0xea4   :  { %v5327_v53 = vcombine.low %v5020_v59, %v5106_v45  ;;  %v5328_v42 = vcombine.high %v5020_v59, %v5106_v45  ;;  %v5149_v49 = vpop.f32.mrb[68].mxu0  ;;  %v6500_v52 = vpop.f32.mrb[65].mxu1 }
 0xea5   :  { %v5343_v4 = vcombine.low %v5063_v39, %v5149_v49  ;;  %v5344_v13 = vcombine.high %v5063_v39, %v5149_v49  ;;  %v6506_v7 = vpop.f32.mrb[69].mxu0  ;;  %v5109_v46 = vpop.f32.mrb[66].mxu1 }
 0xea6   :  { %v5335_v55 = vrot.slane %v5327_v53, %v7624_v43  ;;  %v5342_v9 = vrot.slane %v5328_v42, %v7624_v43  ;;  %v5152_v10 = vpop.f32.mrb[70].mxu0  ;;  %v6501_v27 = vpop.f32.mrb[67].mxu1 }
 0xea7   :  { %v5351_v62 = vrot.slane %v5343_v4, %v7624_v43  ;;  %v5358_v12 = vrot.slane %v5344_v13, %v7624_v43  ;;  %v6507_v35 = vpop.f32.mrb[71].mxu0 }
 0xea9   :  { %v5359_v63 = vcombine.low %v5335_v55, %v5351_v62  ;;  %v5360_v21 = vcombine.high %v5335_v55, %v5351_v62  ;;  %v5375_v57 = vcombine.low %v5342_v9, %v5358_v12  ;;  %v5376_v2 = vcombine.high %v5342_v9, %v5358_v12 }
 0xeab   :  { %v5367_v47 = vrot.slane %v5359_v63, %v7626_v50  ;;  %v5374_v56 = vrot.slane %v5360_v21, %v7626_v50  ;;  %v5383_v3 = vrot.slane %v5375_v57, %v7626_v50  ;;  %v5390_v14 = vrot.slane %v5376_v2, %v7626_v50 }
 0xead   :  { %v5463_v17 = vcombine.low %v5367_v47, %v5374_v56  ;;  %v6154_v30 = vcombine.high %v5367_v47, %v5374_v56  ;;  %v5479_v51 = vcombine.low %v5383_v3, %v5390_v14  ;;  %v6155_v5 = vcombine.high %v5383_v3, %v5390_v14  ;;  %v6674_v14 = vld [vmem:[#allocation26] sm:$0xff]  }
 0xeae   :  { %6533 = vmatpush3.bf16.msra.mxu1 %v6674_v14 }
 0xeaf   :  { %v5470_v11 = vrot.slane %v5463_v17, %v7624_v43  ;;  %v5478_v8 = vrot.slane %v6154_v30, %v7624_v43  ;;  %v5486_v22 = vrot.slane %v5479_v51, %v7624_v43  ;;  %v5494_v58 = vrot.slane %v6155_v5, %v7624_v43  ;;  %6534 = vmatprep.subr.bf16.mxu1 %v7263_v0 }
 0xeb1   :  { %v5496_v18 = vcombine.high %v5470_v11, %v5478_v8  ;;  %v5512_v44 = vcombine.high %v5486_v22, %v5494_v58  ;;  %v5495_v60 = vcombine.low %v5470_v11, %v5478_v8  ;;  %v5511_v32 = vcombine.low %v5486_v22, %v5494_v58 }
 0xeb3   :  { %v8454_v24 = vrot.slane %v5496_v18, %v7626_v50  ;;  %v8457_v28 = vrot.slane %v5512_v44, %v7626_v50  ;;  %v8460_v33 = vrot.slane %v5495_v60, %v7626_v50  ;;  %v8463_v29 = vrot.slane %v5511_v32, %v7626_v50 }
 0xeb5   :  { %v5529_v1 = vcombine.low %v8454_v24, %v8457_v28  ;;  %v5527_v54 = vcombine.low %v8460_v33, %v8463_v29  ;;  %v5528_v36 = vcombine.high %v8460_v33, %v8463_v29  ;;  %v5530_v48 = vcombine.high %v8454_v24, %v8457_v28  ;;  %v6675_v24 = vld [vmem:[#allocation26 + $0x8] sm:$0xff]   ;;  %v6158_v33 = vld [vmem:[#allocation28] ss:$0 sm:$0xff] }
 0xeb6   :  { %6535 = vmatpush3.bf16.msra.mxu1 %v6675_v24 }
 0xeb7   :  { %6548 = vmatprep.subr.bf16.mxu1 %v7263_v0 }
 0xeba   :  { %v5192_v31 = vpop.f32.mrb[68].mxu1  ;;  %v5235_v34 = vpop.f32.mrb[72].mxu0 }
 0xebb   :  { %v6512_v38 = vpop.f32.mrb[69].mxu1  ;;  %v6518_v23 = vpop.f32.mrb[73].mxu0 }
 0xebc   :  { %v5195_v37 = vpop.f32.mrb[70].mxu1  ;;  %v5238_v59 = vpop.f32.mrb[74].mxu0 }
 0xebd   :  { %v6513_v39 = vpop.f32.mrb[71].mxu1  ;;  %v6519_v19 = vpop.f32.mrb[75].mxu0 }
 0xee2   :  { %v5278_v20 = vpop.f32.mrb[72].mxu1 }
 0xee3   :  { %v5395_v41 = vcombine.low %v5192_v31, %v5278_v20  ;;  %v5396_v15 = vcombine.high %v5192_v31, %v5278_v20  ;;  %v5321_v40 = vpop.f32.mrb[76].mxu0  ;;  %v6524_v16 = vpop.f32.mrb[73].mxu1 }
 0xee4   :  { %v5411_v45 = vcombine.low %v5235_v34, %v5321_v40  ;;  %v5412_v53 = vcombine.high %v5235_v34, %v5321_v40  ;;  %v6530_v42 = vpop.f32.mrb[77].mxu0  ;;  %v5281_v49 = vpop.f32.mrb[74].mxu1 }
 0xee5   :  { %v5403_v52 = vrot.slane %v5395_v41, %v7624_v43  ;;  %v5410_v4 = vrot.slane %v5396_v15, %v7624_v43  ;;  %v5324_v13 = vpop.f32.mrb[78].mxu0  ;;  %v6525_v7 = vpop.f32.mrb[75].mxu1 }
 0xee6   :  { %v5419_v46 = vrot.slane %v5411_v45, %v7624_v43  ;;  %v5426_v55 = vrot.slane %v5412_v53, %v7624_v43  ;;  %v6531_v9 = vpop.f32.mrb[79].mxu0 }
 0xee8   :  { %v5427_v10 = vcombine.low %v5403_v52, %v5419_v46  ;;  %v5428_v27 = vcombine.high %v5403_v52, %v5419_v46  ;;  %v5443_v62 = vcombine.low %v5410_v4, %v5426_v55  ;;  %v5444_v12 = vcombine.high %v5410_v4, %v5426_v55 }
 0xeea   :  { %v5435_v35 = vrot.slane %v5427_v10, %v7626_v50  ;;  %v5442_v63 = vrot.slane %v5428_v27, %v7626_v50  ;;  %v5451_v21 = vrot.slane %v5443_v62, %v7626_v50  ;;  %v5458_v57 = vrot.slane %v5444_v12, %v7626_v50 }
 0xeec   :  { %v5531_v2 = vcombine.low %v5435_v35, %v5442_v63  ;;  %v6156_v47 = vcombine.high %v5435_v35, %v5442_v63  ;;  %v5547_v56 = vcombine.low %v5451_v21, %v5458_v57  ;;  %v6157_v3 = vcombine.high %v5451_v21, %v5458_v57 }
 0xeee   :  { %v5538_v17 = vrot.slane %v5531_v2, %v7624_v43  ;;  %v5546_v30 = vrot.slane %v6156_v47, %v7624_v43  ;;  %v5554_v51 = vrot.slane %v5547_v56, %v7624_v43  ;;  %v5562_v5 = vrot.slane %v6157_v3, %v7624_v43 }
 0xef0   :  { %v5564_v11 = vcombine.high %v5538_v17, %v5546_v30  ;;  %v5580_v8 = vcombine.high %v5554_v51, %v5562_v5  ;;  %v5563_v22 = vcombine.low %v5538_v17, %v5546_v30  ;;  %v5579_v58 = vcombine.low %v5554_v51, %v5562_v5 }
 0xef2   :  { %v5578_v18 = vrot.slane %v5564_v11, %v7626_v50  ;;  %v5594_v44 = vrot.slane %v5580_v8, %v7626_v50  ;;  %v5571_v60 = vrot.slane %v5563_v22, %v7626_v50  ;;  %v5587_v32 = vrot.slane %v5579_v58, %v7626_v50  ;;  %v6162_v8 = vld [vmem:[#allocation29] ss:$0 sm:$0xff]  ;;  %v6163_v58 = vld [vmem:[%s8596_s12] ss:$0 sm:$0xff] }
 0xef4   :  { %v5597_v28 = vcombine.low %v5578_v18, %v5594_v44  ;;  %v5596_v31 = vcombine.high %v5571_v60, %v5587_v32  ;;  %v5595_v34 = vcombine.low %v5571_v60, %v5587_v32  ;;  %v5598_v43 = vcombine.high %v5578_v18, %v5594_v44 }
 0xef6   :  { %v6650_v38 = vpack.i.bf16 %v5597_v28, %v5529_v1  ;;  %v6645_v23 = vpack.i.bf16 %v5596_v31, %v5528_v36  ;;  %v6655_v37 = vpack.i.bf16 %v5598_v43, %v5530_v48 }
 0xef8   :  { %6651 = vrot.lane.b32.xlu1 %v6650_v38, %s7270_s16  ;;  %6646 = vrot.lane.b32.xlu0 %v6645_v23, %s7271_s9 }
 0xefc   :  { %6656 = vrot.lane.b32.xlu1 %v6655_v37, %s7272_s30 }
 0xf6a   :  { %v6652_v59 = vpop.permute.xlu1 %6651  ;;  %v6647_v39 = vpop.permute.xlu0 %6646 }
 0xf6b   :  { %v6649_v50 = vunpack.i.h.bf16 %v6647_v39  ;;  %v6648_v19 = vunpack.i.l.bf16 %v6647_v39  ;;  %v6654_v20 = vunpack.i.h.bf16 %v6652_v59  ;;  %v6653_v41 = vunpack.i.l.bf16 %v6652_v59 }
 0xf6d   :  { %v5623_v15 = vsel %vm1470_vm2, %v5527_v54, %v6648_v19  ;;  %v5624_v1 = vsel %vm1470_vm2, %v5595_v34, %v6649_v50 }
 0xf6e   :  { %v6657_v36 = vpop.permute.xlu1 %6656  ;;  %v5625_v16 = vsel %vm2618_vm4, %v5623_v15, %v6653_v41  ;;  %v5626_v45 = vsel %vm2618_vm4, %v5624_v1, %v6654_v20  ;;  %v6677_v1 = vld [vmem:[%s8597_s26 + $0x8] sm:$0xff]  }
 0xf6f   :  { %v6659_v48 = vunpack.i.h.bf16 %v6657_v36  ;;  %v6658_v40 = vunpack.i.l.bf16 %v6657_v36  ;;  %v6678_v36 = vld [vmem:[%s8598_s3] sm:$0xff]  }
 0xf71   :  { %v5627_v53 = vsel %vm2621_vm5, %v5625_v16, %v6658_v40  ;;  %v5628_v42 = vsel %vm2621_vm5, %v5626_v45, %v6659_v48  ;;  %v6679_v48 = vld [vmem:[%s8598_s3 + $0x8] sm:$0xff]  }
 0xf72   :  { %v5629_v49 = vpack.c.bf16 %v5628_v42, %v5627_v53 }
 0xf74   :  { %6537 = vmatmul.mubr.msk.bf16.vlgmr.msra.gmra.mrb[76].mxu1 %vm413_vm1, %v5629_v49 }
 0xf75   :  { %6556 = vmatprep.mubr.msk.bf16.mxu1 %vm7264_vm0, %v7263_v0  ;;  %6549 = vmatpush3.bf16.msra.mxu1 %v6678_v36 }
 0xf76   :  { %6550 = vmatprep.subr.bf16.mxu1 %v7263_v0 }
 0xf79   :  { %6551 = vmatpush3.bf16.msra.mxu1 %v6679_v48 }
 0xf7a   :  { %6552 = vmatprep.subr.bf16.mxu1 %v7263_v0 }
0x1047   :  { %v5685_v29 = vpop.f32.mrb[76].mxu1 }
0x1048   :  { %v5686_v54 = vadd.f32 %v6158_v33, %v5685_v29  ;;  %v6538_v52 = vpop.f32.mrb[77].mxu1  ;;  %v6164_v29 = vld [vmem:[%s8599_s28] ss:$0 sm:$0xff] }
0x1049   :  { %v5688_v4 = vpop.f32.mrb[78].mxu1 }
0x104a   :  { %v5689_v13 = vadd.f32 %v6158_v33, %v5688_v4  ;;  %v6539_v7 = vpop.f32.mrb[79].mxu1  ;;  %v5692_v46 = vadd.f32 %v5686_v54, %v8030_v25 }
0x104c   :  { %v5693_v55 = vadd.f32 %v5689_v13, %v8033_v6  ;;  %v5696_v9 = vsel %vm413_vm1, %v5692_v46, 0.0  ;;  %v6165_v13 = vld [vmem:[%s8600_s29] ss:$0 sm:$0xff] }
0x104d   :  { %5697 = vadd.xlane.f32.xlu0 %v5696_v9 }
0x104e   :  { %v5699_v10 = vsel %vm413_vm1, %v5693_v55, 0.0 }
0x104f   :  { %5700 = vadd.xlane.f32.xlu1 %v5699_v10 }
0x10da   :  { %v5698_v27 = vpop.xlane.xlu0 %5697 }
0x10db   :  { %v5702_v62 = vmul.f32 0.03125, %v5698_v27 }
0x10dc   :  { %v5701_v12 = vpop.xlane.xlu1 %5700 }
0x10dd   :  { %v5704_v35 = vsub.f32 %v5692_v46, %v5702_v62  ;;  %v5703_v63 = vmul.f32 0.03125, %v5701_v12  ;;  %v6680_v12 = vld [vmem:[%s8598_s3 + $0x10] sm:$0xff]  }
0x10de   :  { %6553 = vmatpush3.bf16.msra.mxu1 %v6680_v12 }
0x10df   :  { %v5705_v21 = vsub.f32 %v5693_v55, %v5703_v63  ;;  %v5706_v57 = vmul.f32 %v5704_v35, %v5704_v35  ;;  %6554 = vmatprep.subr.bf16.mxu1 %v7263_v0  ;;  %v6166_v63 = vld [vmem:[%s8601_s0] ss:$0 sm:$0xff] }
0x10e1   :  { %v5708_v2 = vsel %vm413_vm1, %v5706_v57, 0.0  ;;  %v5707_v47 = vmul.f32 %v5705_v21, %v5705_v21 }
0x10e2   :  { %5709 = vadd.xlane.f32.xlu0 %v5708_v2 }
0x10e3   :  { %v5711_v56 = vsel %vm413_vm1, %v5707_v47, 0.0 }
0x10e6   :  { %5712 = vadd.xlane.f32.xlu0 %v5711_v56 }
0x116f   :  { %v5710_v3 = vpop.xlane.xlu0 %5709 }
0x1170   :  { %v5714_v14 = vmul.f32 0.03125, %v5710_v3 }
0x1172   :  { %v5716_v17 = vadd.f32 1e-05, %v5714_v14 }
0x1173   :  { %v5713_v30 = vpop.xlane.xlu0 %5712 }
0x1174   :  { %6754 = vrsqrt.f32 %v5716_v17  ;;  %v5715_v51 = vmul.f32 0.03125, %v5713_v30 }
0x1176   :  { %v5717_v5 = vadd.f32 1e-05, %v5715_v51  ;;  %v6170_v51 = vld [vmem:[%s7444_s25] ss:$0 sm:$0xff]  ;;  %s7274_s25 = smov [#allocation31]  }
0x1177   :  { %s5996_s8 = sshll.u32 %s7274_s25, 4  ;;  %s5997_s8 = int_to_ptr.vmem [resolvable:$true] %s5996_s8 }
0x1178   :  { %6756 = vrsqrt.f32 %v5717_v5  ;;  %p7169_p5 = scmp.lt.s32.totalorder %s5997_s8, %s5997_s8 }
0x117e   :  { %v6755_v11 = vpop.eup %6754 }
0x117f   :  { %v5720_v22 = vmul.f32 %v6755_v11, %v5704_v35  ;;  %v6681_v35 = vld [vmem:[%s8598_s3 + $0x18] sm:$0xff]  }
0x1180   :  { %6555 = vmatpush3.bf16.msra.mxu1 %v6681_v35 }
0x1181   :  { %v5728_v18 = vmul.f32 %v6162_v8, %v5720_v22 }
0x1182   :  { %v6757_v44 = vpop.eup %6756 }
0x1183   :  { %v5736_v60 = vadd.f32 %v6163_v58, %v5728_v18  ;;  %v5721_v32 = vmul.f32 %v6757_v44, %v5705_v21 }
0x1185   :  { %v5738_v24 = vadd.f32 %v5736_v60, %v8030_v25  ;;  %v5729_v28 = vmul.f32 %v6162_v8, %v5721_v32 }
0x1187   :  { %v5742_v31 = vsel %vm413_vm1, %v5738_v24, 0.0  ;;  %v5737_v34 = vadd.f32 %v6163_v58, %v5729_v28 }
0x1188   :  { %5743 = vadd.xlane.f32.xlu1 %v5742_v31 }
0x1189   :  { %v5739_v43 = vadd.f32 %v5737_v34, %v8033_v6  ;;  %v6676_v6 = vld [vmem:[%s8597_s26] sm:$0xff]  }
0x118a   :  { %6541 = vmatpush3.bf16.msra.mxu0 %v6676_v6 }
0x118b   :  { %v5745_v38 = vsel %vm413_vm1, %v5739_v43, 0.0  ;;  %6542 = vmatprep.subr.bf16.mxu0 %v7263_v0 }
0x118c   :  { %5746 = vadd.xlane.f32.xlu0 %v5745_v38 }
0x118e   :  { %6543 = vmatpush3.bf16.msra.mxu0 %v6677_v1  ;;  %v6176_v1 = vld [vmem:[%s7449_s4] ss:$0 sm:$0xff]  ;;  %s7164_s4 = scalar_lea.vmem %s5997_s8, 256 }
0x118f   :  { %p7165_p4 = scmp.ne.s32.totalorder %s5997_s8, %s7164_s4  ;;  %p7170_p6 = scmp.lt.s32.totalorder %s7164_s4, %s7164_s4 }
0x1191   :  { %p7171_p7 = por %p7170_p6, %p7169_p5 }
0x1193   :  { %p7172_p8 = pnand %p7171_p7, %p7165_p4 }
0x1215   :  { %v5744_v23 = vpop.xlane.xlu1 %5743 }
0x1216   :  { %v5748_v37 = vmul.f32 0.03125, %v5744_v23 }
0x1218   :  { %v5750_v59 = vsub.f32 %v5738_v24, %v5748_v37 }
0x1219   :  { %v5747_v39 = vpop.xlane.xlu0 %5746 }
0x121a   :  { %v5749_v50 = vmul.f32 0.03125, %v5747_v39  ;;  %v5752_v25 = vmul.f32 %v5750_v59, %v5750_v59 }
0x121c   :  { %v5751_v19 = vsub.f32 %v5739_v43, %v5749_v50  ;;  %v5754_v20 = vsel %vm413_vm1, %v5752_v25, 0.0 }
0x121d   :  { %5755 = vadd.xlane.f32.xlu1 %v5754_v20 }
0x121e   :  { %v5753_v41 = vmul.f32 %v5751_v19, %v5751_v19 }
0x1220   :  { %v5757_v15 = vsel %vm413_vm1, %v5753_v41, 0.0 }
0x1221   :  { %5758 = vadd.xlane.f32.xlu0 %v5757_v15 }
0x12aa   :  { %v5756_v40 = vpop.xlane.xlu1 %5755 }
0x12ab   :  { %v5760_v16 = vmul.f32 0.03125, %v5756_v40  ;;  %v6177_v40 = vld [vmem:[%s7454_s5] ss:$0 sm:$0xff] }
0x12ad   :  { %v5762_v45 = vadd.f32 1e-05, %v5760_v16 }
0x12ae   :  { %v5759_v53 = vpop.xlane.xlu0 %5758 }
0x12af   :  { %6758 = vrsqrt.f32 %v5762_v45  ;;  %v5761_v42 = vmul.f32 0.03125, %v5759_v53 }
0x12b1   :  { %v5763_v49 = vadd.f32 1e-05, %v5761_v42 }
0x12b3   :  { %6760 = vrsqrt.f32 %v5763_v49 }
0x12b9   :  { %v6759_v33 = vpop.eup %6758 }
0x12ba   :  { %v5766_v54 = vmul.f32 %v6759_v33, %v5750_v59 }
0x12bc   :  { %v5774_v52 = vmul.f32 %v6164_v29, %v5766_v54 }
0x12bd   :  { %v6761_v4 = vpop.eup %6760 }
0x12be   :  { %v5767_v7 = vmul.f32 %v6761_v4, %v5751_v19  ;;  %v5782_v55 = vadd.f32 %v6165_v13, %v5774_v52 }
0x12c0   :  { %v5775_v46 = vmul.f32 %v6164_v29, %v5767_v7  ;;  %v5784_v10 = vmul.f32 %v5782_v55, %v8025_v26 }
0x12c2   :  { %v5783_v9 = vadd.f32 %v6165_v13, %v5775_v46 }
0x12c4   :  { %v5785_v27 = vmul.f32 %v5783_v9, %v8027_v61 }
0x12c6   :  { %v5786_v62 = vpack.c.bf16 %v5785_v27, %v5784_v10 }
0x12c8   :  { %6545 = vmatmul.mubr.msk.bf16.vlgmr.msra.gmra.mrb[80].mxu0 %vm413_vm1, %v5786_v62 }
0x139b   :  { %v5847_v21 = vpop.f32.mrb[80].mxu0 }
0x139c   :  { %v5848_v57 = vadd.f32 %v6166_v63, %v5847_v21  ;;  %v6546_v2 = vpop.f32.mrb[81].mxu0 }
0x139d   :  { %v5850_v47 = vpop.f32.mrb[82].mxu0 }
0x139e   :  { %v5851_v56 = vadd.f32 %v6166_v63, %v5850_v47  ;;  %v6547_v3 = vpop.f32.mrb[83].mxu0  ;;  %v5854_v14 = vmax.f32 %v5848_v57, 0.0 }
0x13a0   :  { %v5855_v17 = vmax.f32 %v5851_v56, 0.0 }
0x13a2   :  { %v5856_v30 = vpack.c.bf16 %v5855_v17, %v5854_v14 }
0x13a4   :  { %6557 = vmatmul.mubr.msk.bf16.vlgmr.msra.gmra.mrb[80].mxu1 %vm5896_vm6, %v5856_v30 }
0x1477   :  { %v5934_v5 = vpop.f32.mrb[80].mxu1 }
0x1478   :  { %v5935_v11 = vadd.f32 %v6170_v51, %v5934_v5  ;;  %v6558_v8 = vpop.f32.mrb[81].mxu1 }
0x1479   :  { %v5937_v22 = vpop.f32.mrb[82].mxu1 }
0x147a   :  { %v5941_v58 = vadd.f32 %v5935_v11, %v5784_v10  ;;  %v5938_v0 = vadd.f32 %v6170_v51, %v5937_v22  ;;  %v6559_v18 = vpop.f32.mrb[83].mxu1 }
0x147c   :  { %v5942_v44 = vadd.f32 %v5938_v0, %v5785_v27  ;;  %v5945_v60 = vsel %vm413_vm1, %v5941_v58, 0.0 }
0x147d   :  { %5946 = vadd.xlane.f32.xlu1 %v5945_v60 }
0x147e   :  { %v5948_v32 = vsel %vm413_vm1, %v5942_v44, 0.0 }
0x147f   :  { %5949 = vadd.xlane.f32.xlu0 %v5948_v32 }
0x150a   :  { %v5947_v24 = vpop.xlane.xlu1 %5946 }
0x150b   :  { %v5951_v28 = vmul.f32 0.03125, %v5947_v24 }
0x150c   :  { %v5950_v31 = vpop.xlane.xlu0 %5949 }
0x150d   :  { %v5953_v34 = vsub.f32 %v5941_v58, %v5951_v28  ;;  %v5952_v43 = vmul.f32 0.03125, %v5950_v31 }
0x150f   :  { %v5954_v38 = vsub.f32 %v5942_v44, %v5952_v43  ;;  %v5955_v23 = vmul.f32 %v5953_v34, %v5953_v34 }
0x1511   :  { %v5957_v37 = vsel %vm413_vm1, %v5955_v23, 0.0  ;;  %v5956_v59 = vmul.f32 %v5954_v38, %v5954_v38 }
0x1512   :  { %5958 = vadd.xlane.f32.xlu1 %v5957_v37 }
0x1513   :  { %v5960_v39 = vsel %vm413_vm1, %v5956_v59, 0.0 }
0x1514   :  { %5961 = vadd.xlane.f32.xlu0 %v5960_v39 }
0x159f   :  { %v5959_v50 = vpop.xlane.xlu1 %5958 }
0x15a0   :  { %v5963_v25 = vmul.f32 0.03125, %v5959_v50 }
0x15a1   :  { %v5962_v19 = vpop.xlane.xlu0 %5961 }
0x15a2   :  { %v5965_v20 = vadd.f32 1e-05, %v5963_v25  ;;  %v5964_v41 = vmul.f32 0.03125, %v5962_v19 }
0x15a4   :  { %6762 = vrsqrt.f32 %v5965_v20  ;;  %v5966_v15 = vadd.f32 1e-05, %v5964_v41 }
0x15a6   :  { %6764 = vrsqrt.f32 %v5966_v15 }
0x15ae   :  { %v6763_v6 = vpop.eup %6762 }
0x15af   :  { %v5969_v36 = vmul.f32 %v6763_v6, %v5953_v34 }
0x15b0   :  { %v6765_v48 = vpop.eup %6764 }
0x15b1   :  { %v5977_v16 = vmul.f32 %v6176_v1, %v5969_v36  ;;  %v5970_v45 = vmul.f32 %v6765_v48, %v5954_v38 }
0x15b3   :  { %v5978_v53 = vmul.f32 %v6176_v1, %v5970_v45  ;;  %v5985_v42 = vadd.f32 %v6177_v40, %v5977_v16 }
0x15b5   :  { %v5986_v49 = vadd.f32 %v6177_v40, %v5978_v53  ;;  %v5987_v33 = vmul.f32 %v5985_v42, %v8025_v26 }
0x15b7   :  { %v5988_v29 = vmul.f32 %v5986_v49, %v8027_v61  ;;  %5989 = vst.msk [vmem:[#allocation31] sm:$0xff] %vm413_vm1, %v5987_v33 }
0x15b9   :  { %5990 = vst.msk [vmem:[#allocation31 + $0x8] sm:$0xff] %vm413_vm1, %v5988_v29 }
0x15ba   :  { %7175 = shalt.err (!%p7172_p8)
}
0x15bb   :  { %s7176_s5 = scalar_lea.hbm %s7459_s21, 256 }
0x15bc   :  { %p7177_p9 = scmp.ne.s32.totalorder %s7459_s21, %s7176_s5  ;;  %p7180_p10 = scmp.lt.u32.totalorder %s7176_s5, %s7459_s21 }
0x15be   :  { %p7182_p11 = pnand %p7180_p10, %p7177_p9 }
0x15c0   :  { %7185 = shalt.err (!%p7182_p11)
}
0x15c1   :  { %s7275_s1 = smov 128  }
0x15c2   :  { %6002 = dma.vmem_to_hbm [thread:$0]  %s5997_s8, 256, %s7459_s21, [#allocation4], %s7275_s1, %s7275_s1, %s7271_s9  }
0x15c3   :  { %7206 = dma.done.wait [#allocation4], 256  }
0x15c4   :  { %7207 = vsyncadd [#allocation4], 4294967040 }
0x15c5   :  { %6006 = vsyncpa [#allocation3], 1 }
0x15c6   :  { %6007 = vsyncpa [#allocation6], 1 }
0x15c7   :  { %6008 = vsyncpa [#allocation9], 1 }
0x15c8   :  { %6009 = vsyncpa [#allocation12], 1 }
0x15c9   :  { %6010 = vsyncpa [#allocation15], 1 }
0x15ca   :  { %6011 = vsyncpa [#allocation18], 1 }
0x15cb   :  { %6012 = vsyncpa [#allocation21], 1 }
0x15cc   :  { %6013 = vsyncpa [#allocation24], 1 }
0x15cd   :  { %6014 = vsyncpa [#allocation27], 1 }
0x15ce   :  { %6015 = vsyncpa [#allocation30], 1 }
0x15cf   :  { %6016 = vsyncpa [#allocation4], 1 }

</bundles_post_ra>
